<compile_context>
chip_gen: v5e
topology: v5e:2x2
jax: 0.10.0
libtpu: 0.0.40
codegen_flags: <defaults>
</compile_context>

<pallas_src>
import math

import jax
import jax.numpy as jnp
from jax.experimental import pallas as pl
from jax.experimental.pallas import tpu as pltpu


def resisc45_fused_kernel(x_ref, w1_ref, b1_ref, w2_ref, b2_ref, w3_ref, b3_ref,
                          o_ref, pad1_ref, pad2_ref, pad3_ref):
    """Fused 3x[Conv3x3(pad=1) + bias + ReLU + MaxPool2x2] for a block of Bt images.

    x_ref:  (Bt, H, 3*H)               lane-dense NHWC slab (x,c merged on the lane axis)
    wN_ref: (9*Cin, Cout)              im2col conv weights, row = (dy*3+dx)*Cin + ci
    bN_ref: (1, Cout)                  bias
    o_ref:  (Bt, H//8, (H//8)*64)      lane-dense output slab ((x,c) merged)
    padN_ref: (Bt, h+2, w+9, Cin)      VMEM padded activation scratch; interior lives at
              rows [1, h], cols [8, 8+w) (sublane-aligned store); left/right zero pads are
              cols 7 / w+8, top/bottom zero pads are rows 0 / h+1.
    """

    def conv3x3_relu_pool(x, pad_ref, w_ref, b_ref):
        bt, h, w, cin = x.shape
        cout = w_ref.shape[-1]
        wp = pad_ref.shape[2]                      # = w + 9

        # --- zero ONLY the halo cells that the taps read (no full-buffer zeroing) ---
        zrow = jnp.zeros((bt, 1, wp, cin), jnp.float32)
        pad_ref[:, 0:1, :, :] = zrow               # top halo row
        pad_ref[:, h + 1:h + 2, :, :] = zrow       # bottom halo row
        zcol = jnp.zeros((bt, h + 2, 1, cin), jnp.float32)
        pad_ref[:, :, 7:8, :] = zcol               # left halo column
        pad_ref[:, :, 8 + w:9 + w, :] = zcol       # right halo column

        # --- interior store at a sublane-aligned column offset (8) ---
        pad_ref[:, 1:h + 1, 8:8 + w, :] = x

        # --- im2col straight from the ref: ONE matmul with K = 9*Cin ---
        taps = [pad_ref[:, dy:dy + h, 7 + dx:7 + dx + w, :]
                for dy in range(3) for dx in range(3)]
        xcol = jnp.concatenate(taps, axis=-1).reshape(bt * h * w, 9 * cin)
        acc = jnp.dot(xcol, w_ref[...], preferred_element_type=jnp.float32)

        # --- bias + ReLU + 2x2/2 max-pool (4-D view, no 2D<->4D round trips) ---
        a = jnp.maximum(acc + b_ref[...], 0.0).reshape(bt, h // 2, 2, w, cout)
        a = jnp.maximum(a[:, :, 0], a[:, :, 1])                # pool over y
        a = a.reshape(bt, h // 2, w // 2, 2, cout)
        a = jnp.maximum(a[:, :, :, 0], a[:, :, :, 1])          # pool over x
        return a                                               # (bt, h/2, w/2, cout)

    bt, f = x_ref.shape[0], x_ref.shape[1]
    x = x_ref[...].reshape(bt, f, f, 3)                        # unpack lane-dense slab
    x = conv3x3_relu_pool(x, pad1_ref, w1_ref, b1_ref)         # (bt, f/2, f/2, 16)
    x = conv3x3_relu_pool(x, pad2_ref, w2_ref, b2_ref)         # (bt, f/4, f/4, 32)
    x = conv3x3_relu_pool(x, pad3_ref, w3_ref, b3_ref)         # (bt, f/8, f/8, 64)
    ho = x.shape[1]
    o_ref[...] = x.reshape(bt, ho, ho * 64).astype(o_ref.dtype)   # lane-dense writeback


def _round_up(x, m):
    return (x + m - 1) // m * m


def _vmem_capacity_bytes():
    try:
        return int(pltpu.get_tpu_info().vmem_capacity_bytes)
    except Exception:
        return 64 << 20          # conservative (v7x per-TC) fallback


def _vmem_bytes_estimate(bt, f):
    """Rough VMEM footprint (lane pads to 128, sublane to 8) for batch tile `bt`."""
    total = 0
    for h, _c in ((f, 3), (f // 2, 16), (f // 4, 32)):         # pad scratch (single-buffered)
        total += bt * (h + 2) * _round_up(h + 9, 8) * 128 * 4
    total += 2 * bt * _round_up(f, 8) * _round_up(3 * f, 128) * 4       # input block x2
    ho = f // 8
    total += 2 * bt * _round_up(ho, 8) * _round_up(ho * 64, 128) * 4    # output block x2
    total += bt * f * f * 128 * 4                                       # im2col LHS (layer 1)
    total += bt * f * f * 128 * 4                                       # conv1 result
    return total


def _pick_batch_tile(batch, f, budget):
    """Largest divisor of `batch` that fits the VMEM budget and keeps >= min(4,batch) steps."""
    divisors = [d for d in range(1, batch + 1) if batch % d == 0]
    target_steps = min(4, batch)
    best = 0
    for bt in divisors:
        if _vmem_bytes_estimate(bt, f) <= budget and batch // bt >= target_steps:
            best = max(best, bt)
    if best == 0:
        for bt in divisors:
            if _vmem_bytes_estimate(bt, f) <= budget:
                best = max(best, bt)
    return max(best, 1)


def _prep_conv_weight(w_oihw):
    """OIHW (Cout, Cin, 3, 3) -> (9*Cin, Cout); row = (dy*3+dx)*Cin + ci (matches im2col)."""
    cout, cin = w_oihw.shape[0], w_oihw.shape[1]
    return jnp.transpose(w_oihw, (2, 3, 1, 0)).reshape(9 * cin, cout)


def resisc45_cnn_forward(x_nchw, params):
    """Full RESISC45Cnn forward. x_nchw: (B, 3, f, f) -> (B, 64*(f//8)**2)."""
    bsz, cin0, f, f2 = x_nchw.shape
    assert f == f2 and f % 8 == 0, "RESISC45Cnn requires square input with f divisible by 8"
    assert cin0 == 3

    (w1, b1), (w2, b2), (w3, b3) = params
    w1k, b1k = _prep_conv_weight(w1), b1.reshape(1, -1)
    w2k, b2k = _prep_conv_weight(w2), b2.reshape(1, -1)
    w3k, b3k = _prep_conv_weight(w3), b3.reshape(1, -1)

    # NCHW -> NHWC -> lane-dense (B, f, 3*f) slab for contiguous HBM->VMEM DMA rows.
    x = jnp.transpose(x_nchw, (0, 2, 3, 1)).astype(jnp.float32).reshape(bsz, f, 3 * f)

    cap = _vmem_capacity_bytes()
    budget = max(min(cap * 3 // 4, 100 << 20), 24 << 20)
    bt = _pick_batch_tile(bsz, f, budget)
    hout = f // 8

    out_slab = pl.pallas_call(
        resisc45_fused_kernel,
        out_shape=jax.ShapeDtypeStruct((bsz, hout, hout * 64), jnp.float32),
        grid=(bsz // bt,),
        in_specs=[
            pl.BlockSpec((bt, f, 3 * f), lambda i: (i, 0, 0)),
            pl.BlockSpec(w1k.shape, lambda i: (0, 0)),
            pl.BlockSpec(b1k.shape, lambda i: (0, 0)),
            pl.BlockSpec(w2k.shape, lambda i: (0, 0)),
            pl.BlockSpec(b2k.shape, lambda i: (0, 0)),
            pl.BlockSpec(w3k.shape, lambda i: (0, 0)),
            pl.BlockSpec(b3k.shape, lambda i: (0, 0)),
        ],
        out_specs=pl.BlockSpec((bt, hout, hout * 64), lambda i: (i, 0, 0)),
        scratch_shapes=[
            pltpu.VMEM((bt, f + 2, f + 9, 3), jnp.float32),
            pltpu.VMEM((bt, f // 2 + 2, f // 2 + 9, 16), jnp.float32),
            pltpu.VMEM((bt, f // 4 + 2, f // 4 + 9, 32), jnp.float32),
        ],
        compiler_params=pltpu.CompilerParams(
            dimension_semantics=("parallel",),
            vmem_limit_bytes=int(budget),
        ),
    )(x, w1k, b1k, w2k, b2k, w3k, b3k)

    # Tiny tensor: NHWC -> NCHW, then Flatten(1, -1) exactly like nn.Flatten after the convs.
    out = out_slab.reshape(bsz, hout, hout, 64)
    out = jnp.transpose(out, (0, 3, 1, 2))
    return out.reshape(bsz, -1)


def init_params(key):
    """Deterministic init: xavier_uniform_ weights, PyTorch-default uniform biases."""
    layer_dims = [(3, 16), (16, 32), (32, 64)]
    params = []
    for cin, cout in layer_dims:
        key, kw, kb = jax.random.split(key, 3)
        fan_in = cin * 3 * 3
        fan_out = cout * 3 * 3
        limit = math.sqrt(6.0 / (fan_in + fan_out))
        w = jax.random.uniform(kw, (cout, cin, 3, 3), jnp.float32, -limit, limit)
        bound = 1.0 / math.sqrt(fan_in)
        b = jax.random.uniform(kb, (cout,), jnp.float32, -bound, bound)
        params.append((w, b))
    return params


def reference_forward(x_nchw, params):
    """Pure-JAX (XLA) reference of the PyTorch module, for correctness checking."""
    x = x_nchw
    for w, b in params:
        x = jax.lax.conv_general_dilated(
            x, w, window_strides=(1, 1), padding=((1, 1), (1, 1)),
            dimension_numbers=("NCHW", "OIHW", "NCHW"))
        x = jnp.maximum(x + b[None, :, None, None], 0.0)
        x = jax.lax.reduce_window(
            x, -jnp.inf, jax.lax.max, (1, 1, 2, 2), (1, 1, 2, 2), "VALID")
    return x.reshape(x.shape[0], -1)


if __name__ == "__main__":
    key = jax.random.PRNGKey(0)
    key, kx = jax.random.split(key)

    f = 16                      # image side (must be divisible by 8)
    batch = 2
    x = jax.random.normal(kx, (batch, 3, f, f), jnp.float32)  # NCHW like PyTorch

    params = init_params(key)

    out = jax.block_until_ready(resisc45_cnn_forward(x, params))

    expected_out_size = 64 * (f // 8) ** 2
    assert out.shape == (batch, expected_out_size), out.shape

    ref = jax.block_until_ready(reference_forward(x, params))
    assert jnp.allclose(out, ref, atol=1e-4, rtol=1e-4), (
        float(jnp.max(jnp.abs(out - ref))))

    print("KERNEL_OK")
</pallas_src>

<mosaic_0001>
module attributes {stable_mosaic.version = 11 : i64} {
  func.func @resisc45_fused_kernel(%arg0: i32, %arg1: memref<1x16x48xf32, #tpu.memory_space<vmem>>, %arg2: memref<27x16xf32, #tpu.memory_space<vmem>>, %arg3: memref<1x16xf32, #tpu.memory_space<vmem>>, %arg4: memref<144x32xf32, #tpu.memory_space<vmem>>, %arg5: memref<1x32xf32, #tpu.memory_space<vmem>>, %arg6: memref<288x64xf32, #tpu.memory_space<vmem>>, %arg7: memref<1x64xf32, #tpu.memory_space<vmem>>, %arg8: memref<1x2x128xf32, #tpu.memory_space<vmem>>, %arg9: memref<1x18x25x3xf32, #tpu.memory_space<vmem>>, %arg10: memref<1x10x17x16xf32, #tpu.memory_space<vmem>>, %arg11: memref<1x6x13x32xf32, #tpu.memory_space<vmem>>) attributes {dimension_semantics = [#tpu.dimension_semantics<parallel>], iteration_bounds = array<i64: 2>, scalar_prefetch = 0 : i64, scratch_operands = 3 : i64, tpu.core_type = #tpu.core_type<tc>, window_params = [{transform_indices = @transform_0, window_bounds = array<i64: 1, 16, 48>}, {pipeline_mode = #tpu.pipeline_mode<synchronous>, transform_indices = @transform_1, window_bounds = array<i64: 27, 16>}, {pipeline_mode = #tpu.pipeline_mode<synchronous>, transform_indices = @transform_2, window_bounds = array<i64: 1, 16>}, {pipeline_mode = #tpu.pipeline_mode<synchronous>, transform_indices = @transform_3, window_bounds = array<i64: 144, 32>}, {pipeline_mode = #tpu.pipeline_mode<synchronous>, transform_indices = @transform_4, window_bounds = array<i64: 1, 32>}, {pipeline_mode = #tpu.pipeline_mode<synchronous>, transform_indices = @transform_5, window_bounds = array<i64: 288, 64>}, {pipeline_mode = #tpu.pipeline_mode<synchronous>, transform_indices = @transform_6, window_bounds = array<i64: 1, 64>}, {transform_indices = @transform_7, window_bounds = array<i64: 1, 2, 128>}]} {
    %c0 = arith.constant 0 : index
    %c0_0 = arith.constant 0 : index
    %c0_1 = arith.constant 0 : index
    %0 = vector.load %arg1[%c0, %c0_0, %c0_1] : memref<1x16x48xf32, #tpu.memory_space<vmem>>, vector<1x16x48xf32>
    %1 = vector.shape_cast %0 : vector<1x16x48xf32> to vector<1x16x16x3xf32>
    %cst = arith.constant 0.000000e+00 : f32
    %2 = vector.broadcast %cst : f32 to vector<1x1x25x3xf32>
    %c0_2 = arith.constant 0 : index
    %c0_3 = arith.constant 0 : index
    %c0_4 = arith.constant 0 : index
    %c0_5 = arith.constant 0 : index
    %3 = vector.load %arg9[%c0_2, %c0_3, %c0_4, %c0_5] : memref<1x18x25x3xf32, #tpu.memory_space<vmem>>, vector<1x1x25x3xf32>
    tpu.vector_store %arg9[%c0_2, %c0_3, %c0_4, %c0_5], %2 {strides = array<i32>} : memref<1x18x25x3xf32, #tpu.memory_space<vmem>>, vector<1x1x25x3xf32>,
    %c0_6 = arith.constant 0 : index
    %c17 = arith.constant 17 : index
    %c0_7 = arith.constant 0 : index
    %c0_8 = arith.constant 0 : index
    %4 = vector.load %arg9[%c0_6, %c17, %c0_7, %c0_8] : memref<1x18x25x3xf32, #tpu.memory_space<vmem>>, vector<1x1x25x3xf32>
    tpu.vector_store %arg9[%c0_6, %c17, %c0_7, %c0_8], %2 {strides = array<i32>} : memref<1x18x25x3xf32, #tpu.memory_space<vmem>>, vector<1x1x25x3xf32>,
    %cst_9 = arith.constant 0.000000e+00 : f32
    %5 = vector.broadcast %cst_9 : f32 to vector<1x18x1x3xf32>
    %c0_10 = arith.constant 0 : index
    %c0_11 = arith.constant 0 : index
    %c7 = arith.constant 7 : index
    %c0_12 = arith.constant 0 : index
    %6 = vector.load %arg9[%c0_10, %c0_11, %c7, %c0_12] : memref<1x18x25x3xf32, #tpu.memory_space<vmem>>, vector<1x18x1x3xf32>
    tpu.vector_store %arg9[%c0_10, %c0_11, %c7, %c0_12], %5 {strides = array<i32>} : memref<1x18x25x3xf32, #tpu.memory_space<vmem>>, vector<1x18x1x3xf32>,
    %c0_13 = arith.constant 0 : index
    %c0_14 = arith.constant 0 : index
    %c24 = arith.constant 24 : index
    %c0_15 = arith.constant 0 : index
    %7 = vector.load %arg9[%c0_13, %c0_14, %c24, %c0_15] : memref<1x18x25x3xf32, #tpu.memory_space<vmem>>, vector<1x18x1x3xf32>
    tpu.vector_store %arg9[%c0_13, %c0_14, %c24, %c0_15], %5 {strides = array<i32>} : memref<1x18x25x3xf32, #tpu.memory_space<vmem>>, vector<1x18x1x3xf32>,
    %c0_16 = arith.constant 0 : index
    %c1 = arith.constant 1 : index
    %c8 = arith.constant 8 : index
    %c0_17 = arith.constant 0 : index
    %8 = vector.load %arg9[%c0_16, %c1, %c8, %c0_17] : memref<1x18x25x3xf32, #tpu.memory_space<vmem>>, vector<1x16x16x3xf32>
    tpu.vector_store %arg9[%c0_16, %c1, %c8, %c0_17], %1 {strides = array<i32>} : memref<1x18x25x3xf32, #tpu.memory_space<vmem>>, vector<1x16x16x3xf32>,
    %c0_18 = arith.constant 0 : index
    %c0_19 = arith.constant 0 : index
    %c7_20 = arith.constant 7 : index
    %c0_21 = arith.constant 0 : index
    %9 = vector.load %arg9[%c0_18, %c0_19, %c7_20, %c0_21] : memref<1x18x25x3xf32, #tpu.memory_space<vmem>>, vector<1x16x16x3xf32>
    %c0_22 = arith.constant 0 : index
    %c0_23 = arith.constant 0 : index
    %c8_24 = arith.constant 8 : index
    %c0_25 = arith.constant 0 : index
    %10 = vector.load %arg9[%c0_22, %c0_23, %c8_24, %c0_25] : memref<1x18x25x3xf32, #tpu.memory_space<vmem>>, vector<1x16x16x3xf32>
    %c0_26 = arith.constant 0 : index
    %c0_27 = arith.constant 0 : index
    %c9 = arith.constant 9 : index
    %c0_28 = arith.constant 0 : index
    %11 = vector.load %arg9[%c0_26, %c0_27, %c9, %c0_28] : memref<1x18x25x3xf32, #tpu.memory_space<vmem>>, vector<1x16x16x3xf32>
    %c0_29 = arith.constant 0 : index
    %c1_30 = arith.constant 1 : index
    %c7_31 = arith.constant 7 : index
    %c0_32 = arith.constant 0 : index
    %12 = vector.load %arg9[%c0_29, %c1_30, %c7_31, %c0_32] : memref<1x18x25x3xf32, #tpu.memory_space<vmem>>, vector<1x16x16x3xf32>
    %c0_33 = arith.constant 0 : index
    %c1_34 = arith.constant 1 : index
    %c8_35 = arith.constant 8 : index
    %c0_36 = arith.constant 0 : index
    %13 = vector.load %arg9[%c0_33, %c1_34, %c8_35, %c0_36] : memref<1x18x25x3xf32, #tpu.memory_space<vmem>>, vector<1x16x16x3xf32>
    %c0_37 = arith.constant 0 : index
    %c1_38 = arith.constant 1 : index
    %c9_39 = arith.constant 9 : index
    %c0_40 = arith.constant 0 : index
    %14 = vector.load %arg9[%c0_37, %c1_38, %c9_39, %c0_40] : memref<1x18x25x3xf32, #tpu.memory_space<vmem>>, vector<1x16x16x3xf32>
    %c0_41 = arith.constant 0 : index
    %c2 = arith.constant 2 : index
    %c7_42 = arith.constant 7 : index
    %c0_43 = arith.constant 0 : index
    %15 = vector.load %arg9[%c0_41, %c2, %c7_42, %c0_43] : memref<1x18x25x3xf32, #tpu.memory_space<vmem>>, vector<1x16x16x3xf32>
    %c0_44 = arith.constant 0 : index
    %c2_45 = arith.constant 2 : index
    %c8_46 = arith.constant 8 : index
    %c0_47 = arith.constant 0 : index
    %16 = vector.load %arg9[%c0_44, %c2_45, %c8_46, %c0_47] : memref<1x18x25x3xf32, #tpu.memory_space<vmem>>, vector<1x16x16x3xf32>
    %c0_48 = arith.constant 0 : index
    %c2_49 = arith.constant 2 : index
    %c9_50 = arith.constant 9 : index
    %c0_51 = arith.constant 0 : index
    %17 = vector.load %arg9[%c0_48, %c2_49, %c9_50, %c0_51] : memref<1x18x25x3xf32, #tpu.memory_space<vmem>>, vector<1x16x16x3xf32>
    %18 = tpu.concatenate %9, %10, %11, %12, %13, %14, %15, %16, %17 in 3 : vector<1x16x16x3xf32>, vector<1x16x16x3xf32>, vector<1x16x16x3xf32>, vector<1x16x16x3xf32>, vector<1x16x16x3xf32>, vector<1x16x16x3xf32>, vector<1x16x16x3xf32>, vector<1x16x16x3xf32>, vector<1x16x16x3xf32> -> vector<1x16x16x27xf32>
    %19 = vector.shape_cast %18 : vector<1x16x16x27xf32> to vector<256x27xf32>
    %c0_52 = arith.constant 0 : index
    %c0_53 = arith.constant 0 : index
    %20 = vector.load %arg2[%c0_52, %c0_53] : memref<27x16xf32, #tpu.memory_space<vmem>>, vector<27x16xf32>
    %cst_54 = arith.constant dense<0.000000e+00> : vector<256x16xf32>
    %21 = tpu.matmul %19, %20, %cst_54 {dimension_numbers = #tpu.dot_dimension_numbers<[1], [0], [0], [1], [0, 0, 1, 1], [], []>} : vector<256x27xf32>, vector<27x16xf32>, vector<256x16xf32> -> vector<256x16xf32>
    %c0_55 = arith.constant 0 : index
    %c0_56 = arith.constant 0 : index
    %22 = vector.load %arg3[%c0_55, %c0_56] : memref<1x16xf32, #tpu.memory_space<vmem>>, vector<1x16xf32>
    %23 = vector.broadcast %22 : vector<1x16xf32> to vector<256x16xf32>
    %24 = arith.addf %21, %23 : vector<256x16xf32>
    %cst_57 = arith.constant 0.000000e+00 : f32
    %25 = vector.broadcast %cst_57 : f32 to vector<256x16xf32>
    %26 = arith.maximumf %24, %25 : vector<256x16xf32>
    %27 = vector.shape_cast %26 : vector<256x16xf32> to vector<1x8x2x16x16xf32>
    %28 = vector.extract_strided_slice %27 {offsets = [0, 0, 0, 0, 0], sizes = [1, 8, 1, 16, 16], strides = [1, 1, 1, 1, 1]} : vector<1x8x2x16x16xf32> to vector<1x8x1x16x16xf32>
    %29 = vector.shape_cast %28 : vector<1x8x1x16x16xf32> to vector<1x8x16x16xf32>
    %30 = vector.extract_strided_slice %27 {offsets = [0, 0, 1, 0, 0], sizes = [1, 8, 1, 16, 16], strides = [1, 1, 1, 1, 1]} : vector<1x8x2x16x16xf32> to vector<1x8x1x16x16xf32>
    %31 = vector.shape_cast %30 : vector<1x8x1x16x16xf32> to vector<1x8x16x16xf32>
    %32 = arith.maximumf %29, %31 : vector<1x8x16x16xf32>
    %33 = vector.shape_cast %32 : vector<1x8x16x16xf32> to vector<1x8x8x2x16xf32>
    %34 = vector.extract_strided_slice %33 {offsets = [0, 0, 0, 0, 0], sizes = [1, 8, 8, 1, 16], strides = [1, 1, 1, 1, 1]} : vector<1x8x8x2x16xf32> to vector<1x8x8x1x16xf32>
    %35 = vector.shape_cast %34 : vector<1x8x8x1x16xf32> to vector<1x8x8x16xf32>
    %36 = vector.extract_strided_slice %33 {offsets = [0, 0, 0, 1, 0], sizes = [1, 8, 8, 1, 16], strides = [1, 1, 1, 1, 1]} : vector<1x8x8x2x16xf32> to vector<1x8x8x1x16xf32>
    %37 = vector.shape_cast %36 : vector<1x8x8x1x16xf32> to vector<1x8x8x16xf32>
    %38 = arith.maximumf %35, %37 : vector<1x8x8x16xf32>
    %cst_58 = arith.constant 0.000000e+00 : f32
    %39 = vector.broadcast %cst_58 : f32 to vector<1x1x17x16xf32>
    %c0_59 = arith.constant 0 : index
    %c0_60 = arith.constant 0 : index
    %c0_61 = arith.constant 0 : index
    %c0_62 = arith.constant 0 : index
    %40 = vector.load %arg10[%c0_59, %c0_60, %c0_61, %c0_62] : memref<1x10x17x16xf32, #tpu.memory_space<vmem>>, vector<1x1x17x16xf32>
    tpu.vector_store %arg10[%c0_59, %c0_60, %c0_61, %c0_62], %39 {strides = array<i32>} : memref<1x10x17x16xf32, #tpu.memory_space<vmem>>, vector<1x1x17x16xf32>,
    %c0_63 = arith.constant 0 : index
    %c9_64 = arith.constant 9 : index
    %c0_65 = arith.constant 0 : index
    %c0_66 = arith.constant 0 : index
    %41 = vector.load %arg10[%c0_63, %c9_64, %c0_65, %c0_66] : memref<1x10x17x16xf32, #tpu.memory_space<vmem>>, vector<1x1x17x16xf32>
    tpu.vector_store %arg10[%c0_63, %c9_64, %c0_65, %c0_66], %39 {strides = array<i32>} : memref<1x10x17x16xf32, #tpu.memory_space<vmem>>, vector<1x1x17x16xf32>,
    %cst_67 = arith.constant 0.000000e+00 : f32
    %42 = vector.broadcast %cst_67 : f32 to vector<1x10x1x16xf32>
    %c0_68 = arith.constant 0 : index
    %c0_69 = arith.constant 0 : index
    %c7_70 = arith.constant 7 : index
    %c0_71 = arith.constant 0 : index
    %43 = vector.load %arg10[%c0_68, %c0_69, %c7_70, %c0_71] : memref<1x10x17x16xf32, #tpu.memory_space<vmem>>, vector<1x10x1x16xf32>
    tpu.vector_store %arg10[%c0_68, %c0_69, %c7_70, %c0_71], %42 {strides = array<i32>} : memref<1x10x17x16xf32, #tpu.memory_space<vmem>>, vector<1x10x1x16xf32>,
    %c0_72 = arith.constant 0 : index
    %c0_73 = arith.constant 0 : index
    %c16 = arith.constant 16 : index
    %c0_74 = arith.constant 0 : index
    %44 = vector.load %arg10[%c0_72, %c0_73, %c16, %c0_74] : memref<1x10x17x16xf32, #tpu.memory_space<vmem>>, vector<1x10x1x16xf32>
    tpu.vector_store %arg10[%c0_72, %c0_73, %c16, %c0_74], %42 {strides = array<i32>} : memref<1x10x17x16xf32, #tpu.memory_space<vmem>>, vector<1x10x1x16xf32>,
    %c0_75 = arith.constant 0 : index
    %c1_76 = arith.constant 1 : index
    %c8_77 = arith.constant 8 : index
    %c0_78 = arith.constant 0 : index
    %45 = vector.load %arg10[%c0_75, %c1_76, %c8_77, %c0_78] : memref<1x10x17x16xf32, #tpu.memory_space<vmem>>, vector<1x8x8x16xf32>
    tpu.vector_store %arg10[%c0_75, %c1_76, %c8_77, %c0_78], %38 {strides = array<i32>} : memref<1x10x17x16xf32, #tpu.memory_space<vmem>>, vector<1x8x8x16xf32>,
    %c0_79 = arith.constant 0 : index
    %c0_80 = arith.constant 0 : index
    %c7_81 = arith.constant 7 : index
    %c0_82 = arith.constant 0 : index
    %46 = vector.load %arg10[%c0_79, %c0_80, %c7_81, %c0_82] : memref<1x10x17x16xf32, #tpu.memory_space<vmem>>, vector<1x8x8x16xf32>
    %c0_83 = arith.constant 0 : index
    %c0_84 = arith.constant 0 : index
    %c8_85 = arith.constant 8 : index
    %c0_86 = arith.constant 0 : index
    %47 = vector.load %arg10[%c0_83, %c0_84, %c8_85, %c0_86] : memref<1x10x17x16xf32, #tpu.memory_space<vmem>>, vector<1x8x8x16xf32>
    %c0_87 = arith.constant 0 : index
    %c0_88 = arith.constant 0 : index
    %c9_89 = arith.constant 9 : index
    %c0_90 = arith.constant 0 : index
    %48 = vector.load %arg10[%c0_87, %c0_88, %c9_89, %c0_90] : memref<1x10x17x16xf32, #tpu.memory_space<vmem>>, vector<1x8x8x16xf32>
    %c0_91 = arith.constant 0 : index
    %c1_92 = arith.constant 1 : index
    %c7_93 = arith.constant 7 : index
    %c0_94 = arith.constant 0 : index
    %49 = vector.load %arg10[%c0_91, %c1_92, %c7_93, %c0_94] : memref<1x10x17x16xf32, #tpu.memory_space<vmem>>, vector<1x8x8x16xf32>
    %c0_95 = arith.constant 0 : index
    %c1_96 = arith.constant 1 : index
    %c8_97 = arith.constant 8 : index
    %c0_98 = arith.constant 0 : index
    %50 = vector.load %arg10[%c0_95, %c1_96, %c8_97, %c0_98] : memref<1x10x17x16xf32, #tpu.memory_space<vmem>>, vector<1x8x8x16xf32>
    %c0_99 = arith.constant 0 : index
    %c1_100 = arith.constant 1 : index
    %c9_101 = arith.constant 9 : index
    %c0_102 = arith.constant 0 : index
    %51 = vector.load %arg10[%c0_99, %c1_100, %c9_101, %c0_102] : memref<1x10x17x16xf32, #tpu.memory_space<vmem>>, vector<1x8x8x16xf32>
    %c0_103 = arith.constant 0 : index
    %c2_104 = arith.constant 2 : index
    %c7_105 = arith.constant 7 : index
    %c0_106 = arith.constant 0 : index
    %52 = vector.load %arg10[%c0_103, %c2_104, %c7_105, %c0_106] : memref<1x10x17x16xf32, #tpu.memory_space<vmem>>, vector<1x8x8x16xf32>
    %c0_107 = arith.constant 0 : index
    %c2_108 = arith.constant 2 : index
    %c8_109 = arith.constant 8 : index
    %c0_110 = arith.constant 0 : index
    %53 = vector.load %arg10[%c0_107, %c2_108, %c8_109, %c0_110] : memref<1x10x17x16xf32, #tpu.memory_space<vmem>>, vector<1x8x8x16xf32>
    %c0_111 = arith.constant 0 : index
    %c2_112 = arith.constant 2 : index
    %c9_113 = arith.constant 9 : index
    %c0_114 = arith.constant 0 : index
    %54 = vector.load %arg10[%c0_111, %c2_112, %c9_113, %c0_114] : memref<1x10x17x16xf32, #tpu.memory_space<vmem>>, vector<1x8x8x16xf32>
    %55 = tpu.concatenate %46, %47, %48, %49, %50, %51, %52, %53, %54 in 3 : vector<1x8x8x16xf32>, vector<1x8x8x16xf32>, vector<1x8x8x16xf32>, vector<1x8x8x16xf32>, vector<1x8x8x16xf32>, vector<1x8x8x16xf32>, vector<1x8x8x16xf32>, vector<1x8x8x16xf32>, vector<1x8x8x16xf32> -> vector<1x8x8x144xf32>
    %56 = vector.shape_cast %55 : vector<1x8x8x144xf32> to vector<64x144xf32>
    %c0_115 = arith.constant 0 : index
    %c0_116 = arith.constant 0 : index
    %57 = vector.load %arg4[%c0_115, %c0_116] : memref<144x32xf32, #tpu.memory_space<vmem>>, vector<144x32xf32>
    %cst_117 = arith.constant dense<0.000000e+00> : vector<64x32xf32>
    %58 = tpu.matmul %56, %57, %cst_117 {dimension_numbers = #tpu.dot_dimension_numbers<[1], [0], [0], [1], [0, 0, 1, 1], [], []>} : vector<64x144xf32>, vector<144x32xf32>, vector<64x32xf32> -> vector<64x32xf32>
    %c0_118 = arith.constant 0 : index
    %c0_119 = arith.constant 0 : index
    %59 = vector.load %arg5[%c0_118, %c0_119] : memref<1x32xf32, #tpu.memory_space<vmem>>, vector<1x32xf32>
    %60 = vector.broadcast %59 : vector<1x32xf32> to vector<64x32xf32>
    %61 = arith.addf %58, %60 : vector<64x32xf32>
    %cst_120 = arith.constant 0.000000e+00 : f32
    %62 = vector.broadcast %cst_120 : f32 to vector<64x32xf32>
    %63 = arith.maximumf %61, %62 : vector<64x32xf32>
    %64 = vector.shape_cast %63 : vector<64x32xf32> to vector<1x4x2x8x32xf32>
    %65 = vector.extract_strided_slice %64 {offsets = [0, 0, 0, 0, 0], sizes = [1, 4, 1, 8, 32], strides = [1, 1, 1, 1, 1]} : vector<1x4x2x8x32xf32> to vector<1x4x1x8x32xf32>
    %66 = vector.shape_cast %65 : vector<1x4x1x8x32xf32> to vector<1x4x8x32xf32>
    %67 = vector.extract_strided_slice %64 {offsets = [0, 0, 1, 0, 0], sizes = [1, 4, 1, 8, 32], strides = [1, 1, 1, 1, 1]} : vector<1x4x2x8x32xf32> to vector<1x4x1x8x32xf32>
    %68 = vector.shape_cast %67 : vector<1x4x1x8x32xf32> to vector<1x4x8x32xf32>
    %69 = arith.maximumf %66, %68 : vector<1x4x8x32xf32>
    %70 = vector.shape_cast %69 : vector<1x4x8x32xf32> to vector<1x4x4x2x32xf32>
    %71 = vector.extract_strided_slice %70 {offsets = [0, 0, 0, 0, 0], sizes = [1, 4, 4, 1, 32], strides = [1, 1, 1, 1, 1]} : vector<1x4x4x2x32xf32> to vector<1x4x4x1x32xf32>
    %72 = vector.shape_cast %71 : vector<1x4x4x1x32xf32> to vector<1x4x4x32xf32>
    %73 = vector.extract_strided_slice %70 {offsets = [0, 0, 0, 1, 0], sizes = [1, 4, 4, 1, 32], strides = [1, 1, 1, 1, 1]} : vector<1x4x4x2x32xf32> to vector<1x4x4x1x32xf32>
    %74 = vector.shape_cast %73 : vector<1x4x4x1x32xf32> to vector<1x4x4x32xf32>
    %75 = arith.maximumf %72, %74 : vector<1x4x4x32xf32>
    %cst_121 = arith.constant 0.000000e+00 : f32
    %76 = vector.broadcast %cst_121 : f32 to vector<1x1x13x32xf32>
    %c0_122 = arith.constant 0 : index
    %c0_123 = arith.constant 0 : index
    %c0_124 = arith.constant 0 : index
    %c0_125 = arith.constant 0 : index
    %77 = vector.load %arg11[%c0_122, %c0_123, %c0_124, %c0_125] : memref<1x6x13x32xf32, #tpu.memory_space<vmem>>, vector<1x1x13x32xf32>
    tpu.vector_store %arg11[%c0_122, %c0_123, %c0_124, %c0_125], %76 {strides = array<i32>} : memref<1x6x13x32xf32, #tpu.memory_space<vmem>>, vector<1x1x13x32xf32>,
    %c0_126 = arith.constant 0 : index
    %c5 = arith.constant 5 : index
    %c0_127 = arith.constant 0 : index
    %c0_128 = arith.constant 0 : index
    %78 = vector.load %arg11[%c0_126, %c5, %c0_127, %c0_128] : memref<1x6x13x32xf32, #tpu.memory_space<vmem>>, vector<1x1x13x32xf32>
    tpu.vector_store %arg11[%c0_126, %c5, %c0_127, %c0_128], %76 {strides = array<i32>} : memref<1x6x13x32xf32, #tpu.memory_space<vmem>>, vector<1x1x13x32xf32>,
    %cst_129 = arith.constant 0.000000e+00 : f32
    %79 = vector.broadcast %cst_129 : f32 to vector<1x6x1x32xf32>
    %c0_130 = arith.constant 0 : index
    %c0_131 = arith.constant 0 : index
    %c7_132 = arith.constant 7 : index
    %c0_133 = arith.constant 0 : index
    %80 = vector.load %arg11[%c0_130, %c0_131, %c7_132, %c0_133] : memref<1x6x13x32xf32, #tpu.memory_space<vmem>>, vector<1x6x1x32xf32>
    tpu.vector_store %arg11[%c0_130, %c0_131, %c7_132, %c0_133], %79 {strides = array<i32>} : memref<1x6x13x32xf32, #tpu.memory_space<vmem>>, vector<1x6x1x32xf32>,
    %c0_134 = arith.constant 0 : index
    %c0_135 = arith.constant 0 : index
    %c12 = arith.constant 12 : index
    %c0_136 = arith.constant 0 : index
    %81 = vector.load %arg11[%c0_134, %c0_135, %c12, %c0_136] : memref<1x6x13x32xf32, #tpu.memory_space<vmem>>, vector<1x6x1x32xf32>
    tpu.vector_store %arg11[%c0_134, %c0_135, %c12, %c0_136], %79 {strides = array<i32>} : memref<1x6x13x32xf32, #tpu.memory_space<vmem>>, vector<1x6x1x32xf32>,
    %c0_137 = arith.constant 0 : index
    %c1_138 = arith.constant 1 : index
    %c8_139 = arith.constant 8 : index
    %c0_140 = arith.constant 0 : index
    %82 = vector.load %arg11[%c0_137, %c1_138, %c8_139, %c0_140] : memref<1x6x13x32xf32, #tpu.memory_space<vmem>>, vector<1x4x4x32xf32>
    tpu.vector_store %arg11[%c0_137, %c1_138, %c8_139, %c0_140], %75 {strides = array<i32>} : memref<1x6x13x32xf32, #tpu.memory_space<vmem>>, vector<1x4x4x32xf32>,
    %c0_141 = arith.constant 0 : index
    %c0_142 = arith.constant 0 : index
    %c7_143 = arith.constant 7 : index
    %c0_144 = arith.constant 0 : index
    %83 = vector.load %arg11[%c0_141, %c0_142, %c7_143, %c0_144] : memref<1x6x13x32xf32, #tpu.memory_space<vmem>>, vector<1x4x4x32xf32>
    %c0_145 = arith.constant 0 : index
    %c0_146 = arith.constant 0 : index
    %c8_147 = arith.constant 8 : index
    %c0_148 = arith.constant 0 : index
    %84 = vector.load %arg11[%c0_145, %c0_146, %c8_147, %c0_148] : memref<1x6x13x32xf32, #tpu.memory_space<vmem>>, vector<1x4x4x32xf32>
    %c0_149 = arith.constant 0 : index
    %c0_150 = arith.constant 0 : index
    %c9_151 = arith.constant 9 : index
    %c0_152 = arith.constant 0 : index
    %85 = vector.load %arg11[%c0_149, %c0_150, %c9_151, %c0_152] : memref<1x6x13x32xf32, #tpu.memory_space<vmem>>, vector<1x4x4x32xf32>
    %c0_153 = arith.constant 0 : index
    %c1_154 = arith.constant 1 : index
    %c7_155 = arith.constant 7 : index
    %c0_156 = arith.constant 0 : index
    %86 = vector.load %arg11[%c0_153, %c1_154, %c7_155, %c0_156] : memref<1x6x13x32xf32, #tpu.memory_space<vmem>>, vector<1x4x4x32xf32>
    %c0_157 = arith.constant 0 : index
    %c1_158 = arith.constant 1 : index
    %c8_159 = arith.constant 8 : index
    %c0_160 = arith.constant 0 : index
    %87 = vector.load %arg11[%c0_157, %c1_158, %c8_159, %c0_160] : memref<1x6x13x32xf32, #tpu.memory_space<vmem>>, vector<1x4x4x32xf32>
    %c0_161 = arith.constant 0 : index
    %c1_162 = arith.constant 1 : index
    %c9_163 = arith.constant 9 : index
    %c0_164 = arith.constant 0 : index
    %88 = vector.load %arg11[%c0_161, %c1_162, %c9_163, %c0_164] : memref<1x6x13x32xf32, #tpu.memory_space<vmem>>, vector<1x4x4x32xf32>
    %c0_165 = arith.constant 0 : index
    %c2_166 = arith.constant 2 : index
    %c7_167 = arith.constant 7 : index
    %c0_168 = arith.constant 0 : index
    %89 = vector.load %arg11[%c0_165, %c2_166, %c7_167, %c0_168] : memref<1x6x13x32xf32, #tpu.memory_space<vmem>>, vector<1x4x4x32xf32>
    %c0_169 = arith.constant 0 : index
    %c2_170 = arith.constant 2 : index
    %c8_171 = arith.constant 8 : index
    %c0_172 = arith.constant 0 : index
    %90 = vector.load %arg11[%c0_169, %c2_170, %c8_171, %c0_172] : memref<1x6x13x32xf32, #tpu.memory_space<vmem>>, vector<1x4x4x32xf32>
    %c0_173 = arith.constant 0 : index
    %c2_174 = arith.constant 2 : index
    %c9_175 = arith.constant 9 : index
    %c0_176 = arith.constant 0 : index
    %91 = vector.load %arg11[%c0_173, %c2_174, %c9_175, %c0_176] : memref<1x6x13x32xf32, #tpu.memory_space<vmem>>, vector<1x4x4x32xf32>
    %92 = tpu.concatenate %83, %84, %85, %86, %87, %88, %89, %90, %91 in 3 : vector<1x4x4x32xf32>, vector<1x4x4x32xf32>, vector<1x4x4x32xf32>, vector<1x4x4x32xf32>, vector<1x4x4x32xf32>, vector<1x4x4x32xf32>, vector<1x4x4x32xf32>, vector<1x4x4x32xf32>, vector<1x4x4x32xf32> -> vector<1x4x4x288xf32>
    %93 = vector.shape_cast %92 : vector<1x4x4x288xf32> to vector<16x288xf32>
    %c0_177 = arith.constant 0 : index
    %c0_178 = arith.constant 0 : index
    %94 = vector.load %arg6[%c0_177, %c0_178] : memref<288x64xf32, #tpu.memory_space<vmem>>, vector<288x64xf32>
    %cst_179 = arith.constant dense<0.000000e+00> : vector<16x64xf32>
    %95 = tpu.matmul %93, %94, %cst_179 {dimension_numbers = #tpu.dot_dimension_numbers<[1], [0], [0], [1], [0, 0, 1, 1], [], []>} : vector<16x288xf32>, vector<288x64xf32>, vector<16x64xf32> -> vector<16x64xf32>
    %c0_180 = arith.constant 0 : index
    %c0_181 = arith.constant 0 : index
    %96 = vector.load %arg7[%c0_180, %c0_181] : memref<1x64xf32, #tpu.memory_space<vmem>>, vector<1x64xf32>
    %97 = vector.broadcast %96 : vector<1x64xf32> to vector<16x64xf32>
    %98 = arith.addf %95, %97 : vector<16x64xf32>
    %cst_182 = arith.constant 0.000000e+00 : f32
    %99 = vector.broadcast %cst_182 : f32 to vector<16x64xf32>
    %100 = arith.maximumf %98, %99 : vector<16x64xf32>
    %101 = vector.shape_cast %100 : vector<16x64xf32> to vector<1x2x2x4x64xf32>
    %102 = vector.extract_strided_slice %101 {offsets = [0, 0, 0, 0, 0], sizes = [1, 2, 1, 4, 64], strides = [1, 1, 1, 1, 1]} : vector<1x2x2x4x64xf32> to vector<1x2x1x4x64xf32>
    %103 = vector.shape_cast %102 : vector<1x2x1x4x64xf32> to vector<1x2x4x64xf32>
    %104 = vector.extract_strided_slice %101 {offsets = [0, 0, 1, 0, 0], sizes = [1, 2, 1, 4, 64], strides = [1, 1, 1, 1, 1]} : vector<1x2x2x4x64xf32> to vector<1x2x1x4x64xf32>
    %105 = vector.shape_cast %104 : vector<1x2x1x4x64xf32> to vector<1x2x4x64xf32>
    %106 = arith.maximumf %103, %105 : vector<1x2x4x64xf32>
    %107 = vector.shape_cast %106 : vector<1x2x4x64xf32> to vector<1x2x2x2x64xf32>
    %108 = vector.extract_strided_slice %107 {offsets = [0, 0, 0, 0, 0], sizes = [1, 2, 2, 1, 64], strides = [1, 1, 1, 1, 1]} : vector<1x2x2x2x64xf32> to vector<1x2x2x1x64xf32>
    %109 = vector.shape_cast %108 : vector<1x2x2x1x64xf32> to vector<1x2x2x64xf32>
    %110 = vector.extract_strided_slice %107 {offsets = [0, 0, 0, 1, 0], sizes = [1, 2, 2, 1, 64], strides = [1, 1, 1, 1, 1]} : vector<1x2x2x2x64xf32> to vector<1x2x2x1x64xf32>
    %111 = vector.shape_cast %110 : vector<1x2x2x1x64xf32> to vector<1x2x2x64xf32>
    %112 = arith.maximumf %109, %111 : vector<1x2x2x64xf32>
    %113 = vector.shape_cast %112 : vector<1x2x2x64xf32> to vector<1x2x128xf32>
    %c0_183 = arith.constant 0 : index
    %c0_184 = arith.constant 0 : index
    %c0_185 = arith.constant 0 : index
    %114 = vector.load %arg8[%c0_183, %c0_184, %c0_185] : memref<1x2x128xf32, #tpu.memory_space<vmem>>, vector<1x2x128xf32>
    tpu.vector_store %arg8[%c0_183, %c0_184, %c0_185], %113 {strides = array<i32>} : memref<1x2x128xf32, #tpu.memory_space<vmem>>, vector<1x2x128xf32>,
    return
  }
  func.func @transform_0(%arg0: i32) -> (i32, i32, i32) {
    %c0_i32 = arith.constant 0 : i32
    %c0_i32_0 = arith.constant 0 : i32
    %c0_i32_1 = arith.constant 0 : i32
    return %arg0, %c0_i32, %c0_i32_0 : i32, i32, i32
  }
  func.func @transform_1(%arg0: i32) -> (i32, i32) {
    %c0_i32 = arith.constant 0 : i32
    %c0_i32_0 = arith.constant 0 : i32
    %c0_i32_1 = arith.constant 0 : i32
    return %c0_i32, %c0_i32_0 : i32, i32
  }
  func.func @transform_2(%arg0: i32) -> (i32, i32) {
    %c0_i32 = arith.constant 0 : i32
    %c0_i32_0 = arith.constant 0 : i32
    %c0_i32_1 = arith.constant 0 : i32
    return %c0_i32, %c0_i32_0 : i32, i32
  }
  func.func @transform_3(%arg0: i32) -> (i32, i32) {
    %c0_i32 = arith.constant 0 : i32
    %c0_i32_0 = arith.constant 0 : i32
    %c0_i32_1 = arith.constant 0 : i32
    return %c0_i32, %c0_i32_0 : i32, i32
  }
  func.func @transform_4(%arg0: i32) -> (i32, i32) {
    %c0_i32 = arith.constant 0 : i32
    %c0_i32_0 = arith.constant 0 : i32
    %c0_i32_1 = arith.constant 0 : i32
    return %c0_i32, %c0_i32_0 : i32, i32
  }
  func.func @transform_5(%arg0: i32) -> (i32, i32) {
    %c0_i32 = arith.constant 0 : i32
    %c0_i32_0 = arith.constant 0 : i32
    %c0_i32_1 = arith.constant 0 : i32
    return %c0_i32, %c0_i32_0 : i32, i32
  }
  func.func @transform_6(%arg0: i32) -> (i32, i32) {
    %c0_i32 = arith.constant 0 : i32
    %c0_i32_0 = arith.constant 0 : i32
    %c0_i32_1 = arith.constant 0 : i32
    return %c0_i32, %c0_i32_0 : i32, i32
  }
  func.func @transform_7(%arg0: i32) -> (i32, i32, i32) {
    %c0_i32 = arith.constant 0 : i32
    %c0_i32_0 = arith.constant 0 : i32
    %c0_i32_1 = arith.constant 0 : i32
    return %arg0, %c0_i32, %c0_i32_0 : i32, i32, i32
  }
}

</mosaic_0001>

<bundles_post_ra>
// kernel: tpu_custom_call.1
= control target key start
LH: loop header
LB: loop body
LE: loop exit
PB: predicated region body
PF: predicated region fallthrough
CT: control target
= control target key end

     0   :  { %12 = vsyncpa [#allocation6], 0  ;;  %s7388_s0 = inlined_call_operand.vmem [shape: f32[2,16,48], index: 0, kind: input, shape index: {}]   ;;  %s7389_s1 = inlined_call_operand.vmem [shape: f32[27,16], index: 1, kind: input, shape index: {}]   ;;  %s7390_s2 = inlined_call_operand.vmem [shape: f32[1,16], index: 2, kind: input, shape index: {}]   ;;  %s7391_s3 = inlined_call_operand.vmem [shape: f32[144,32], index: 3, kind: input, shape index: {}]   ;;  %s7392_s4 = inlined_call_operand.vmem [shape: f32[1,32], index: 4, kind: input, shape index: {}]   ;;  %s7393_s5 = inlined_call_operand.vmem [shape: f32[288,64], index: 5, kind: input, shape index: {}]   ;;  %s7394_s6 = inlined_call_operand.vmem [shape: f32[1,64], index: 6, kind: input, shape index: {}]   ;;  %s7395_s7 = inlined_call_operand.hbm [shape: f32[2,2,128], index: 7, kind: output, shape index: {}]  }
   0x1   :  { %14 = vsyncpa [#allocation6 + $0x1], 0  ;;  %s4986_s24 = smov 0   ;;  %s4988_s25 = smov 0  }
   0x2   :  { %s4990_s26 = smov 0   ;;  %s4992_s27 = smov 0  }
   0x3 LB: > { %s5007_s28 = sadd.s32 4294967295, %s4911_s27   ;;  %s4484_s29 = sadd.s32 4294967294, %s4911_s27   ;;  %s4911_s27 = sphi %s4992_s27, %s7543_s27   ;;  %s4907_s26 = sphi %s4990_s26, %s7542_s26   ;;  %s4903_s25 = sphi %s4988_s25, %s7541_s25   ;;  %s4899_s24 = sphi %s4986_s24, %s7540_s24  }
   0x4   : > { %s5011_s30 = sadd.s32 1, %s4911_s27   ;;  %s179_s8 = sadd.s32 1, %s4907_s26 }
   0x5   : > { %s176_s9 = ssub.s32 %s4911_s27, %s5011_s30  ;;  %p189_p0 = scmp.ne.s32.totalorder %s4907_s26, %s4903_s25 }
   0x6   : > { %p177_p1 = scmp.eq.s32.totalorder %s176_s9, 0  ;;  %p190_p2 = scmp.eq.s32.totalorder %s5007_s28, 1 }
   0x7   : > { %p195_p3 = scmp.ne.s32.totalorder %s4903_s25, %s4899_s24  ;;  %p196_p4 = scmp.eq.s32.totalorder %s4484_s29, 1 }
   0x8   : > { %s5022_s10 = scalar_select %p177_p1, %s4907_s26, %s179_s8  }
   0x9   : > { %p5024_p5 = por %p190_p2, %p189_p0  ;;  %p5028_p6 = por %p196_p4, %p195_p3 }
   0xa   : > { %p4487_p7 = scmp.ge.s32.totalorder %s4911_s27, 1  ;;  %p240_p8 = scmp.lt.s32.totalorder %s4911_s27, 3 }
   0xc   : > { %p241_p9 = pnand %p4487_p7, %p240_p8 }
   0xe   : > { %244 = sbr.rel (%p241_p9) target bundleno = 1904 (0x770), region = 48 }
  0x13   : > { %p272_p10 = scmp.lt.s32.totalorder %s5007_s28, 1  ;;  %s4913_s18 = smov 122   ;;  %v4928_v11 = vmov 1983009808   ;;  %vm7401_vm0 = vcmask 1047556   ;;  %vm820_vm1 = vcmask 23552  }
  0x14   : > { %s4914_s19 = smov 125   ;;  %s4915_s20 = smov 119   ;;  %v377_v12 = vunpack.c.l.s4 %v4928_v11  ;;  %v7396_v32 = vmov 0.0   ;;  %v4930_v39 = vmov 1934713408   ;;  %vm824_vm2 = vcmask 16384  }
  0x15   : > { %s273_s13 = scalar_select %p272_p10, %s5007_s28, 1  ;;  %823 = vst.msk [vmem:[#allocation2 + $0x10] sm:$0xff] %vm820_vm1, %v7396_v32  ;;  %v425_v40 = vunpack.c.l.s4 %v4930_v39  ;;  %vm2581_vm3 = vcmask 1042432   ;;  %vm2245_vm4 = vcmask 48128   ;;  %vm2278_vm5 = vcmask 72704  }
  0x16   : > { %s4916_s21 = smov 116   ;;  %s4917_s22 = smov 113   ;;  %v5063_v19 = vunpack.c.0.s8 %v377_v12  ;;  %821 = vst.msk [vmem:[#allocation2] sm:$0xff] %vm820_vm1, %v7396_v32  ;;  %vm2311_vm6 = vcmask 97280   ;;  %vm2344_vm7 = vcmask 121856   ;;  %vm2377_vm8 = vcmask 146432  }
  0x17   : > { %s4622_s14 = sshll.u32 %s273_s13, 4  ;;  %s4918_s23 = smov 110   ;;  %822 = vst.msk [vmem:[#allocation2 + $0x8] sm:$0xff] %vm820_vm1, %v7396_v32  ;;  %v5100_v56 = vunpack.c.0.s8 %v425_v40  ;;  %vm2410_vm9 = vcmask 171008   ;;  %vm2443_vm10 = vcmask 195584   ;;  %vm2484_vm11 = vcmask 220160  }
  0x18   : > { %s276_s17 = scalar_lea.vmem %s7388_s0, %s4622_s14  ;;  %s4919_s29 = smov 107   ;;  %827 = vst.msk [vmem:[#allocation2 + $0x220] sm:$0xff] %vm820_vm1, %v7396_v32  ;;  %vm7404_vm12 = vcmask 130048   ;;  %vm7403_vm13 = vcmask 1041409   ;;  %vm7402_vm14 = vcmask 1042434   ;;  %vm3275_vm15 = vcmask 1043459  }
  0x19   : > { %v5039_v0 = vld [vmem:[%s276_s17] sm:$0xff]  ;;  %v278_v1 = vld [vmem:[%s276_s17 + $0x8] sm:$0xff]  ;;  %s4920_s8 = smov 104   ;;  %s4921_s9 = smov 101   ;;  %828 = vst.msk [vmem:[#allocation2 + $0x228] sm:$0xff] %vm820_vm1, %v7396_v32 }
  0x1a   : > { %287 = vrot.lane.b32.xlu1 %v5039_v0, %s4913_s18  ;;  %281 = vrot.lane.b32.xlu0 %v5039_v0, %s4914_s19  ;;  %s4922_s13 = smov 98   ;;  %s4923_s14 = smov 95   ;;  %v598_v13 = vrot.slane %v278_v1, 4  ;;  %v374_v23 = vrot.slane %v5039_v0, 4  ;;  %829 = vst.msk [vmem:[#allocation2 + $0x230] sm:$0xff] %vm820_vm1, %v7396_v32 }
  0x1b   : > { %293 = vrot.lane.b32.xlu2 %v5039_v0, %s4915_s20  ;;  %s4924_s15 = smov 92   ;;  %s4925_s16 = smov 89   ;;  %832 = vst.msk [vmem:[#allocation2 + $0x27] sm:$0x1] %vm824_vm2, %v7396_v32 }
  0x1c   : > { %s4926_s17 = smov 86   ;;  %v933_v55 = vld [vmem:[#allocation2 + $0x10] sm:$0xff]  ;;  %7407 = vst [vmem:[#allocation8_spill] sm:$0xff] %v5100_v56 }
  0x1d   : > { %825 = vst.msk [vmem:[#allocation2 + $0x18] sm:$0x1] %vm824_vm2, %v7396_v32 }
  0x1e   : > { %830 = vst.msk [vmem:[#allocation2 + $0x238] sm:$0x1] %vm824_vm2, %v7396_v32 }
  0x1f   : > { %831 = vst.msk [vmem:[#allocation2 + $0x7] sm:$0x1] %vm824_vm2, %v7396_v32 }
  0x20   : > { %833 = vst.msk [vmem:[#allocation2 + $0x47] sm:$0x1] %vm824_vm2, %v7396_v32 }
  0x21   : > { %834 = vst.msk [vmem:[#allocation2 + $0x67] sm:$0x1] %vm824_vm2, %v7396_v32 }
  0x22   : > { %289 = vrot.lane.b32.xlu1 %v278_v1, %s4913_s18  ;;  %283 = vrot.lane.b32.xlu0 %v278_v1, %s4914_s19  ;;  %s4927_s18 = smov 83   ;;  %s4931_s19 = smov 3   ;;  %835 = vst.msk [vmem:[#allocation2 + $0x87] sm:$0x1] %vm824_vm2, %v7396_v32 }
  0x23   : > { %295 = vrot.lane.b32.xlu2 %v278_v1, %s4915_s20  ;;  %836 = vst.msk [vmem:[#allocation2 + $0xa7] sm:$0x1] %vm824_vm2, %v7396_v32  ;;  %s4932_s20 = smov 6  }
  0x24   : > { %837 = vst.msk [vmem:[#allocation2 + $0xc7] sm:$0x1] %vm824_vm2, %v7396_v32 }
  0x25   : > { %838 = vst.msk [vmem:[#allocation2 + $0xe7] sm:$0x1] %vm824_vm2, %v7396_v32 }
  0x26   : > { %839 = vst.msk [vmem:[#allocation2 + $0x107] sm:$0x1] %vm824_vm2, %v7396_v32 }
  0x27   : > { %840 = vst.msk [vmem:[#allocation2 + $0x127] sm:$0x1] %vm824_vm2, %v7396_v32 }
  0x28   : > { %841 = vst.msk [vmem:[#allocation2 + $0x147] sm:$0x1] %vm824_vm2, %v7396_v32 }
  0x29   : > { %842 = vst.msk [vmem:[#allocation2 + $0x167] sm:$0x1] %vm824_vm2, %v7396_v32 }
  0x2a   : > { %301 = vrot.lane.b32.xlu1 %v278_v1, %s4916_s21  ;;  %299 = vrot.lane.b32.xlu0 %v5039_v0, %s4916_s21  ;;  %843 = vst.msk [vmem:[#allocation2 + $0x187] sm:$0x1] %vm824_vm2, %v7396_v32  ;;  %s4933_s21 = smov 9  }
  0x2b   : > { %305 = vrot.lane.b32.xlu2 %v5039_v0, %s4917_s22  ;;  %844 = vst.msk [vmem:[#allocation2 + $0x1a7] sm:$0x1] %vm824_vm2, %v7396_v32 }
  0x2c   : > { %845 = vst.msk [vmem:[#allocation2 + $0x1c7] sm:$0x1] %vm824_vm2, %v7396_v32 }
  0x2d   : > { %846 = vst.msk [vmem:[#allocation2 + $0x1e7] sm:$0x1] %vm824_vm2, %v7396_v32 }
  0x2e   : > { %847 = vst.msk [vmem:[#allocation2 + $0x207] sm:$0x1] %vm824_vm2, %v7396_v32 }
  0x2f   : > { %848 = vst.msk [vmem:[#allocation2 + $0x227] sm:$0x1] %vm824_vm2, %v7396_v32 }
  0x30   : > { %850 = vst.msk [vmem:[#allocation2 + $0x38] sm:$0x1] %vm824_vm2, %v7396_v32 }
  0x31   : > { %851 = vst.msk [vmem:[#allocation2 + $0x58] sm:$0x1] %vm824_vm2, %v7396_v32 }
  0x32   : > { %311 = vrot.lane.b32.xlu1 %v5039_v0, %s4918_s23  ;;  %307 = vrot.lane.b32.xlu0 %v278_v1, %s4917_s22  ;;  %852 = vst.msk [vmem:[#allocation2 + $0x78] sm:$0x1] %vm824_vm2, %v7396_v32  ;;  %s4934_s22 = smov 18  }
  0x33   : > { %313 = vrot.lane.b32.xlu2 %v278_v1, %s4918_s23  ;;  %853 = vst.msk [vmem:[#allocation2 + $0x98] sm:$0x1] %vm824_vm2, %v7396_v32  ;;  %s4935_s23 = smov 12  }
  0x34   : > { %854 = vst.msk [vmem:[#allocation2 + $0xb8] sm:$0x1] %vm824_vm2, %v7396_v32 }
  0x35   : > { %855 = vst.msk [vmem:[#allocation2 + $0xd8] sm:$0x1] %vm824_vm2, %v7396_v32 }
  0x36   : > { %856 = vst.msk [vmem:[#allocation2 + $0xf8] sm:$0x1] %vm824_vm2, %v7396_v32 }
  0x37   : > { %857 = vst.msk [vmem:[#allocation2 + $0x118] sm:$0x1] %vm824_vm2, %v7396_v32 }
  0x38   : > { %858 = vst.msk [vmem:[#allocation2 + $0x138] sm:$0x1] %vm824_vm2, %v7396_v32 }
  0x39   : > { %859 = vst.msk [vmem:[#allocation2 + $0x158] sm:$0x1] %vm824_vm2, %v7396_v32 }
  0x3a   : > { %319 = vrot.lane.b32.xlu1 %v278_v1, %s4919_s29  ;;  %317 = vrot.lane.b32.xlu0 %v5039_v0, %s4919_s29  ;;  %860 = vst.msk [vmem:[#allocation2 + $0x178] sm:$0x1] %vm824_vm2, %v7396_v32  ;;  %s4936_s29 = smov 21  }
  0x3b   : > { %323 = vrot.lane.b32.xlu2 %v5039_v0, %s4920_s8  ;;  %861 = vst.msk [vmem:[#allocation2 + $0x198] sm:$0x1] %vm824_vm2, %v7396_v32 }
  0x3c   : > { %862 = vst.msk [vmem:[#allocation2 + $0x1b8] sm:$0x1] %vm824_vm2, %v7396_v32 }
  0x3d   : > { %863 = vst.msk [vmem:[#allocation2 + $0x1d8] sm:$0x1] %vm824_vm2, %v7396_v32 }
  0x3e   : > { %864 = vst.msk [vmem:[#allocation2 + $0x1f8] sm:$0x1] %vm824_vm2, %v7396_v32 }
  0x3f   : > { %865 = vst.msk [vmem:[#allocation2 + $0x218] sm:$0x1] %vm824_vm2, %v7396_v32 }
  0x40   : > { %849 = vst.msk [vmem:[#allocation2 + $0x18] sm:$0x1] %vm824_vm2, %v7396_v32 }
  0x41   : > { %866 = vst.msk [vmem:[#allocation2 + $0x238] sm:$0x1] %vm824_vm2, %v7396_v32  ;;  %vm3277_vm2 = vcmask 1044484  }
  0x42   : > { %329 = vrot.lane.b32.xlu1 %v5039_v0, %s4921_s9  ;;  %325 = vrot.lane.b32.xlu0 %v278_v1, %s4920_s8  ;;  %s4937_s8 = smov 15  }
  0x43   : > { %331 = vrot.lane.b32.xlu2 %v278_v1, %s4921_s9  ;;  %s4938_s9 = smov 24  }
  0x4a   : > { %337 = vrot.lane.b32.xlu1 %v278_v1, %s4922_s13  ;;  %335 = vrot.lane.b32.xlu0 %v5039_v0, %s4922_s13 }
  0x4b   : > { %341 = vrot.lane.b32.xlu2 %v5039_v0, %s4923_s14 }
  0x52   : > { %347 = vrot.lane.b32.xlu1 %v5039_v0, %s4924_s15  ;;  %343 = vrot.lane.b32.xlu0 %v278_v1, %s4923_s14 }
  0x53   : > { %349 = vrot.lane.b32.xlu2 %v278_v1, %s4924_s15 }
  0x5a   : > { %355 = vrot.lane.b32.xlu1 %v278_v1, %s4925_s16  ;;  %353 = vrot.lane.b32.xlu0 %v5039_v0, %s4925_s16 }
  0x5b   : > { %359 = vrot.lane.b32.xlu2 %v5039_v0, %s4926_s17 }
  0x62   : > { %365 = vrot.lane.b32.xlu1 %v5039_v0, %s4927_s18  ;;  %361 = vrot.lane.b32.xlu0 %v278_v1, %s4926_s17 }
  0x63   : > { %367 = vrot.lane.b32.xlu2 %v278_v1, %s4927_s18  ;;  %s4869_s18 = scalar_lea.hbm %s7395_s7, 4 }
  0x6a   : > { %1223 = vrot.lane.b32.xlu1 %v933_v55, %s4931_s19 }
  0x75   : > { %v294_v2 = vpop.permute.xlu2 %293 }
  0x76   : > { %v384_v15 = vrot.slane %v294_v2, 4 }
  0x7d   : > { %v296_v3 = vpop.permute.xlu2 %295 }
  0x7e   : > { %v608_v10 = vrot.slane %v296_v3, 4 }
  0x85   : > { %v5056_v4 = vpop.permute.xlu2 %305 }
  0x8c   : > { %v288_v5 = vpop.permute.xlu1 %287  ;;  %v282_v6 = vpop.permute.xlu0 %281 }
  0x8d   : > { %v5058_v7 = vpop.permute.xlu2 %313  ;;  %v371_v22 = vrot.slane %v288_v5, 4  ;;  %v385_v24 = vsel %vm7401_vm0, %v384_v15, %v282_v6  ;;  %v386_v25 = vrot.slane %v282_v6, 4  ;;  %v375_v35 = vsel %vm7401_vm0, %v288_v5, %v374_v23 }
  0x8e   : > { %v391_v33 = vperm.slane %v385_v24, %v5063_v19  ;;  %v383_v45 = vperm.slane %v375_v35, %v5063_v19  ;;  %v620_v51 = vrot.slane %v5058_v7, 4 }
  0x8f   : > { %v373_v34 = vsel %vm7401_vm0, %v371_v22, %v5039_v0  ;;  %v387_v37 = vsel %vm7401_vm0, %v294_v2, %v386_v25 }
  0x90   : > { %v379_v44 = vperm.slane %v373_v34, %v5063_v19  ;;  %v420_v46 = vrot.slane %v391_v33, 4  ;;  %v395_v47 = vperm.slane %v387_v37, %v5063_v19  ;;  %v434_v61 = vrot.slane %v383_v45, 4 }
  0x92   : > { %v422_v60 = vrot.slane %v379_v44, 4  ;;  %v421_v62 = vsel %vm7401_vm0, %v420_v46, %v379_v44  ;;  %v432_v63 = vrot.slane %v395_v47, 4  ;;  %v5136_v12 = vsel %vm7401_vm0, %v395_v47, %v434_v61 }
  0x93   : > { %v5133_v11 = vperm.slane %v421_v62, %v5100_v56 }
  0x94   : > { %v290_v8 = vpop.permute.xlu1 %289  ;;  %v284_v9 = vpop.permute.xlu0 %283  ;;  %v423_v15 = vsel %vm7401_vm0, %v391_v33, %v422_v60 }
  0x95   : > { %v596_v14 = vrot.slane %v290_v8, 4  ;;  %v5060_v16 = vpop.permute.xlu2 %323  ;;  %v610_v17 = vrot.slane %v284_v9, 4  ;;  %v609_v18 = vsel %vm7401_vm0, %v608_v10, %v284_v9  ;;  %v599_v21 = vsel %vm7401_vm0, %v290_v8, %v598_v13 }
  0x96   : > { %v615_v27 = vperm.slane %v609_v18, %v5063_v19  ;;  %v607_v31 = vperm.slane %v599_v21, %v5063_v19  ;;  %v410_v9 = vrot.slane %v5056_v4, 4 }
  0x97   : > { %v597_v20 = vsel %vm7401_vm0, %v596_v14, %v278_v1  ;;  %v611_v26 = vsel %vm7401_vm0, %v296_v3, %v610_v17  ;;  %v5146_v17 = vsel %vm7401_vm0, %v432_v63, %v383_v45 }
  0x98   : > { %v603_v30 = vperm.slane %v597_v20, %v5063_v19  ;;  %v619_v36 = vperm.slane %v611_v26, %v5063_v19  ;;  %v644_v38 = vrot.slane %v615_v27, 4  ;;  %v658_v42 = vrot.slane %v607_v31, 4 }
  0x9a   : > { %v646_v41 = vrot.slane %v603_v30, 4  ;;  %v656_v48 = vrot.slane %v619_v36, 4  ;;  %v645_v50 = vsel %vm7401_vm0, %v644_v38, %v603_v30  ;;  %v659_v58 = vsel %vm7401_vm0, %v619_v36, %v658_v42 }
  0x9b   : > { %v5111_v0 = vperm.slane %v645_v50, %v5100_v56  ;;  %v5122_v5 = vperm.slane %v659_v58, %v5100_v56 }
  0x9c   : > { %v302_v28 = vpop.permute.xlu1 %301  ;;  %v300_v29 = vpop.permute.xlu0 %299  ;;  %v647_v57 = vsel %vm7401_vm0, %v615_v27, %v646_v41  ;;  %v657_v1 = vsel %vm7401_vm0, %v656_v48, %v607_v31 }
  0x9d   : > { %v5087_v43 = vpop.permute.xlu2 %331  ;;  %v622_v49 = vrot.slane %v302_v28, 4  ;;  %v398_v52 = vrot.slane %v300_v29, 4  ;;  %v5119_v3 = vperm.slane %v647_v57, %v5100_v56  ;;  %v621_v6 = vsel %vm7401_vm0, %v620_v51, %v302_v28 }
  0x9e   : > { %v5139_v13 = vperm.slane %v657_v1, %v5100_v56  ;;  %v627_v18 = vperm.slane %v621_v6, %v5063_v19  ;;  %v694_v22 = vrot.slane %v5111_v0, 4  ;;  %v706_v24 = vrot.slane %v5122_v5, 4 }
  0x9f   : > { %v623_v2 = vsel %vm7401_vm0, %v5058_v7, %v622_v49  ;;  %v698_v23 = vrot.slane %v5119_v3, 4 }
  0xa0   : > { %v631_v14 = vperm.slane %v623_v2, %v5063_v19  ;;  %v702_v33 = vrot.slane %v5139_v13, 4  ;;  %v670_v37 = vrot.slane %v627_v18, 4 }
  0xa2   : > { %v682_v34 = vrot.slane %v631_v14, 4 }
  0xa4   : > { %v312_v53 = vpop.permute.xlu1 %311  ;;  %v308_v54 = vpop.permute.xlu0 %307 }
  0xa5   : > { %v396_v59 = vrot.slane %v312_v53, 4  ;;  %v399_v8 = vsel %vm7401_vm0, %v312_v53, %v398_v52  ;;  %v634_v10 = vrot.slane %v308_v54, 4  ;;  %v5150_v21 = vpop.permute.xlu2 %341 }
  0xa6   : > { %v407_v20 = vperm.slane %v399_v8, %v5063_v19 }
  0xa7   : > { %v397_v7 = vsel %vm7401_vm0, %v396_v59, %v300_v29 }
  0xa8   : > { %v403_v25 = vperm.slane %v397_v7, %v5063_v19  ;;  %v458_v38 = vrot.slane %v407_v20, 4  ;;  %v431_v7 = vperm.slane %v423_v15, %v5100_v56 }
  0xaa   : > { %v446_v46 = vrot.slane %v403_v25, 4 }
  0xac   : > { %v320_v26 = vpop.permute.xlu1 %319  ;;  %v318_v27 = vpop.permute.xlu0 %317 }
  0xad   : > { %v632_v28 = vrot.slane %v320_v26, 4  ;;  %v635_v29 = vsel %vm7401_vm0, %v320_v26, %v634_v10  ;;  %v408_v30 = vrot.slane %v318_v27, 4  ;;  %v411_v31 = vsel %vm7401_vm0, %v318_v27, %v410_v9  ;;  %v5203_v9 = vpop.permute.xlu2 %349 }
  0xae   : > { %v643_v35 = vperm.slane %v635_v29, %v5063_v19  ;;  %v419_v36 = vperm.slane %v411_v31, %v5063_v19  ;;  %v443_v31 = vperm.slane %v5136_v12, %v5100_v56 }
  0xaf   : > { %v633_v39 = vsel %vm7401_vm0, %v632_v28, %v308_v54  ;;  %v409_v40 = vsel %vm7401_vm0, %v408_v30, %v5056_v4  ;;  %v470_v28 = vrot.slane %v5133_v11, 4 }
  0xb0   : > { %v639_v41 = vperm.slane %v633_v39, %v5063_v19  ;;  %v680_v42 = vrot.slane %v643_v35, 4  ;;  %v683_v44 = vsel %vm7401_vm0, %v643_v35, %v682_v34  ;;  %v415_v45 = vperm.slane %v409_v40, %v5063_v19 }
  0xb1   : > { %v691_v47 = vperm.slane %v683_v44, %v5100_v56  ;;  %v456_v48 = vrot.slane %v419_v36, 4  ;;  %v459_v49 = vsel %vm7401_vm0, %v419_v36, %v458_v38  ;;  %v496_v39 = vrot.slane %v5150_v21, 4 }
  0xb2   : > { %v668_v4 = vrot.slane %v639_v41, 4  ;;  %v671_v50 = vsel %vm7401_vm0, %v639_v41, %v670_v37  ;;  %v681_v51 = vsel %vm7401_vm0, %v680_v42, %v631_v14  ;;  %v444_v52 = vrot.slane %v415_v45, 4 }
  0xb3   : > { %v679_v53 = vperm.slane %v671_v50, %v5100_v56  ;;  %v687_v54 = vperm.slane %v681_v51, %v5100_v56  ;;  %v704_v55 = vrot.slane %v691_v47, 4  ;;  %v707_v57 = vsel %vm7401_vm0, %v691_v47, %v706_v24 }
  0xb4   : > { %v669_v58 = vsel %vm7401_vm0, %v668_v4, %v627_v18  ;;  %898 = vst.msk [vmem:[#allocation2 + $0x208] sm:$0xff] %vm820_vm1, %v707_v57  ;;  %v445_v59 = vsel %vm7401_vm0, %v444_v52, %v403_v25  ;;  %v447_v60 = vsel %vm7401_vm0, %v415_v45, %v446_v46  ;;  %v457_v61 = vsel %vm7401_vm0, %v456_v48, %v407_v20  ;;  %v5197_v62 = vpop.permute.xlu1 %329  ;;  %v5199_v63 = vpop.permute.xlu0 %325 }
  0xb5   : > { %v675_v1 = vperm.slane %v669_v58, %v5100_v56  ;;  %v696_v2 = vrot.slane %v679_v53, 4  ;;  %v699_v6 = vsel %vm7401_vm0, %v679_v53, %v698_v23  ;;  %v700_v8 = vrot.slane %v687_v54, 4  ;;  %v360_v45 = vpop.permute.xlu2 %359 }
  0xb6   : > { %v703_v10 = vsel %vm7401_vm0, %v687_v54, %v702_v33  ;;  %890 = vst.msk [vmem:[#allocation2 + $0x188] sm:$0xff] %vm820_vm1, %v699_v6  ;;  %v451_v14 = vperm.slane %v445_v59, %v5100_v56  ;;  %v455_v18 = vperm.slane %v447_v60, %v5100_v56  ;;  %v439_v20 = vperm.slane %v5146_v17, %v5100_v56 }
  0xb7   : > { %v692_v23 = vrot.slane %v675_v1, 4  ;;  %v695_v24 = vsel %vm7401_vm0, %v675_v1, %v694_v22  ;;  %v697_v25 = vsel %vm7401_vm0, %v696_v2, %v5119_v3  ;;  %894 = vst.msk [vmem:[#allocation2 + $0x1c8] sm:$0xff] %vm820_vm1, %v703_v10  ;;  %v701_v15 = vsel %vm7401_vm0, %v700_v8, %v5139_v13 }
  0xb8   : > { %886 = vst.msk [vmem:[#allocation2 + $0x148] sm:$0xff] %vm820_vm1, %v695_v24  ;;  %v463_v26 = vperm.slane %v457_v61, %v5100_v56  ;;  %v467_v27 = vperm.slane %v459_v49, %v5100_v56  ;;  %v468_v17 = vrot.slane %v451_v14, 4  ;;  %v705_v3 = vsel %vm7401_vm0, %v704_v55, %v5122_v5 }
  0xb9   : > { %v693_v22 = vsel %vm7401_vm0, %v692_v23, %v5111_v0  ;;  %888 = vst.msk [vmem:[#allocation2 + $0x168] sm:$0xff] %vm820_vm1, %v697_v25  ;;  %v472_v29 = vrot.slane %v455_v18, 4  ;;  %v474_v33 = vrot.slane %v431_v7, 4  ;;  %v471_v0 = vsel %vm7401_vm0, %v451_v14, %v470_v28 }
  0xba   : > { %884 = vst.msk [vmem:[#allocation2 + $0x128] sm:$0xff] %vm820_vm1, %v693_v22  ;;  %v469_v13 = vsel %vm7401_vm0, %v468_v17, %v5133_v11  ;;  %v476_v30 = vrot.slane %v463_v26, 4  ;;  %v480_v34 = vrot.slane %v467_v27, 4  ;;  %v478_v37 = vrot.slane %v439_v20, 4  ;;  %v932_v22 = vld [vmem:[#allocation2 + $0x8] sm:$0xff] }
  0xbb   : > { %892 = vst.msk [vmem:[#allocation2 + $0x1a8] sm:$0xff] %vm820_vm1, %v701_v15  ;;  %v473_v5 = vsel %vm7401_vm0, %v472_v29, %v431_v7  ;;  %v475_v38 = vsel %vm7401_vm0, %v455_v18, %v474_v33  ;;  %v498_v40 = vrot.slane %v5197_v62, 4  ;;  %v482_v41 = vrot.slane %v443_v31, 4  ;;  %1221 = vrot.lane.b32.xlu0 %v932_v22, %s4931_s19 }
  0xbc   : > { %896 = vst.msk [vmem:[#allocation2 + $0x1e8] sm:$0xff] %vm820_vm1, %v705_v3  ;;  %v338_v35 = vpop.permute.xlu1 %337  ;;  %v336_v36 = vpop.permute.xlu0 %335  ;;  %v477_v12 = vsel %vm7401_vm0, %v476_v30, %v439_v20  ;;  %v486_v42 = vrot.slane %v5060_v16, 4  ;;  %v479_v44 = vsel %vm7401_vm0, %v463_v26, %v478_v37  ;;  %v481_v46 = vsel %vm7401_vm0, %v480_v34, %v443_v31 }
  0xbd   : > { %868 = vst.msk [vmem:[#allocation2 + $0x28] sm:$0xff] %vm820_vm1, %v469_v13  ;;  %v484_v11 = vrot.slane %v336_v36, 4  ;;  %v483_v47 = vsel %vm7401_vm0, %v467_v27, %v482_v41  ;;  %v497_v4 = vsel %vm7401_vm0, %v496_v39, %v5197_v62  ;;  %v499_v50 = vsel %vm7401_vm0, %v5150_v21, %v498_v40  ;;  %v368_v7 = vpop.permute.xlu2 %367 }
  0xbe   : > { %870 = vst.msk [vmem:[#allocation2 + $0x48] sm:$0xff] %vm820_vm1, %v471_v0  ;;  %v487_v49 = vsel %vm7401_vm0, %v336_v36, %v486_v42  ;;  %v710_v51 = vrot.slane %v5199_v63, 4  ;;  %v503_v57 = vperm.slane %v497_v4, %v5063_v19  ;;  %v507_v58 = vperm.slane %v499_v50, %v5063_v19 }
  0xbf   : > { %872 = vst.msk [vmem:[#allocation2 + $0x68] sm:$0xff] %vm820_vm1, %v473_v5  ;;  %v485_v48 = vsel %vm7401_vm0, %v484_v11, %v5060_v16  ;;  %v495_v16 = vperm.slane %v487_v49, %v5063_v19  ;;  %v708_v21 = vrot.slane %v338_v35, 4  ;;  %v508_v1 = vrot.slane %v360_v45, 4 }
  0xc0   : > { %874 = vst.msk [vmem:[#allocation2 + $0x88] sm:$0xff] %vm820_vm1, %v475_v38  ;;  %v491_v52 = vperm.slane %v485_v48, %v5063_v19  ;;  %v711_v60 = vsel %vm7401_vm0, %v338_v35, %v710_v51  ;;  %v532_v2 = vrot.slane %v503_v57, 4  ;;  %v544_v6 = vrot.slane %v507_v58, 4 }
  0xc1   : > { %876 = vst.msk [vmem:[#allocation2 + $0xa8] sm:$0xff] %vm820_vm1, %v477_v12  ;;  %v546_v62 = vrot.slane %v495_v16, 4  ;;  %v722_v10 = vrot.slane %v5087_v43, 4  ;;  %v709_v14 = vsel %vm7401_vm0, %v708_v21, %v5199_v63  ;;  %v5289_v18 = vperm.slane %v711_v60, %v5063_v19 }
  0xc2   : > { %878 = vst.msk [vmem:[#allocation2 + $0xc8] sm:$0xff] %vm820_vm1, %v479_v44  ;;  %v534_v61 = vrot.slane %v491_v52, 4  ;;  %v533_v20 = vsel %vm7401_vm0, %v532_v2, %v491_v52  ;;  %v545_v23 = vsel %vm7401_vm0, %v544_v6, %v495_v16  ;;  %v744_v27 = vrot.slane %v368_v7, 4 }
  0xc3   : > { %880 = vst.msk [vmem:[#allocation2 + $0xe8] sm:$0xff] %vm820_vm1, %v481_v46  ;;  %v547_v63 = vsel %vm7401_vm0, %v507_v58, %v546_v62  ;;  %v5310_v13 = vperm.slane %v533_v20, %v5100_v56  ;;  %v5313_v30 = vperm.slane %v545_v23, %v5100_v56  ;;  %v734_v11 = vrot.slane %v5203_v9, 4 }
  0xc4   : > { %882 = vst.msk [vmem:[#allocation2 + $0x108] sm:$0xff] %vm820_vm1, %v483_v47  ;;  %v5266_v53 = vld [vmem:[#allocation2 + $0x28] sm:$0xff]  ;;  %v348_v54 = vpop.permute.xlu1 %347  ;;  %v344_v55 = vpop.permute.xlu0 %343  ;;  %v535_v15 = vsel %vm7401_vm0, %v503_v57, %v534_v61  ;;  %v5322_v5 = vperm.slane %v547_v63, %v5100_v56  ;;  %v770_v12 = vrot.slane %v5289_v18, 4 }
  0xc5   : > { %1225 = vrot.lane.b32.xlu2 %v5266_v53, %s4931_s19  ;;  %v720_v59 = vrot.slane %v344_v55, 4  ;;  %v510_v8 = vrot.slane %v348_v54, 4  ;;  %v509_v26 = vsel %vm7401_vm0, %v508_v1, %v348_v54  ;;  %v723_v29 = vsel %vm7401_vm0, %v344_v55, %v722_v10  ;;  %v5347_v47 = vld [vmem:[#allocation2 + $0x48] sm:$0xff] }
  0xc6   : > { %v5319_v0 = vperm.slane %v535_v15, %v5100_v56  ;;  %v5325_v34 = vperm.slane %v509_v26, %v5063_v19  ;;  %v5331_v36 = vperm.slane %v723_v29, %v5063_v19  ;;  %v582_v41 = vrot.slane %v5310_v13, 4 }
  0xc7   : > { %v721_v25 = vsel %vm7401_vm0, %v720_v59, %v5087_v43  ;;  %v715_v43 = vperm.slane %v709_v14, %v5063_v19  ;;  %v511_v3 = vsel %vm7401_vm0, %v360_v45, %v510_v8  ;;  %v590_v42 = vrot.slane %v5313_v30, 4 }
  0xc8   : > { %v727_v31 = vperm.slane %v721_v25, %v5063_v19  ;;  %v519_v35 = vperm.slane %v511_v3, %v5063_v19  ;;  %v586_v45 = vrot.slane %v5319_v0, 4  ;;  %v594_v46 = vrot.slane %v5322_v5, 4 }
  0xc9   : > { %v758_v40 = vrot.slane %v715_v43, 4  ;;  %v558_v4 = vrot.slane %v5325_v34, 4  ;;  %v768_v51 = vrot.slane %v5331_v36, 4  ;;  %v5357_v52 = vsel %vm7401_vm0, %v5331_v36, %v770_v12 }
  0xca   : > { %v756_v44 = vrot.slane %v727_v31, 4  ;;  %v570_v50 = vrot.slane %v519_v35, 4 }
  0xcb   : > { %v948_v24 = vld [vmem:[#allocation2 + $0x108] sm:$0xff]  ;;  %v759_v60 = vsel %vm7401_vm0, %v727_v31, %v758_v40 }
  0xcc   : > { %1253 = vrot.lane.b32.xlu1 %v948_v24, %s4931_s19  ;;  %v356_v17 = vpop.permute.xlu1 %355  ;;  %v354_v28 = vpop.permute.xlu0 %353  ;;  %v757_v59 = vsel %vm7401_vm0, %v756_v44, %v715_v43 }
  0xcd   : > { %v746_v33 = vrot.slane %v356_v17, 4  ;;  %v745_v37 = vsel %vm7401_vm0, %v744_v27, %v356_v17  ;;  %v522_v39 = vrot.slane %v354_v28, 4  ;;  %v763_v23 = vperm.slane %v757_v59, %v5100_v56 }
  0xce   : > { %v751_v48 = vperm.slane %v745_v37, %v5063_v19 }
  0xcf   : > { %v747_v38 = vsel %vm7401_vm0, %v368_v7, %v746_v33 }
  0xd0   : > { %v755_v49 = vperm.slane %v747_v38, %v5063_v19  ;;  %v780_v1 = vrot.slane %v751_v48, 4  ;;  %v769_v38 = vsel %vm7401_vm0, %v768_v51, %v5289_v18 }
  0xd2   : > { %v792_v2 = vrot.slane %v755_v49, 4 }
  0xd4   : > { %1229 = vrot.lane.b32.xlu1 %v5347_v47, %s4931_s19  ;;  %v366_v16 = vpop.permute.xlu1 %365  ;;  %v362_v54 = vpop.permute.xlu0 %361 }
  0xd5   : > { %v520_v55 = vrot.slane %v366_v16, 4  ;;  %v523_v57 = vsel %vm7401_vm0, %v366_v16, %v522_v39  ;;  %v732_v58 = vrot.slane %v362_v54, 4  ;;  %v735_v21 = vsel %vm7401_vm0, %v362_v54, %v734_v11 }
  0xd6   : > { %v531_v61 = vperm.slane %v523_v57, %v5063_v19  ;;  %v743_v62 = vperm.slane %v735_v21, %v5063_v19  ;;  %v767_v39 = vperm.slane %v759_v60, %v5100_v56  ;;  %v779_v16 = vperm.slane %v5357_v52, %v5100_v56 }
  0xd7   : > { %v521_v6 = vsel %vm7401_vm0, %v520_v55, %v354_v28  ;;  %v733_v8 = vsel %vm7401_vm0, %v732_v58, %v5203_v9 }
  0xd8   : > { %v527_v7 = vperm.slane %v521_v6, %v5063_v19  ;;  %v568_v10 = vrot.slane %v531_v61, 4  ;;  %v571_v14 = vsel %vm7401_vm0, %v531_v61, %v570_v50  ;;  %v739_v20 = vperm.slane %v733_v8, %v5063_v19  ;;  %v5458_v6 = vld [vmem:[#allocation2 + $0x88] sm:$0xff] }
  0xd9   : > { %v579_v24 = vperm.slane %v571_v14, %v5100_v56  ;;  %v793_v25 = vsel %vm7401_vm0, %v792_v2, %v743_v62  ;;  %v794_v9 = vrot.slane %v743_v62, 4  ;;  %v810_v54 = vrot.slane %v767_v39, 4  ;;  %v5462_v8 = vld [vmem:[#allocation2 + $0xa8] sm:$0xff] }
  0xda   : > { %v556_v15 = vrot.slane %v527_v7, 4  ;;  %v559_v63 = vsel %vm7401_vm0, %v527_v7, %v558_v4  ;;  %v569_v26 = vsel %vm7401_vm0, %v568_v10, %v519_v35  ;;  %v781_v19 = vsel %vm7401_vm0, %v780_v1, %v739_v20  ;;  %v5466_v7 = vld [vmem:[#allocation2 + $0x68] sm:$0xff] }
  0xdb   : > { %v567_v27 = vperm.slane %v559_v63, %v5100_v56  ;;  %v575_v17 = vperm.slane %v569_v26, %v5100_v56  ;;  %v592_v28 = vrot.slane %v579_v24, 4  ;;  %v595_v22 = vsel %vm7401_vm0, %v579_v24, %v594_v46  ;;  %v952_v26 = vld [vmem:[#allocation2 + $0x148] sm:$0xff] }
  0xdc   : > { %v557_v43 = vsel %vm7401_vm0, %v556_v15, %v5325_v34  ;;  %883 = vst.msk [vmem:[#allocation2 + $0x110] sm:$0xff] %vm820_vm1, %v595_v22  ;;  %v782_v3 = vrot.slane %v739_v20, 4  ;;  %v787_v29 = vperm.slane %v781_v19, %v5100_v56  ;;  %v795_v31 = vsel %vm7401_vm0, %v755_v49, %v794_v9  ;;  %v954_v15 = vld [vmem:[#allocation2 + $0x168] sm:$0xff] }
  0xdd   : > { %v563_v33 = vperm.slane %v557_v43, %v5100_v56  ;;  %v584_v35 = vrot.slane %v567_v27, 4  ;;  %v587_v36 = vsel %vm7401_vm0, %v567_v27, %v586_v45  ;;  %v588_v37 = vrot.slane %v575_v17, 4  ;;  %v950_v27 = vld [vmem:[#allocation2 + $0x128] sm:$0xff] }
  0xde   : > { %v591_v11 = vsel %vm7401_vm0, %v575_v17, %v590_v42  ;;  %875 = vst.msk [vmem:[#allocation2 + $0x90] sm:$0xff] %vm820_vm1, %v587_v36  ;;  %v783_v34 = vsel %vm7401_vm0, %v751_v48, %v782_v3  ;;  %v799_v12 = vperm.slane %v793_v25, %v5100_v56  ;;  %v803_v46 = vperm.slane %v795_v31, %v5100_v56  ;;  %v5487_v25 = vld [vmem:[#allocation2 + $0xc8] sm:$0xff] }
  0xdf   : > { %v580_v40 = vrot.slane %v563_v33, 4  ;;  %v583_v44 = vsel %vm7401_vm0, %v563_v33, %v582_v41  ;;  %v585_v45 = vsel %vm7401_vm0, %v584_v35, %v5319_v0  ;;  %879 = vst.msk [vmem:[#allocation2 + $0xd0] sm:$0xff] %vm820_vm1, %v591_v11  ;;  %v589_v18 = vsel %vm7401_vm0, %v588_v37, %v5313_v30  ;;  %v5503_v43 = vld [vmem:[#allocation2 + $0x1a8] sm:$0xff] }
  0xe0   : > { %871 = vst.msk [vmem:[#allocation2 + $0x50] sm:$0xff] %vm820_vm1, %v583_v44  ;;  %v791_v42 = vperm.slane %v783_v34, %v5100_v56  ;;  %v804_v48 = vrot.slane %v787_v29, 4  ;;  %v775_v49 = vperm.slane %v769_v38, %v5100_v56  ;;  %v806_v4 = vrot.slane %v763_v23, 4  ;;  %v964_v36 = vld [vmem:[#allocation2 + $0x9] sm:$0xff]  ;;  %v965_v34 = vld [vmem:[#allocation2 + $0x11] sm:$0xff] }
  0xe1   : > { %v581_v41 = vsel %vm7401_vm0, %v580_v40, %v5310_v13  ;;  %v593_v0 = vsel %vm7401_vm0, %v592_v28, %v5322_v5  ;;  %873 = vst.msk [vmem:[#allocation2 + $0x70] sm:$0xff] %vm820_vm1, %v585_v45  ;;  %v812_v51 = vrot.slane %v799_v12, 4  ;;  %v816_v5 = vrot.slane %v803_v46, 4  ;;  %v960_v28 = vld [vmem:[#allocation2 + $0x1c8] sm:$0xff]  ;;  %v5535_v40 = vpop.permute.xlu1 %1223 }
  0xe2   : > { %869 = vst.msk [vmem:[#allocation2 + $0x30] sm:$0xff] %vm820_vm1, %v581_v41  ;;  %v805_v30 = vsel %vm7401_vm0, %v804_v48, %v763_v23  ;;  %v808_v50 = vrot.slane %v791_v42, 4  ;;  %v807_v55 = vsel %vm7401_vm0, %v787_v29, %v806_v4  ;;  %v814_v57 = vrot.slane %v775_v49, 4  ;;  %v5482_v23 = vld [vmem:[#allocation2 + $0xe8] sm:$0xff] }
  0xe3   : > { %877 = vst.msk [vmem:[#allocation2 + $0xb0] sm:$0xff] %vm820_vm1, %v589_v18  ;;  %v811_v58 = vsel %vm7401_vm0, %v791_v42, %v810_v54  ;;  %v813_v21 = vsel %vm7401_vm0, %v812_v51, %v775_v49  ;;  %v818_v52 = vrot.slane %v779_v16, 4  ;;  %v817_v61 = vsel %vm7401_vm0, %v816_v5, %v779_v16  ;;  %v949_v9 = vld [vmem:[#allocation2 + $0x110] sm:$0xff]  ;;  %v956_v29 = vld [vmem:[#allocation2 + $0x188] sm:$0xff] }
  0xe4   : > { %881 = vst.msk [vmem:[#allocation2 + $0xf0] sm:$0xff] %vm820_vm1, %v593_v0  ;;  %v809_v13 = vsel %vm7401_vm0, %v808_v50, %v767_v39  ;;  %v815_v59 = vsel %vm7401_vm0, %v799_v12, %v814_v57  ;;  %v962_v38 = vld [vmem:[#allocation2 + $0x1e8] sm:$0xff] }
  0xe5   : > { %885 = vst.msk [vmem:[#allocation2 + $0x130] sm:$0xff] %vm820_vm1, %v805_v30  ;;  %v819_v1 = vsel %vm7401_vm0, %v803_v46, %v818_v52  ;;  %v5478_v20 = vld [vmem:[#allocation2 + $0x90] sm:$0xff]  ;;  %vm3281_vm0 = vcmask 1046534  }
  0xe6   : > { %887 = vst.msk [vmem:[#allocation2 + $0x150] sm:$0xff] %vm820_vm1, %v807_v55  ;;  %v5474_v14 = vld [vmem:[#allocation2 + $0xd0] sm:$0xff] }
  0xe7   : > { %889 = vst.msk [vmem:[#allocation2 + $0x170] sm:$0xff] %vm820_vm1, %v809_v13  ;;  %v5439_v60 = vld [vmem:[#allocation2 + $0x50] sm:$0xff] }
  0xe8   : > { %891 = vst.msk [vmem:[#allocation2 + $0x190] sm:$0xff] %vm820_vm1, %v811_v58  ;;  %1231 = vrot.lane.b32.xlu2 %v5439_v60, %s4931_s19  ;;  %v5445_v62 = vld [vmem:[#allocation2 + $0x70] sm:$0xff] }
  0xe9   : > { %893 = vst.msk [vmem:[#allocation2 + $0x1b0] sm:$0xff] %vm820_vm1, %v813_v21  ;;  %1235 = vrot.lane.b32.xlu1 %v5445_v62, %s4931_s19  ;;  %v5451_v2 = vld [vmem:[#allocation2 + $0x30] sm:$0xff] }
  0xea   : > { %895 = vst.msk [vmem:[#allocation2 + $0x1d0] sm:$0xff] %vm820_vm1, %v815_v59  ;;  %1227 = vrot.lane.b32.xlu0 %v5451_v2, %s4931_s19  ;;  %v5470_v10 = vld [vmem:[#allocation2 + $0xb0] sm:$0xff] }
  0xeb   : > { %897 = vst.msk [vmem:[#allocation2 + $0x1f0] sm:$0xff] %vm820_vm1, %v817_v61  ;;  %v947_v63 = vld [vmem:[#allocation2 + $0xf0] sm:$0xff] }
  0xec   : > { %899 = vst.msk [vmem:[#allocation2 + $0x210] sm:$0xff] %vm820_vm1, %v819_v1  ;;  %v951_v24 = vld [vmem:[#allocation2 + $0x130] sm:$0xff] }
  0xed   : > { %v953_v22 = vld [vmem:[#allocation2 + $0x150] sm:$0xff] }
  0xee   : > { %v955_v17 = vld [vmem:[#allocation2 + $0x170] sm:$0xff] }
  0xef   : > { %v5495_v19 = vld [vmem:[#allocation2 + $0x190] sm:$0xff] }
  0xf0   : > { %1237 = vrot.lane.b32.xlu2 %v5458_v6, %s4931_s19  ;;  %v5510_v33 = vld [vmem:[#allocation2 + $0x29] sm:$0xff]  ;;  %v5519_v37 = vld [vmem:[#allocation2 + $0x51] sm:$0xff] }
  0xf1   : > { %1241 = vrot.lane.b32.xlu1 %v5462_v8, %s4931_s19  ;;  %v961_v31 = vld [vmem:[#allocation2 + $0x1d0] sm:$0xff] }
  0xf2   : > { %1233 = vrot.lane.b32.xlu0 %v5466_v7, %s4931_s19  ;;  %v963_v3 = vld [vmem:[#allocation2 + $0x1f0] sm:$0xff] }
  0xf3   : > { %v5514_v35 = vld [vmem:[#allocation2 + $0x1b0] sm:$0xff] }
  0xf4   : > { %v5524_v11 = vld [vmem:[#allocation2 + $0x31] sm:$0xff]  ;;  %v5528_v12 = vld [vmem:[#allocation2 + $0x89] sm:$0xff] }
  0xf5   : > { %v5537_v44 = vld [vmem:[#allocation2 + $0x69] sm:$0xff]  ;;  %v5541_v45 = vld [vmem:[#allocation2 + $0xb1] sm:$0xff] }
  0xf6   : > { %v5545_v18 = vld [vmem:[#allocation2 + $0x49] sm:$0xff]  ;;  %v5551_v46 = vld [vmem:[#allocation2 + $0x91] sm:$0xff] }
  0xf7   : > { %v5555_v48 = vld [vmem:[#allocation2 + $0xe9] sm:$0xff]  ;;  %v5561_v4 = vld [vmem:[#allocation2 + $0x71] sm:$0xff] }
  0xf8   : > { %1243 = vrot.lane.b32.xlu2 %v5470_v10, %s4931_s19  ;;  %v5567_v0 = vld [vmem:[#allocation2 + $0xc9] sm:$0xff]  ;;  %v5571_v30 = vld [vmem:[#allocation2 + $0x111] sm:$0xff] }
  0xf9   : > { %1247 = vrot.lane.b32.xlu1 %v5474_v14, %s4931_s19  ;;  %v5575_v50 = vld [vmem:[#allocation2 + $0xa9] sm:$0xff]  ;;  %v5585_v55 = vld [vmem:[#allocation2 + $0xf1] sm:$0xff] }
  0xfa   : > { %1239 = vrot.lane.b32.xlu0 %v5478_v20, %s4931_s19  ;;  %v984_v13 = vld [vmem:[#allocation2 + $0x149] sm:$0xff]  ;;  %v5590_v5 = vld [vmem:[#allocation2 + $0xd1] sm:$0xff] }
  0xfb   : > { %v982_v52 = vld [vmem:[#allocation2 + $0x129] sm:$0xff]  ;;  %v987_v59 = vld [vmem:[#allocation2 + $0x171] sm:$0xff] }
  0xfc   : > { %v980_v61 = vld [vmem:[#allocation2 + $0x109] sm:$0xff] }
  0xfd   : > { %v5663_v32 = vld [vmem:[#allocation2 + $0x1c9] sm:$0xff] }
 0x100   : > { %1249 = vrot.lane.b32.xlu2 %v5482_v23, %s4931_s19 }
 0x101   : > { %1259 = vrot.lane.b32.xlu1 %v951_v24, %s4931_s19 }
 0x102   : > { %1245 = vrot.lane.b32.xlu0 %v5487_v25, %s4931_s19 }
 0x108   : > { %1255 = vrot.lane.b32.xlu2 %v949_v9, %s4931_s19 }
 0x109   : > { %1265 = vrot.lane.b32.xlu1 %v954_v15, %s4931_s19  ;;  %v5609_v15 = vld [vmem:[#allocation2 + $0x151] sm:$0xff] }
 0x10a   : > { %1251 = vrot.lane.b32.xlu0 %v947_v63, %s4931_s19  ;;  %v5613_v63 = vld [vmem:[#allocation2 + $0x1a9] sm:$0xff] }
 0x110   : > { %1261 = vrot.lane.b32.xlu2 %v952_v26, %s4931_s19  ;;  %v5617_v26 = vld [vmem:[#allocation2 + $0x131] sm:$0xff] }
 0x111   : > { %1271 = vrot.lane.b32.xlu1 %v5495_v19, %s4931_s19  ;;  %7413 = vst [vmem:[#allocation14_spill] sm:$0xff] %v5617_v26 }
 0x112   : > { %1257 = vrot.lane.b32.xlu0 %v950_v27, %s4931_s19 }
 0x118   : > { %1267 = vrot.lane.b32.xlu2 %v955_v17, %s4931_s19 }
 0x119   : > { %1277 = vrot.lane.b32.xlu1 %v960_v28, %s4931_s19 }
 0x11a   : > { %1263 = vrot.lane.b32.xlu0 %v953_v22, %s4931_s19  ;;  %v988_v22 = vld [vmem:[#allocation2 + $0x189] sm:$0xff] }
 0x11f   : > { %v5532_v39 = vpop.permute.xlu2 %1225 }
 0x120   : > { %1273 = vrot.lane.b32.xlu2 %v5503_v43, %s4931_s19 }
 0x121   : > { %1283 = vrot.lane.b32.xlu1 %v963_v3, %s4931_s19  ;;  %v5627_v3 = vld [vmem:[#allocation2 + $0x27] sm:$0xff] }
 0x122   : > { %1269 = vrot.lane.b32.xlu0 %v956_v29, %s4931_s19  ;;  %v986_v29 = vld [vmem:[#allocation2 + $0x169] sm:$0xff] }
 0x128   : > { %1279 = vrot.lane.b32.xlu2 %v961_v31, %s4931_s19 }
 0x129   : > { %1353 = vrot.lane.b32.xlu1 %v5510_v33, %s4932_s20 }
 0x12a   : > { %1275 = vrot.lane.b32.xlu0 %v5514_v35, %s4931_s19 }
 0x12d   : > { %v5581_v16 = vpop.permute.xlu0 %1221 }
 0x130   : > { %1349 = vrot.lane.b32.xlu2 %v964_v36, %s4932_s20 }
 0x131   : > { %1359 = vrot.lane.b32.xlu1 %v5519_v37, %s4932_s20 }
 0x132   : > { %1281 = vrot.lane.b32.xlu0 %v962_v38, %s4931_s19 }
 0x138   : > { %1355 = vrot.lane.b32.xlu2 %v5524_v11, %s4932_s20 }
 0x139   : > { %1365 = vrot.lane.b32.xlu1 %v5528_v12, %s4932_s20 }
 0x13a   : > { %1351 = vrot.lane.b32.xlu0 %v965_v34, %s4932_s20  ;;  %v5639_v34 = vld [vmem:[#allocation2 + $0x1b1] sm:$0xff] }
 0x13e   : > { %v5557_v49 = vpop.permute.xlu1 %1253 }
 0x13f   : > { %7408 = vst [vmem:[#allocation9_spill] sm:$0xff] %v5557_v49 }
 0x140   : > { %1361 = vrot.lane.b32.xlu2 %v5537_v44, %s4932_s20 }
 0x141   : > { %1371 = vrot.lane.b32.xlu1 %v5541_v45, %s4932_s20 }
 0x142   : > { %v5547_v42 = vpop.permute.xlu2 %1231  ;;  %1357 = vrot.lane.b32.xlu0 %v5545_v18, %s4932_s20 }
 0x146   : > { %v5583_v54 = vpop.permute.xlu1 %1229 }
 0x148   : > { %1367 = vrot.lane.b32.xlu2 %v5551_v46, %s4932_s20 }
 0x149   : > { %1377 = vrot.lane.b32.xlu1 %v5555_v48, %s4932_s20 }
 0x14a   : > { %v5563_v41 = vpop.permute.xlu2 %1237  ;;  %1363 = vrot.lane.b32.xlu0 %v5561_v4, %s4932_s20 }
 0x150   : > { %1373 = vrot.lane.b32.xlu2 %v5567_v0, %s4932_s20 }
 0x151   : > { %1383 = vrot.lane.b32.xlu1 %v5571_v30, %s4932_s20 }
 0x152   : > { %v5577_v51 = vpop.permute.xlu2 %1243  ;;  %1369 = vrot.lane.b32.xlu0 %v5575_v50, %s4932_s20 }
 0x153   : > { %7409 = vst [vmem:[#allocation10_spill] sm:$0xff] %v5577_v51 }
 0x158   : > { %1379 = vrot.lane.b32.xlu2 %v5585_v55, %s4932_s20 }
 0x159   : > { %1389 = vrot.lane.b32.xlu1 %v984_v13, %s4932_s20  ;;  %v5641_v13 = vld [vmem:[#allocation2 + $0x47] sm:$0xff] }
 0x15a   : > { %v5592_v57 = vpop.permute.xlu2 %1249  ;;  %1375 = vrot.lane.b32.xlu0 %v5590_v5, %s4932_s20 }
 0x15b   : > { %7410 = vst [vmem:[#allocation11_spill] sm:$0xff] %v5592_v57  ;;  %v5596_v58 = vpop.permute.xlu1 %1235 }
 0x15c   : > { %v5598_v21 = vpop.permute.xlu0 %1227 }
 0x160   : > { %1385 = vrot.lane.b32.xlu2 %v982_v52, %s4932_s20  ;;  %v5647_v52 = vld [vmem:[#allocation2 + $0x191] sm:$0xff] }
 0x161   : > { %1395 = vrot.lane.b32.xlu1 %v987_v59, %s4932_s20 }
 0x162   : > { %v5602_v1 = vpop.permute.xlu2 %1255  ;;  %1381 = vrot.lane.b32.xlu0 %v980_v61, %s4932_s20 }
 0x163   : > { %7411 = vst [vmem:[#allocation12_spill] sm:$0xff] %v5602_v1  ;;  %v5605_v24 = vpop.permute.xlu1 %1241  ;;  %v5673_v1 = vld [vmem:[#allocation2 + $0x4f] sm:$0xff] }
 0x164   : > { %7412 = vst [vmem:[#allocation13_spill] sm:$0xff] %v5605_v24  ;;  %v5607_v9 = vpop.permute.xlu0 %1233 }
 0x168   : > { %1391 = vrot.lane.b32.xlu2 %v5609_v15, %s4932_s20 }
 0x169   : > { %1401 = vrot.lane.b32.xlu1 %v5613_v63, %s4932_s20 }
 0x16a   : > { %v5619_v27 = vpop.permute.xlu2 %1261  ;;  %1387 = vrot.lane.b32.xlu0 %v5617_v26, %s4932_s20 }
 0x16b   : > { %7414 = vst [vmem:[#allocation15_spill] sm:$0xff] %v5619_v27  ;;  %v5623_v17 = vpop.permute.xlu1 %1247 }
 0x16c   : > { %7415 = vst [vmem:[#allocation16_spill] sm:$0xff] %v5623_v17  ;;  %v5625_v28 = vpop.permute.xlu0 %1239 }
 0x170   : > { %1397 = vrot.lane.b32.xlu2 %v988_v22, %s4932_s20 }
 0x171   : > { %1477 = vrot.lane.b32.xlu1 %v5627_v3, %s4933_s21 }
 0x172   : > { %v5632_v31 = vpop.permute.xlu2 %1267  ;;  %1393 = vrot.lane.b32.xlu0 %v986_v29, %s4932_s20  ;;  %v5657_v29 = vld [vmem:[#allocation2 + $0x2f] sm:$0xff] }
 0x173   : > { %7416 = vst [vmem:[#allocation17_spill] sm:$0xff] %v5632_v31  ;;  %v5635_v36 = vpop.permute.xlu1 %1259 }
 0x174   : > { %7417 = vst [vmem:[#allocation18_spill] sm:$0xff] %v5635_v36  ;;  %v5637_v38 = vpop.permute.xlu0 %1245 }
 0x175   : > { %7418 = vst [vmem:[#allocation19_spill] sm:$0xff] %v5637_v38 }
 0x178   : > { %1403 = vrot.lane.b32.xlu2 %v5639_v34, %s4932_s20 }
 0x179   : > { %1861 = vrot.lane.b32.xlu1 %v5641_v13, %s4934_s22 }
 0x17a   : > { %v5649_v59 = vpop.permute.xlu2 %1273  ;;  %1399 = vrot.lane.b32.xlu0 %v5647_v52, %s4932_s20 }
 0x17b   : > { %7419 = vst [vmem:[#allocation20_spill] sm:$0xff] %v5649_v59  ;;  %v5653_v61 = vpop.permute.xlu1 %1265 }
 0x17c   : > { %7420 = vst [vmem:[#allocation21_spill] sm:$0xff] %v5653_v61  ;;  %v5655_v22 = vpop.permute.xlu0 %1251 }
 0x17d   : > { %7421 = vst [vmem:[#allocation22_spill] sm:$0xff] %v5655_v22 }
 0x180   : > { %1605 = vrot.lane.b32.xlu2 %v5266_v53, %s4935_s23 }
 0x181   : > { %1479 = vrot.lane.b32.xlu1 %v5657_v29, %s4933_s21 }
 0x182   : > { %v5665_v56 = vpop.permute.xlu2 %1279  ;;  %1405 = vrot.lane.b32.xlu0 %v5663_v32, %s4932_s20 }
 0x183   : > { %7422 = vst [vmem:[#allocation23_spill] sm:$0xff] %v5665_v56  ;;  %v5669_v57 = vpop.permute.xlu1 %1271 }
 0x184   : > { %7423 = vst [vmem:[#allocation24_spill] sm:$0xff] %v5669_v57  ;;  %v5671_v61 = vpop.permute.xlu0 %1257 }
 0x185   : > { %7424 = vst [vmem:[#allocation25_spill] sm:$0xff] %v5671_v61 }
 0x188   : > { %1989 = vrot.lane.b32.xlu2 %v5347_v47, %s4936_s29 }
 0x189   : > { %1863 = vrot.lane.b32.xlu1 %v5673_v1, %s4934_s22 }
 0x18a   : > { %v5679_v53 = vpop.permute.xlu2 %1349  ;;  %1733 = vrot.lane.b32.xlu0 %v5510_v33, %s4937_s8  ;;  %v5699_v33 = vld [vmem:[#allocation2 + $0x67] sm:$0xff] }
 0x18b   : > { %v5683_v56 = vpop.permute.xlu1 %1277 }
 0x18c   : > { %7425 = vst [vmem:[#allocation26_spill] sm:$0xff] %v5683_v56  ;;  %v5685_v27 = vpop.permute.xlu0 %1263 }
 0x18d   : > { %7426 = vst [vmem:[#allocation27_spill] sm:$0xff] %v5685_v27 }
 0x190   : > { %1607 = vrot.lane.b32.xlu2 %v5451_v2, %s4935_s23 }
 0x191   : > { %1481 = vrot.lane.b32.xlu1 %v5641_v13, %s4933_s21 }
 0x192   : > { %v5691_v61 = vpop.permute.xlu2 %1355  ;;  %2117 = vrot.lane.b32.xlu0 %v5545_v18, %s4938_s9 }
 0x193   : > { %v5695_v17 = vpop.permute.xlu1 %1283 }
 0x194   : > { %7427 = vst [vmem:[#allocation28_spill] sm:$0xff] %v5695_v17  ;;  %v5697_v49 = vpop.permute.xlu0 %1269 }
 0x195   : > { %7428 = vst [vmem:[#allocation29_spill] sm:$0xff] %v5697_v49 }
 0x198   : > { %1991 = vrot.lane.b32.xlu2 %v5439_v60, %s4936_s29 }
 0x199   : > { %1865 = vrot.lane.b32.xlu1 %v5699_v33, %s4934_s22 }
 0x19a   : > { %v5705_v2 = vpop.permute.xlu2 %1361  ;;  %1735 = vrot.lane.b32.xlu0 %v5524_v11, %s4937_s8  ;;  %v5725_v11 = vld [vmem:[#allocation2 + $0x6f] sm:$0xff] }
 0x19b   : > { %v5709_v56 = vpop.permute.xlu1 %1353 }
 0x19c   : > { %v5711_v27 = vpop.permute.xlu0 %1275 }
 0x19d   : > { %7429 = vst [vmem:[#allocation30_spill] sm:$0xff] %v5711_v27 }
 0x1a0   : > { %1609 = vrot.lane.b32.xlu2 %v5347_v47, %s4935_s23 }
 0x1a1   : > { %1483 = vrot.lane.b32.xlu1 %v5673_v1, %s4933_s21 }
 0x1a2   : > { %v5717_v17 = vpop.permute.xlu2 %1367  ;;  %2119 = vrot.lane.b32.xlu0 %v5519_v37, %s4938_s9 }
 0x1a3   : > { %7430 = vst [vmem:[#allocation31_spill] sm:$0xff] %v5717_v17  ;;  %v5721_v59 = vpop.permute.xlu1 %1359 }
 0x1a4   : > { %v5723_v36 = vpop.permute.xlu0 %1281 }
 0x1a5   : > { %7431 = vst [vmem:[#allocation32_spill] sm:$0xff] %v5723_v36 }
 0x1a8   : > { %1993 = vrot.lane.b32.xlu2 %v5466_v7, %s4936_s29 }
 0x1a9   : > { %1867 = vrot.lane.b32.xlu1 %v5725_v11, %s4934_s22 }
 0x1aa   : > { %v5731_v47 = vpop.permute.xlu2 %1373  ;;  %1737 = vrot.lane.b32.xlu0 %v5545_v18, %s4937_s8  ;;  %v5751_v18 = vld [vmem:[#allocation2 + $0x87] sm:$0xff] }
 0x1ab   : > { %7432 = vst [vmem:[#allocation33_spill] sm:$0xff] %v5731_v47  ;;  %v5735_v27 = vpop.permute.xlu1 %1365 }
 0x1ac   : > { %v5737_v38 = vpop.permute.xlu0 %1351 }
 0x1b0   : > { %1611 = vrot.lane.b32.xlu2 %v5439_v60, %s4935_s23 }
 0x1b1   : > { %1485 = vrot.lane.b32.xlu1 %v5699_v33, %s4933_s21 }
 0x1b2   : > { %v5743_v36 = vpop.permute.xlu2 %1379  ;;  %2121 = vrot.lane.b32.xlu0 %v5537_v44, %s4938_s9 }
 0x1b3   : > { %7433 = vst [vmem:[#allocation34_spill] sm:$0xff] %v5743_v36  ;;  %v5747_v22 = vpop.permute.xlu1 %1371 }
 0x1b4   : > { %7434 = vst [vmem:[#allocation35_spill] sm:$0xff] %v5747_v22  ;;  %v5749_v47 = vpop.permute.xlu0 %1357 }
 0x1b8   : > { %1995 = vrot.lane.b32.xlu2 %v5445_v62, %s4936_s29 }
 0x1b9   : > { %1869 = vrot.lane.b32.xlu1 %v5751_v18, %s4934_s22 }
 0x1ba   : > { %v5757_v60 = vpop.permute.xlu2 %1385  ;;  %1739 = vrot.lane.b32.xlu0 %v5519_v37, %s4937_s8  ;;  %v5777_v37 = vld [vmem:[#allocation2 + $0x8f] sm:$0xff] }
 0x1bb   : > { %7435 = vst [vmem:[#allocation36_spill] sm:$0xff] %v5757_v60  ;;  %v5761_v36 = vpop.permute.xlu1 %1377 }
 0x1bc   : > { %7436 = vst [vmem:[#allocation37_spill] sm:$0xff] %v5761_v36  ;;  %v5763_v57 = vpop.permute.xlu0 %1363 }
 0x1c0   : > { %1613 = vrot.lane.b32.xlu2 %v5466_v7, %s4935_s23 }
 0x1c1   : > { %1487 = vrot.lane.b32.xlu1 %v5725_v11, %s4933_s21 }
 0x1c2   : > { %v5769_v22 = vpop.permute.xlu2 %1391  ;;  %2123 = vrot.lane.b32.xlu0 %v5561_v4, %s4938_s9 }
 0x1c3   : > { %7437 = vst [vmem:[#allocation38_spill] sm:$0xff] %v5769_v22  ;;  %v5773_v51 = vpop.permute.xlu1 %1383 }
 0x1c4   : > { %7438 = vst [vmem:[#allocation39_spill] sm:$0xff] %v5773_v51  ;;  %v5775_v60 = vpop.permute.xlu0 %1369 }
 0x1c5   : > { %7439 = vst [vmem:[#allocation40_spill] sm:$0xff] %v5775_v60  ;;  %v2476_v60 = vld [vmem:[%s7389_s1] sm:$0xff] }
 0x1c8   : > { %1997 = vrot.lane.b32.xlu2 %v5458_v6, %s4936_s29 }
 0x1c9   : > { %1871 = vrot.lane.b32.xlu1 %v5777_v37, %s4934_s22 }
 0x1ca   : > { %v5783_v7 = vpop.permute.xlu2 %1397  ;;  %1741 = vrot.lane.b32.xlu0 %v5537_v44, %s4937_s8  ;;  %v5803_v44 = vld [vmem:[#allocation2 + $0xa7] sm:$0xff] }
 0x1cb   : > { %7440 = vst [vmem:[#allocation41_spill] sm:$0xff] %v5783_v7  ;;  %v5787_v22 = vpop.permute.xlu1 %1389 }
 0x1cc   : > { %7441 = vst [vmem:[#allocation42_spill] sm:$0xff] %v5787_v22  ;;  %v5789_v36 = vpop.permute.xlu0 %1375 }
 0x1cd   : > { %7442 = vst [vmem:[#allocation43_spill] sm:$0xff] %v5789_v36  ;;  %v2479_v36 = vld [vmem:[%s7389_s1 + $0x18] sm:$0x7] }
 0x1ce   : > { %7446 = vst [vmem:[#allocation47_spill] sm:$0xff] %v5803_v44  ;;  %4491 = vmatpush.msk.msra.mxu0 %vm2581_vm3, %v2479_v36  ;;  %4625 = vmatpush.msk.msra.mxu3 %vm2581_vm3, %v2479_v36 }
 0x1cf   : > { %4623 = vmatpush.msk.msra.mxu1 %vm2581_vm3, %v2479_v36  ;;  %4624 = vmatpush.msk.msra.mxu2 %vm2581_vm3, %v2479_v36  ;;  %v5835_v36 = vld [vmem:[#allocation2 + $0xaf] sm:$0xff]  ;;  %vm3279_vm3 = vcmask 1045509  }
 0x1d0   : > { %1615 = vrot.lane.b32.xlu2 %v5445_v62, %s4935_s23 }
 0x1d1   : > { %1489 = vrot.lane.b32.xlu1 %v5751_v18, %s4933_s21 }
 0x1d2   : > { %v5795_v51 = vpop.permute.xlu2 %1403  ;;  %2125 = vrot.lane.b32.xlu0 %v5528_v12, %s4938_s9 }
 0x1d3   : > { %7443 = vst [vmem:[#allocation44_spill] sm:$0xff] %v5795_v51  ;;  %v5799_v49 = vpop.permute.xlu1 %1395 }
 0x1d4   : > { %7444 = vst [vmem:[#allocation45_spill] sm:$0xff] %v5799_v49  ;;  %v5801_v7 = vpop.permute.xlu0 %1381 }
 0x1d5   : > { %7445 = vst [vmem:[#allocation46_spill] sm:$0xff] %v5801_v7 }
 0x1d8   : > { %1999 = vrot.lane.b32.xlu2 %v5478_v20, %s4936_s29 }
 0x1d9   : > { %1873 = vrot.lane.b32.xlu1 %v5803_v44, %s4934_s22 }
 0x1da   : > { %v1606_v62 = vpop.permute.xlu2 %1605  ;;  %1743 = vrot.lane.b32.xlu0 %v5561_v4, %s4937_s8  ;;  %v2478_v4 = vld [vmem:[%s7389_s1 + $0x10] sm:$0xff] }
 0x1db   : > { %v5811_v51 = vpop.permute.xlu1 %1401  ;;  %2598 = vmatpush.msra.mxu0 %v2478_v4  ;;  %4628 = vmatpush.msra.mxu3 %v2478_v4 }
 0x1dc   : > { %7447 = vst [vmem:[#allocation48_spill] sm:$0xff] %v5811_v51  ;;  %v5813_v22 = vpop.permute.xlu0 %1387  ;;  %4626 = vmatpush.msra.mxu1 %v2478_v4  ;;  %4627 = vmatpush.msra.mxu2 %v2478_v4 }
 0x1dd   : > { %7448 = vst [vmem:[#allocation49_spill] sm:$0xff] %v5813_v22 }
 0x1e0   : > { %1617 = vrot.lane.b32.xlu2 %v5458_v6, %s4935_s23  ;;  %v2477_v6 = vld [vmem:[%s7389_s1 + $0x8] sm:$0xff] }
 0x1e1   : > { %1491 = vrot.lane.b32.xlu1 %v5777_v37, %s4933_s21  ;;  %2599 = vmatpush.msra.mxu0 %v2477_v6 }
 0x1e2   : > { %v1990_v7 = vpop.permute.xlu2 %1989  ;;  %2127 = vrot.lane.b32.xlu0 %v5551_v46, %s4938_s9  ;;  %4631 = vmatpush.msra.mxu3 %v2477_v6 }
 0x1e3   : > { %v1478_v51 = vpop.permute.xlu1 %1477  ;;  %4629 = vmatpush.msra.mxu1 %v2477_v6  ;;  %4630 = vmatpush.msra.mxu2 %v2477_v6 }
 0x1e4   : > { %v5827_v22 = vpop.permute.xlu0 %1393  ;;  %2600 = vmatpush.msra.mxu0 %v2476_v60  ;;  %4634 = vmatpush.msra.mxu3 %v2476_v60 }
 0x1e5   : > { %7449 = vst [vmem:[#allocation50_spill] sm:$0xff] %v5827_v22  ;;  %4632 = vmatpush.msra.mxu1 %v2476_v60  ;;  %4633 = vmatpush.msra.mxu2 %v2476_v60  ;;  %v900_v60 = vld [vmem:[#allocation2 + $0x7] sm:$0xff] }
 0x1e8   : > { %2001 = vrot.lane.b32.xlu2 %v5462_v8, %s4936_s29 }
 0x1e9   : > { %1875 = vrot.lane.b32.xlu1 %v5835_v36, %s4934_s22 }
 0x1ea   : > { %v1608_v22 = vpop.permute.xlu2 %1607  ;;  %1745 = vrot.lane.b32.xlu0 %v5528_v12, %s4937_s8  ;;  %v2213_v12 = vsel %vm820_vm1, %v900_v60, %v5581_v16 }
 0x1eb   : > { %v1862_v4 = vpop.permute.xlu1 %1861 }
 0x1ec   : > { %v5843_v24 = vpop.permute.xlu0 %1399 }
 0x1ed   : > { %7450 = vst [vmem:[#allocation51_spill] sm:$0xff] %v5843_v24  ;;  %v5855_v24 = vld [vmem:[#allocation2 + $0xc7] sm:$0xff] }
 0x1f0   : > { %1619 = vrot.lane.b32.xlu2 %v5478_v20, %s4935_s23  ;;  %v2246_v20 = vsel %vm2245_vm4, %v2213_v12, %v5679_v53  ;;  %v901_v12 = vld [vmem:[#allocation2 + $0xf] sm:$0xff] }
 0x1f1   : > { %1493 = vrot.lane.b32.xlu1 %v5803_v44, %s4933_s21  ;;  %v2279_v44 = vsel %vm2278_vm5, %v2246_v20, %v1478_v51 }
 0x1f2   : > { %v1992_v6 = vpop.permute.xlu2 %1991  ;;  %2129 = vrot.lane.b32.xlu0 %v5575_v50, %s4938_s9  ;;  %v2312_v60 = vsel %vm2311_vm6, %v2279_v44, %v1606_v62 }
 0x1f3   : > { %v1480_v49 = vpop.permute.xlu1 %1479 }
 0x1f4   : > { %v5851_v31 = vpop.permute.xlu0 %1405 }
 0x1f5   : > { %7451 = vst [vmem:[#allocation52_spill] sm:$0xff] %v5851_v31 }
 0x1f8   : > { %2003 = vrot.lane.b32.xlu2 %v5470_v10, %s4936_s29 }
 0x1f9   : > { %1877 = vrot.lane.b32.xlu1 %v5855_v24, %s4934_s22 }
 0x1fa   : > { %v1610_v31 = vpop.permute.xlu2 %1609  ;;  %1747 = vrot.lane.b32.xlu0 %v5551_v46, %s4937_s8 }
 0x1fb   : > { %v1864_v26 = vpop.permute.xlu1 %1863 }
 0x1fc   : > { %v1734_v16 = vpop.permute.xlu0 %1733 }
 0x1fd   : > { %v2345_v17 = vsel %vm2344_vm7, %v2312_v60, %v1734_v16 }
 0x1fe   : > { %v2378_v53 = vsel %vm2377_vm8, %v2345_v17, %v1862_v4  ;;  %v5880_v17 = vld [vmem:[#allocation2 + $0xcf] sm:$0xff] }
 0x1ff   : > { %v2411_v62 = vsel %vm2410_vm9, %v2378_v53, %v1990_v7 }
 0x200   : > { %1621 = vrot.lane.b32.xlu2 %v5462_v8, %s4935_s23  ;;  %v2214_v8 = vsel %vm820_vm1, %v901_v12, %v5535_v40 }
 0x201   : > { %1495 = vrot.lane.b32.xlu1 %v5835_v36, %s4933_s21  ;;  %v2247_v4 = vsel %vm2245_vm4, %v2214_v8, %v5737_v38 }
 0x202   : > { %v1994_v51 = vpop.permute.xlu2 %1993  ;;  %2131 = vrot.lane.b32.xlu0 %v5541_v45, %s4938_s9  ;;  %v2280_v7 = vsel %vm2278_vm5, %v2247_v4, %v1480_v49 }
 0x203   : > { %v1482_v46 = vpop.permute.xlu1 %1481  ;;  %v2313_v40 = vsel %vm2311_vm6, %v2280_v7, %v1608_v22 }
 0x204   : > { %v2118_v44 = vpop.permute.xlu0 %2117 }
 0x205   : > { %v2444_v20 = vsel %vm2443_vm10, %v2411_v62, %v2118_v44  ;;  %v5893_v62 = vld [vmem:[#allocation2 + $0x18f] sm:$0xff] }
 0x206   : > { %4492 = vmatmul.msk.f32.vlgmr.msra.gmra.mxu0 %vm2484_vm11, %v2444_v20 }
 0x208   : > { %2005 = vrot.lane.b32.xlu2 %v5487_v25, %s4936_s29 }
 0x209   : > { %1879 = vrot.lane.b32.xlu1 %v5880_v17, %s4934_s22 }
 0x20a   : > { %v1612_v16 = vpop.permute.xlu2 %1611  ;;  %1749 = vrot.lane.b32.xlu0 %v5575_v50, %s4937_s8 }
 0x20b   : > { %v1866_v60 = vpop.permute.xlu1 %1865 }
 0x20c   : > { %v1736_v53 = vpop.permute.xlu0 %1735 }
 0x20d   : > { %v2346_v44 = vsel %vm2344_vm7, %v2313_v40, %v1736_v53 }
 0x20e   : > { %v2379_v38 = vsel %vm2377_vm8, %v2346_v44, %v1864_v26 }
 0x20f   : > { %v2412_v22 = vsel %vm2410_vm9, %v2379_v38, %v1992_v6 }
 0x210   : > { %1623 = vrot.lane.b32.xlu2 %v5470_v10, %s4935_s23  ;;  %v2215_v10 = vsel %vm820_vm1, %v5627_v3, %v5532_v39 }
 0x211   : > { %1523 = vrot.lane.b32.xlu1 %v5893_v62, %s4933_s21  ;;  %v2248_v26 = vsel %vm2245_vm4, %v2215_v10, %v5709_v56 }
 0x212   : > { %v1996_v49 = vpop.permute.xlu2 %1995  ;;  %2133 = vrot.lane.b32.xlu0 %v5567_v0, %s4938_s9  ;;  %v2281_v8 = vsel %vm2278_vm5, %v2248_v26, %v1482_v46 }
 0x213   : > { %v1484_v50 = vpop.permute.xlu1 %1483  ;;  %v2314_v53 = vsel %vm2311_vm6, %v2281_v8, %v1610_v31 }
 0x214   : > { %v2120_v12 = vpop.permute.xlu0 %2119 }
 0x215   : > { %v2445_v20 = vsel %vm2443_vm10, %v2412_v22, %v2120_v12  ;;  %v2217_v22 = vsel %vm820_vm1, %v5641_v13, %v5583_v54 }
 0x216   : > { %4493 = vmatmul.msk.f32.gmra.mxu0 %vm2484_vm11, %v2445_v20  ;;  %v5956_v20 = vld [vmem:[#allocation2 + $0xe7] sm:$0xff]  ;;  %v2250_v10 = vsel %vm2245_vm4, %v2217_v22, %v5749_v47 }
 0x218   : > { %2007 = vrot.lane.b32.xlu2 %v5474_v14, %s4936_s29 }
 0x219   : > { %1779 = vrot.lane.b32.xlu1 %v5647_v52, %s4937_s8 }
 0x21a   : > { %v1614_v6 = vpop.permute.xlu2 %1613  ;;  %1751 = vrot.lane.b32.xlu0 %v5541_v45, %s4937_s8 }
 0x21b   : > { %v1868_v4 = vpop.permute.xlu1 %1867 }
 0x21c   : > { %v1738_v7 = vpop.permute.xlu0 %1737 }
 0x21d   : > { %v2347_v39 = vsel %vm2344_vm7, %v2314_v53, %v1738_v7 }
 0x21e   : > { %v2380_v56 = vsel %vm2377_vm8, %v2347_v39, %v1866_v60  ;;  %v1039_v39 = vld [vmem:[#allocation2 + $0xd0] sm:$0xff] }
 0x21f   : > { %v2413_v52 = vsel %vm2410_vm9, %v2380_v56, %v1994_v51 }
 0x220   : > { %1651 = vrot.lane.b32.xlu2 %v5495_v19, %s4935_s23  ;;  %v2216_v19 = vsel %vm820_vm1, %v5657_v29, %v5598_v21  ;;  %v926_v29 = vld [vmem:[#allocation2 + $0x1a7] sm:$0xff] }
 0x221   : > { %1753 = vrot.lane.b32.xlu1 %v5567_v0, %s4937_s8  ;;  %v2249_v0 = vsel %vm2245_vm4, %v2216_v19, %v5691_v61 }
 0x222   : > { %v1998_v14 = vpop.permute.xlu2 %1997  ;;  %2135 = vrot.lane.b32.xlu0 %v5590_v5, %s4938_s9  ;;  %v2282_v46 = vsel %vm2278_vm5, %v2249_v0, %v1484_v50 }
 0x223   : > { %v1486_v3 = vpop.permute.xlu1 %1485  ;;  %v2315_v44 = vsel %vm2311_vm6, %v2282_v46, %v1612_v16 }
 0x224   : > { %v2122_v45 = vpop.permute.xlu0 %2121 }
 0x225   : > { %v2446_v31 = vsel %vm2443_vm10, %v2413_v52, %v2122_v45 }
 0x226   : > { %4494 = vmatmul.msk.f32.gmra.mxu0 %vm2484_vm11, %v2446_v31 }
 0x228   : > { %1625 = vrot.lane.b32.xlu2 %v5487_v25, %s4935_s23  ;;  %v927_v25 = vld [vmem:[#allocation2 + $0x1af] sm:$0xff] }
 0x229   : > { %2163 = vrot.lane.b32.xlu1 %v5639_v34, %s4938_s9 }
 0x22a   : > { %v1616_v51 = vpop.permute.xlu2 %1615  ;;  %1497 = vrot.lane.b32.xlu0 %v5855_v24, %s4933_s21 }
 0x22b   : > { %v1870_v60 = vpop.permute.xlu1 %1869 }
 0x22c   : > { %v1740_v40 = vpop.permute.xlu0 %1739 }
 0x22d   : > { %v2348_v21 = vsel %vm2344_vm7, %v2315_v44, %v1740_v40  ;;  %v917_v40 = vld [vmem:[#allocation2 + $0x10f] sm:$0xff]  ;;  %v2219_v44 = vsel %vm820_vm1, %v5699_v33, %v5607_v9 }
 0x22e   : > { %v2381_v61 = vsel %vm2377_vm8, %v2348_v21, %v1868_v4  ;;  %v6010_v21 = vld [vmem:[#allocation2 + $0xef] sm:$0xff] }
 0x22f   : > { %v2414_v12 = vsel %vm2410_vm9, %v2381_v61, %v1996_v49  ;;  %v2283_v49 = vsel %vm2278_vm5, %v2250_v10, %v1486_v3 }
 0x230   : > { %2035 = vrot.lane.b32.xlu2 %v5514_v35, %s4936_s29  ;;  %v2316_v54 = vsel %vm2311_vm6, %v2283_v49, %v1614_v6 }
 0x231   : > { %1525 = vrot.lane.b32.xlu1 %v926_v29, %s4933_s21  ;;  %v2252_v29 = vsel %vm2245_vm4, %v2219_v44, %v5705_v2 }
 0x232   : > { %v2000_v38 = vpop.permute.xlu2 %1999  ;;  %1907 = vrot.lane.b32.xlu0 %v927_v25, %s4934_s22 }
 0x233   : > { %v1488_v50 = vpop.permute.xlu1 %1487 }
 0x234   : > { %v2124_v24 = vpop.permute.xlu0 %2123 }
 0x235   : > { %v2447_v16 = vsel %vm2443_vm10, %v2414_v12, %v2124_v24  ;;  %v6022_v24 = vld [vmem:[#allocation2 + $0x110] sm:$0xff] }
 0x236   : > { %4495 = vmatmul.msk.f32.gmra.mxu0 %vm2484_vm11, %v2447_v16 }
 0x238   : > { %2009 = vrot.lane.b32.xlu2 %v5482_v23, %s4936_s29 }
 0x239   : > { %1781 = vrot.lane.b32.xlu1 %v5613_v63, %s4937_s8 }
 0x23a   : > { %v1618_v26 = vpop.permute.xlu2 %1617  ;;  %1881 = vrot.lane.b32.xlu0 %v5956_v20, %s4934_s22 }
 0x23b   : > { %v1872_v8 = vpop.permute.xlu1 %1871 }
 0x23c   : > { %v1742_v4 = vpop.permute.xlu0 %1741 }
 0x23d   : > { %v2349_v23 = vsel %vm2344_vm7, %v2316_v54, %v1742_v4 }
 0x23e   : > { %v2382_v13 = vsel %vm2377_vm8, %v2349_v23, %v1870_v60  ;;  %v6003_v60 = vld [vmem:[#allocation2 + $0xf0] sm:$0xff] }
 0x23f   : > { %v2415_v53 = vsel %vm2410_vm9, %v2382_v13, %v1998_v14 }
 0x240   : > { %1653 = vrot.lane.b32.xlu2 %v5503_v43, %s4935_s23  ;;  %v2218_v43 = vsel %vm820_vm1, %v5673_v1, %v5547_v42  ;;  %v5990_v1 = vld [vmem:[#allocation2 + $0x1c8] sm:$0xff] }
 0x241   : > { %1755 = vrot.lane.b32.xlu1 %v5590_v5, %s4937_s8  ;;  %v2251_v5 = vsel %vm2245_vm4, %v2218_v43, %v5721_v59  ;;  %v5994_v59 = vld [vmem:[#allocation2 + $0x1c7] sm:$0xff] }
 0x242   : > { %v2002_v63 = vpop.permute.xlu2 %2001  ;;  %2137 = vrot.lane.b32.xlu0 %v5555_v48, %s4938_s9  ;;  %v2284_v56 = vsel %vm2278_vm5, %v2251_v5, %v1488_v50 }
 0x243   : > { %v1490_v47 = vpop.permute.xlu1 %1489  ;;  %v2317_v52 = vsel %vm2311_vm6, %v2284_v56, %v1616_v51 }
 0x244   : > { %v2126_v7 = vpop.permute.xlu0 %2125 }
 0x245   : > { %v2448_v6 = vsel %vm2443_vm10, %v2415_v53, %v2126_v7  ;;  %v2221_v53 = vsel %vm820_vm1, %v5751_v18, %v5563_v41 }
 0x246   : > { %4496 = vmatmul.msk.f32.gmra.mxu0 %vm2484_vm11, %v2448_v6  ;;  %v6061_v6 = vld [vmem:[#allocation2 + $0x1d1] sm:$0xff]  ;;  %v2254_v43 = vsel %vm2245_vm4, %v2221_v53, %v5735_v27 }
 0x247   : > { %v6077_v27 = vld [vmem:[#allocation2 + $0x130] sm:$0xff] }
 0x248   : > { %1627 = vrot.lane.b32.xlu2 %v1039_v39, %s4935_s23  ;;  %v921_v39 = vld [vmem:[#allocation2 + $0x14f] sm:$0xff] }
 0x249   : > { %2165 = vrot.lane.b32.xlu1 %v5663_v32, %s4938_s9 }
 0x24a   : > { %v1620_v14 = vpop.permute.xlu2 %1619  ;;  %1499 = vrot.lane.b32.xlu0 %v5880_v17, %s4933_s21 }
 0x24b   : > { %v1874_v3 = vpop.permute.xlu1 %1873 }
 0x24c   : > { %v1744_v45 = vpop.permute.xlu0 %1743 }
 0x24d   : > { %v2350_v42 = vsel %vm2344_vm7, %v2317_v52, %v1744_v45  ;;  %v6082_v52 = vld [vmem:[#allocation2 + $0x1d0] sm:$0xff] }
 0x24e   : > { %v2383_v31 = vsel %vm2377_vm8, %v2350_v42, %v1872_v8 }
 0x24f   : > { %v2416_v46 = vsel %vm2410_vm9, %v2383_v31, %v2000_v38 }
 0x250   : > { %2037 = vrot.lane.b32.xlu2 %v5990_v1, %s4936_s29 }
 0x251   : > { %1527 = vrot.lane.b32.xlu1 %v927_v25, %s4933_s21  ;;  %v2285_v25 = vsel %vm2278_vm5, %v2252_v29, %v1490_v47  ;;  %v7453_v29 = vld [vmem:[#allocation14_spill] sm:$0xff] }
 0x252   : > { %v2004_v19 = vpop.permute.xlu2 %2003  ;;  %1909 = vrot.lane.b32.xlu0 %v5994_v59, %s4934_s22  ;;  %v2318_v9 = vsel %vm2311_vm6, %v2285_v25, %v1618_v26 }
 0x253   : > { %v1492_v17 = vpop.permute.xlu1 %1491 }
 0x254   : > { %v2128_v0 = vpop.permute.xlu0 %2127 }
 0x255   : > { %v2449_v51 = vsel %vm2443_vm10, %v2416_v46, %v2128_v0  ;;  %v2222_v46 = vsel %vm820_vm1, %v5777_v37, %v5625_v28  ;;  %v923_v37 = vld [vmem:[#allocation2 + $0x16f] sm:$0xff] }
 0x256   : > { %4497 = vmatmul.msk.f32.gmra.mxu0 %vm2484_vm11, %v2449_v51  ;;  %v6096_v51 = vld [vmem:[#allocation2 + $0x12f] sm:$0xff] }
 0x258   : > { %2011 = vrot.lane.b32.xlu2 %v6003_v60, %s4936_s29 }
 0x259   : > { %1507 = vrot.lane.b32.xlu1 %v917_v40, %s4933_s21  ;;  %v7452_v40 = vld [vmem:[#allocation31_spill] sm:$0xff] }
 0x25a   : > { %v1622_v61 = vpop.permute.xlu2 %1621  ;;  %1883 = vrot.lane.b32.xlu0 %v6010_v21, %s4934_s22  ;;  %v2255_v44 = vsel %vm2245_vm4, %v2222_v46, %v7452_v40  ;;  %v1073_v40 = vld [vmem:[#allocation2 + $0xf1] sm:$0xff] }
 0x25b   : > { %v1876_v38 = vpop.permute.xlu1 %1875 }
 0x25c   : > { %v1746_v50 = vpop.permute.xlu0 %1745 }
 0x25d   : > { %v2351_v33 = vsel %vm2344_vm7, %v2318_v9, %v1746_v50 }
 0x25e   : > { %v2384_v2 = vsel %vm2377_vm8, %v2351_v33, %v1874_v3  ;;  %v6073_v3 = vld [vmem:[#allocation2 + $0x107] sm:$0xff] }
 0x25f   : > { %v2417_v10 = vsel %vm2410_vm9, %v2384_v2, %v2002_v63  ;;  %v6111_v33 = vld [vmem:[#allocation2 + $0x108] sm:$0xff] }
 0x260   : > { %1655 = vrot.lane.b32.xlu2 %v5514_v35, %s4935_s23  ;;  %v2220_v35 = vsel %vm820_vm1, %v5725_v11, %v5596_v58  ;;  %v929_v11 = vld [vmem:[#allocation2 + $0x1cf] sm:$0xff] }
 0x261   : > { %1635 = vrot.lane.b32.xlu1 %v6022_v24, %s4935_s23  ;;  %v2253_v26 = vsel %vm2245_vm4, %v2220_v35, %v5763_v57  ;;  %v918_v35 = vld [vmem:[#allocation2 + $0x127] sm:$0xff] }
 0x262   : > { %v2006_v12 = vpop.permute.xlu2 %2005  ;;  %2139 = vrot.lane.b32.xlu0 %v5585_v55, %s4938_s9  ;;  %v2286_v55 = vsel %vm2278_vm5, %v2253_v26, %v1492_v17 }
 0x263   : > { %v1494_v16 = vpop.permute.xlu1 %1493  ;;  %v2319_v23 = vsel %vm2311_vm6, %v2286_v55, %v1620_v14 }
 0x264   : > { %v2130_v22 = vpop.permute.xlu0 %2129  ;;  %v2287_v5 = vsel %vm2278_vm5, %v2254_v43, %v1494_v16 }
 0x265   : > { %v2450_v49 = vsel %vm2443_vm10, %v2417_v10, %v2130_v22  ;;  %v2320_v18 = vsel %vm2311_vm6, %v2287_v5, %v1622_v61 }
 0x266   : > { %4498 = vmatmul.msk.f32.gmra.mxu0 %vm2484_vm11, %v2450_v49 }
 0x268   : > { %1783 = vrot.lane.b32.xlu2 %v5639_v34, %s4937_s8  ;;  %v6047_v34 = vld [vmem:[#allocation2 + $0x150] sm:$0xff] }
 0x269   : > { %1757 = vrot.lane.b32.xlu1 %v5555_v48, %s4937_s8  ;;  %v1040_v48 = vld [vmem:[#allocation2 + $0xe8] sm:$0xff] }
 0x26a   : > { %v1624_v8 = vpop.permute.xlu2 %1623  ;;  %1501 = vrot.lane.b32.xlu0 %v5956_v20, %s4933_s21 }
 0x26b   : > { %v1878_v4 = vpop.permute.xlu1 %1877 }
 0x26c   : > { %v1748_v54 = vpop.permute.xlu0 %1747 }
 0x26d   : > { %v2352_v58 = vsel %vm2344_vm7, %v2319_v23, %v1748_v54  ;;  %v7454_v54 = vld [vmem:[#allocation17_spill] sm:$0xff] }
 0x26e   : > { %v2385_v57 = vsel %vm2377_vm8, %v2352_v58, %v1876_v38  ;;  %v2236_v23 = vsel %vm820_vm1, %v923_v37, %v7454_v54  ;;  %v6136_v58 = vld [vmem:[%s7390_s2] ss:$0 sm:$0xff] }
 0x26f   : > { %v2418_v47 = vsel %vm2410_vm9, %v2385_v57, %v2004_v19  ;;  %v6140_v57 = vld [vmem:[#allocation2 + $0x171] sm:$0xff] }
 0x270   : > { %1911 = vrot.lane.b32.xlu2 %v929_v11, %s4934_s22 }
 0x271   : > { %1643 = vrot.lane.b32.xlu1 %v6047_v34, %s4935_s23 }
 0x272   : > { %v2008_v13 = vpop.permute.xlu2 %2007  ;;  %1629 = vrot.lane.b32.xlu0 %v1040_v48, %s4935_s23  ;;  %v7456_v48 = vmov 0.0  }
 0x273   : > { %v1496_v20 = vpop.permute.xlu1 %1495  ;;  %3115 = vst.msk [vmem:[#allocation3] sm:$0xff] %vm7404_vm12, %v7456_v48 }
 0x274   : > { %v2132_v63 = vpop.permute.xlu0 %2131  ;;  %v2288_v25 = vsel %vm2278_vm5, %v2255_v44, %v1496_v20  ;;  %v6147_v20 = vld [vmem:[#allocation2 + $0x128] sm:$0xff]  ;;  %3116 = vst.msk [vmem:[#allocation3 + $0x8] sm:$0xff] %vm7404_vm12, %v7456_v48  ;;  %v7459_v44 = vld [vmem:[#allocation40_spill] sm:$0xff] }
 0x275   : > { %v2451_v7 = vsel %vm2443_vm10, %v2418_v47, %v2132_v63  ;;  %v2321_v28 = vsel %vm2311_vm6, %v2288_v25, %v1624_v8  ;;  %v6153_v63 = vld [vmem:[#allocation2 + $0x170] sm:$0xff]  ;;  %3120 = vst.msk [vmem:[#allocation3 + $0xd8] sm:$0xff] %vm7404_vm12, %v7456_v48 }
 0x276   : > { %4499 = vmatmul.msk.f32.gmra.mxu0 %vm2484_vm11, %v2451_v7  ;;  %3121 = vst.msk [vmem:[#allocation3 + $0xe0] sm:$0xff] %vm7404_vm12, %v7456_v48  ;;  %v1009_v25 = vld [vmem:[#allocation2 + $0xef] sm:$0xff] }
 0x278   : > { %1763 = vrot.lane.b32.xlu2 %v5571_v30, %s4937_s8 }
 0x279   : > { %2167 = vrot.lane.b32.xlu1 %v6061_v6, %s4938_s9 }
 0x27a   : > { %v6068_v56 = vpop.permute.xlu2 %1651  ;;  %1515 = vrot.lane.b32.xlu0 %v921_v39, %s4933_s21 }
 0x27b   : > { %v1880_v14 = vpop.permute.xlu1 %1879 }
 0x27c   : > { %v1750_v41 = vpop.permute.xlu0 %1749 }
 0x27d   : > { %v2353_v30 = vsel %vm2344_vm7, %v2320_v18, %v1750_v41 }
 0x27e   : > { %v2386_v45 = vsel %vm2377_vm8, %v2353_v30, %v1878_v4 }
 0x27f   : > { %v2419_v17 = vsel %vm2410_vm9, %v2386_v45, %v2006_v12 }
 0x280   : > { %1885 = vrot.lane.b32.xlu2 %v6073_v3, %s4934_s22 }
 0x281   : > { %2019 = vrot.lane.b32.xlu1 %v6077_v27, %s4936_s29 }
 0x282   : > { %v6084_v42 = vpop.permute.xlu2 %1625  ;;  %2039 = vrot.lane.b32.xlu0 %v6082_v52, %s4936_s29 }
 0x283   : > { %v1524_v31 = vpop.permute.xlu1 %1523  ;;  %v2602_v12 = vpop.f32.mrf.mxu0 }
 0x284   : > { %v2134_v19 = vpop.permute.xlu0 %2133  ;;  %v2603_v47 = vadd.f32 %v6136_v58, %v2602_v12 }
 0x285   : > { %v2452_v0 = vsel %vm2443_vm10, %v2419_v17, %v2134_v19  ;;  %v7457_v17 = vld [vmem:[#allocation13_spill] sm:$0xff] }
 0x286   : > { %4500 = vmatmul.msk.f32.gmra.mxu0 %vm2484_vm11, %v2452_v0  ;;  %v2698_v30 = vmax.f32 %v2603_v47, 0.0  ;;  %v7458_v0 = vld [vmem:[#allocation47_spill] sm:$0xff] }
 0x288   : > { %1771 = vrot.lane.b32.xlu2 %v5609_v15, %s4937_s8 }
 0x289   : > { %2147 = vrot.lane.b32.xlu1 %v7453_v29, %s4938_s9 }
 0x28a   : > { %v2036_v61 = vpop.permute.xlu2 %2035  ;;  %1891 = vrot.lane.b32.xlu0 %v6096_v51, %s4934_s22 }
 0x28b   : > { %v1780_v38 = vpop.permute.xlu1 %1779 }
 0x28c   : > { %v1752_v50 = vpop.permute.xlu0 %1751 }
 0x28d   : > { %v2354_v15 = vsel %vm2344_vm7, %v2321_v28, %v1752_v50 }
 0x28e   : > { %v2387_v9 = vsel %vm2377_vm8, %v2354_v15, %v1880_v14 }
 0x28f   : > { %v2420_v10 = vsel %vm2410_vm9, %v2387_v9, %v2008_v13 }
 0x290   : > { %1899 = vrot.lane.b32.xlu2 %v923_v37, %s4934_s22 }
 0x291   : > { %1657 = vrot.lane.b32.xlu1 %v5990_v1, %s4935_s23  ;;  %v6125_v1 = vld [vmem:[#allocation2 + $0x109] sm:$0xff] }
 0x292   : > { %v6113_v2 = vpop.permute.xlu2 %2009  ;;  %2013 = vrot.lane.b32.xlu0 %v6111_v33, %s4936_s29 }
 0x293   : > { %v6117_v16 = vpop.permute.xlu1 %1753  ;;  %v2605_v55 = vpop.f32.mrf.mxu0 }
 0x294   : > { %v2136_v22 = vpop.permute.xlu0 %2135 }
 0x295   : > { %v2453_v49 = vsel %vm2443_vm10, %v2420_v10, %v2136_v22  ;;  %v930_v22 = vld [vmem:[#allocation2 + $0x1e7] sm:$0xff] }
 0x296   : > { %4501 = vmatmul.msk.f32.gmra.mxu0 %vm2484_vm11, %v2453_v49 }
 0x298   : > { %1529 = vrot.lane.b32.xlu2 %v5994_v59, %s4933_s21  ;;  %v7455_v59 = vld [vmem:[#allocation45_spill] sm:$0xff] }
 0x299   : > { %1509 = vrot.lane.b32.xlu1 %v918_v35, %s4933_s21  ;;  %v2269_v11 = vsel %vm2245_vm4, %v2236_v23, %v7455_v59  ;;  %v2606_v23 = vadd.f32 %v6136_v58, %v2605_v55 }
 0x29a   : > { %v6127_v26 = vpop.permute.xlu2 %1653  ;;  %2141 = vrot.lane.b32.xlu0 %v6125_v1, %s4938_s9  ;;  %v2302_v13 = vsel %vm2278_vm5, %v2269_v11, %v1524_v31 }
 0x29b   : > { %v2164_v8 = vpop.permute.xlu1 %2163  ;;  %v2335_v53 = vsel %vm2311_vm6, %v2302_v13, %v6068_v56  ;;  %v2223_v56 = vsel %vm820_vm1, %v7458_v0, %v7457_v17  ;;  %v6219_v0 = vld [vmem:[#allocation2 + $0x167] sm:$0xff] }
 0x29c   : > { %v1498_v4 = vpop.permute.xlu0 %1497  ;;  %v2368_v5 = vsel %vm2344_vm7, %v2335_v53, %v1780_v38  ;;  %v2256_v29 = vsel %vm2245_vm4, %v2223_v56, %v7459_v44  ;;  %v924_v56 = vld [vmem:[#allocation2 + $0x187] sm:$0xff] }
 0x2a0   : > { %2155 = vrot.lane.b32.xlu2 %v6140_v57, %s4938_s9 }
 0x2a1   : > { %1637 = vrot.lane.b32.xlu1 %v6147_v20, %s4935_s23 }
 0x2a2   : > { %v6158_v7 = vpop.permute.xlu2 %1627  ;;  %2027 = vrot.lane.b32.xlu0 %v6153_v63, %s4936_s29 }
 0x2a3   : > { %v6166_v39 = vpop.permute.xlu1 %1525  ;;  %v2608_v43 = vpop.f32.mrf.mxu0 }
 0x2a4   : > { %v2609_v14 = vadd.f32 %v6136_v58, %v2608_v43  ;;  %v1908_v41 = vpop.permute.xlu0 %1907 }
 0x2a5   : > { %v2401_v18 = vsel %vm2377_vm8, %v2368_v5, %v1908_v41  ;;  %v2699_v41 = vmax.f32 %v2606_v23, 0.0 }
 0x2a6   : > { %v2700_v45 = vmax.f32 %v2609_v14, 0.0  ;;  %v2434_v31 = vsel %vm2410_vm9, %v2401_v18, %v2036_v61  ;;  %v2289_v61 = vsel %vm2278_vm5, %v2256_v29, %v1498_v4 }
 0x2a7   : > { %v2467_v19 = vsel %vm2443_vm10, %v2434_v31, %v2164_v8  ;;  %v2322_v9 = vsel %vm2311_vm6, %v2289_v61, %v6084_v42  ;;  %v6193_v8 = vld [vmem:[#allocation2 + $0x168] sm:$0xff]  ;;  %v7460_v61 = vld [vmem:[#allocation29_spill] sm:$0xff] }
 0x2a8   : > { %v2730_v46 = vmax.f32 %v2698_v30, %v2700_v45  ;;  %1785 = vrot.lane.b32.xlu2 %v5663_v32, %s4937_s8  ;;  %4515 = vmatmul.msk.f32.vlgmr.msra.gmra.mxu3 %vm2484_vm11, %v2467_v19  ;;  %v2355_v35 = vsel %vm2344_vm7, %v2322_v9, %v6117_v16  ;;  %v6210_v45 = vld [vmem:[#allocation2 + $0x129] sm:$0xff] }
 0x2a9   : > { %1759 = vrot.lane.b32.xlu1 %v1073_v40, %s4937_s8 }
 0x2aa   : > { %v2762_v38 = vrot.slane %v2730_v46, 2  ;;  %v6183_v50 = vpop.permute.xlu2 %2037  ;;  %1503 = vrot.lane.b32.xlu0 %v1009_v25, %s4933_s21  ;;  %v2763_v28 = vrot.slane %v2730_v46, 4  ;;  %v4524_v12 = vrot.slane %v2730_v46, 9  ;;  %v2764_v4 = vrot.slane %v2730_v46, 6 }
 0x2ab   : > { %v6186_v15 = vpop.permute.xlu1 %1781 }
 0x2ac   : > { %v4525_v32 = vrot.slane %v2762_v38, 9  ;;  %v1882_v37 = vpop.permute.xlu0 %1881  ;;  %v4526_v10 = vrot.slane %v2763_v28, 9  ;;  %v3050_v42 = vmax.f32 %v2730_v46, %v4524_v12  ;;  %v4527_v14 = vrot.slane %v2764_v4, 9 }
 0x2ad   : > { %v2388_v54 = vsel %vm2377_vm8, %v2355_v35, %v1882_v37 }
 0x2ae   : > { %v3051_v49 = vmax.f32 %v2762_v38, %v4525_v32  ;;  %v3052_v11 = vmax.f32 %v2763_v28, %v4526_v10  ;;  %v2421_v5 = vsel %vm2410_vm9, %v2388_v54, %v6113_v2  ;;  %v3207_v18 = vperm.slane %v3050_v42, 0  ;;  %v6215_v2 = vld [vmem:[#allocation2 + $0x1e9] sm:$0xff] }
 0x2af   : > { %v3053_v17 = vmax.f32 %v2764_v4, %v4527_v14  ;;  %v2237_v38 = vsel %vm820_vm1, %v924_v56, %v7460_v61 }
 0x2b0   : > { %1913 = vrot.lane.b32.xlu2 %v930_v22, %s4934_s22  ;;  %v3208_v47 = vperm.slane %v3051_v49, 0  ;;  %v7461_v49 = vld [vmem:[#allocation41_spill] sm:$0xff] }
 0x2b1   : > { %1645 = vrot.lane.b32.xlu1 %v6193_v8, %s4935_s23  ;;  %v2270_v35 = vsel %vm2245_vm4, %v2237_v38, %v7461_v49  ;;  %v3210_v4 = vperm.slane %v3053_v17, 0  ;;  %v6280_v38 = vld [vmem:[#allocation2 + $0x149] sm:$0xff] }
 0x2b2   : > { %v6199_v59 = vpop.permute.xlu2 %2011  ;;  %1631 = vrot.lane.b32.xlu0 %v6003_v60, %s4935_s23  ;;  %v3209_v60 = vperm.slane %v3052_v11, 0  ;;  %v3272_v31 = vsel %vm7403_vm13, %v3208_v47, %v3207_v18  ;;  %v1106_v47 = vld [vmem:[#allocation2 + $0x10f] sm:$0xff]  ;;  %vm3283_vm13 = vcmask 1047559  }
 0x2b3   : > { %v6203_v16 = vpop.permute.xlu1 %1755  ;;  %v2611_v13 = vpop.f32.mrf.mxu0 }
 0x2b4   : > { %v2612_v53 = vadd.f32 %v6136_v58, %v2611_v13  ;;  %v2138_v43 = vpop.permute.xlu0 %2137  ;;  %v3274_v28 = vsel %vm7402_vm14, %v3209_v60, %v3272_v31  ;;  %vm3117_vm14 = vcmask 122880  }
 0x2b5   : > { %v2454_v55 = vsel %vm2443_vm10, %v2421_v5, %v2138_v43  ;;  %v3276_v13 = vsel %vm3275_vm15, %v3210_v4, %v3274_v28  ;;  %3118 = vst.msk [vmem:[#allocation3 + $0x10] sm:$0x1] %vm3117_vm14, %v7456_v48 }
 0x2b6   : > { %v2701_v30 = vmax.f32 %v2612_v53, 0.0  ;;  %4502 = vmatmul.msk.f32.gmra.mxu0 %vm2484_vm11, %v2454_v55  ;;  %v2303_v53 = vsel %vm2278_vm5, %v2270_v35, %v6166_v39  ;;  %v6235_v55 = vld [vmem:[#allocation2 + $0x148] sm:$0xff]  ;;  %3133 = vst.msk [vmem:[#allocation3 + $0x10] sm:$0x1] %vm3117_vm14, %v7456_v48 }
 0x2b7   : > { %3134 = vst.msk [vmem:[#allocation3 + $0x28] sm:$0x1] %vm3117_vm14, %v7456_v48  ;;  %v2336_v60 = vsel %vm2311_vm6, %v2303_v53, %v6127_v26 }
 0x2b8   : > { %v2731_v19 = vmax.f32 %v2699_v41, %v2701_v30  ;;  %1765 = vrot.lane.b32.xlu2 %v6210_v45, %s4937_s8  ;;  %v6241_v41 = vld [vmem:[#allocation2 + $0x1e8] sm:$0xff]  ;;  %3122 = vst.msk [vmem:[#allocation3 + $0xe8] sm:$0x1] %vm3117_vm14, %v7456_v48  ;;  %v2369_v17 = vsel %vm2344_vm7, %v2336_v60, %v6186_v15 }
 0x2b9   : > { %2169 = vrot.lane.b32.xlu1 %v6215_v2, %s4938_s9  ;;  %3123 = vst.msk [vmem:[#allocation3 + $0x7] sm:$0x1] %vm3117_vm14, %v7456_v48 }
 0x2ba   : > { %v2765_v46 = vrot.slane %v2731_v19, 2  ;;  %v2766_v40 = vrot.slane %v2731_v19, 4  ;;  %v2767_v44 = vrot.slane %v2731_v19, 6  ;;  %v4528_v29 = vrot.slane %v2731_v19, 9  ;;  %v6221_v25 = vpop.permute.xlu2 %1655  ;;  %1517 = vrot.lane.b32.xlu0 %v6219_v0, %s4933_s21  ;;  %3124 = vst.msk [vmem:[#allocation3 + $0x1f] sm:$0x1] %vm3117_vm14, %v7456_v48 }
 0x2bb   : > { %v2166_v32 = vpop.permute.xlu1 %2165  ;;  %3125 = vst.msk [vmem:[#allocation3 + $0x37] sm:$0x1] %vm3117_vm14, %v7456_v48 }
 0x2bc   : > { %v4529_v37 = vrot.slane %v2765_v46, 9  ;;  %v4530_v9 = vrot.slane %v2766_v40, 9  ;;  %v4531_v12 = vrot.slane %v2767_v44, 9  ;;  %v3054_v22 = vmax.f32 %v2731_v19, %v4528_v29  ;;  %v1500_v10 = vpop.permute.xlu0 %1499  ;;  %v7462_v29 = vld [vmem:[#allocation10_spill] sm:$0xff]  ;;  %3126 = vst.msk [vmem:[#allocation3 + $0x4f] sm:$0x1] %vm3117_vm14, %v7456_v48 }
 0x2bd   : > { %v2224_v61 = vsel %vm820_vm1, %v5835_v36, %v7462_v29  ;;  %3127 = vst.msk [vmem:[#allocation3 + $0x67] sm:$0x1] %vm3117_vm14, %v7456_v48 }
 0x2be   : > { %v3055_v54 = vmax.f32 %v2765_v46, %v4529_v37  ;;  %v3056_v23 = vmax.f32 %v2766_v40, %v4530_v9  ;;  %v3057_v42 = vmax.f32 %v2767_v44, %v4531_v12  ;;  %v3211_v11 = vperm.slane %v3054_v22, 0  ;;  %v6270_v44 = vld [vmem:[#allocation2 + $0x169] sm:$0xff]  ;;  %3128 = vst.msk [vmem:[#allocation3 + $0x7f] sm:$0x1] %vm3117_vm14, %v7456_v48 }
 0x2bf   : > { %3129 = vst.msk [vmem:[#allocation3 + $0x97] sm:$0x1] %vm3117_vm14, %v7456_v48 }
 0x2c0   : > { %v3212_v43 = vperm.slane %v3055_v54, 0  ;;  %v3213_v5 = vperm.slane %v3056_v23, 0  ;;  %v3278_v14 = vsel %vm3277_vm2, %v3211_v11, %v3276_v13  ;;  %1887 = vrot.lane.b32.xlu2 %v1106_v47, %s4934_s22  ;;  %v3214_v39 = vperm.slane %v3057_v42, 0  ;;  %3130 = vst.msk [vmem:[#allocation3 + $0xaf] sm:$0x1] %vm3117_vm14, %v7456_v48  ;;  %v1013_v42 = vld [vmem:[#allocation2 + $0x12f] sm:$0xff] }
 0x2c1   : > { %2021 = vrot.lane.b32.xlu1 %v6235_v55, %s4936_s29  ;;  %3131 = vst.msk [vmem:[#allocation3 + $0xc7] sm:$0x1] %vm3117_vm14, %v7456_v48 }
 0x2c2   : > { %v3280_v18 = vsel %vm3279_vm3, %v3212_v43, %v3278_v14  ;;  %v6246_v30 = vpop.permute.xlu2 %1783  ;;  %2041 = vrot.lane.b32.xlu0 %v6241_v41, %s4936_s29  ;;  %3132 = vst.msk [vmem:[#allocation3 + $0xdf] sm:$0x1] %vm3117_vm14, %v7456_v48  ;;  %v6356_v43 = vld [vmem:[#allocation2 + $0x189] sm:$0xff] }
 0x2c3   : > { %v3282_v31 = vsel %vm3281_vm0, %v3213_v5, %v3280_v18  ;;  %v6255_v19 = vpop.permute.xlu1 %1527  ;;  %3135 = vst.msk [vmem:[#allocation3 + $0x40] sm:$0x1] %vm3117_vm14, %v7456_v48  ;;  %v6362_v5 = vld [vmem:[#allocation2 + $0x188] sm:$0xff] }
 0x2c4   : > { %v3284_v56 = vsel %vm3283_vm13, %v3214_v39, %v3282_v31  ;;  %v1910_v46 = vpop.permute.xlu0 %1909  ;;  %3136 = vst.msk [vmem:[#allocation3 + $0x58] sm:$0x1] %vm3117_vm14, %v7456_v48 }
 0x2c5   : > { %3343 = vst.msk [vmem:[#allocation3 + $0x20] sm:$0xff] %vm7404_vm12, %v3284_v56  ;;  %v2402_v26 = vsel %vm2377_vm8, %v2369_v17, %v1910_v46  ;;  %vm7469_vm12 = vcmask 1042434  }
 0x2c6   : > { %v2435_v40 = vsel %vm2410_vm9, %v2402_v26, %v6183_v50  ;;  %v7463_v50 = vld [vmem:[#allocation35_spill] sm:$0xff]  ;;  %3137 = vst.msk [vmem:[#allocation3 + $0x70] sm:$0x1] %vm3117_vm14, %v7456_v48 }
 0x2c7   : > { %v2468_v15 = vsel %vm2443_vm10, %v2435_v40, %v2166_v32  ;;  %v2257_v28 = vsel %vm2245_vm4, %v2224_v61, %v7463_v50  ;;  %v6289_v32 = vld [vmem:[#allocation2 + $0x147] sm:$0xff]  ;;  %3138 = vst.msk [vmem:[#allocation3 + $0x88] sm:$0x1] %vm3117_vm14, %v7456_v48 }
 0x2c8   : > { %1773 = vrot.lane.b32.xlu2 %v6270_v44, %s4937_s8  ;;  %4516 = vmatmul.msk.f32.gmra.mxu3 %vm2484_vm11, %v2468_v15  ;;  %v2290_v36 = vsel %vm2278_vm5, %v2257_v28, %v1500_v10  ;;  %v6312_v10 = vld [vmem:[#allocation2 + $0x187] sm:$0xff]  ;;  %3139 = vst.msk [vmem:[#allocation3 + $0xa0] sm:$0x1] %vm3117_vm14, %v7456_v48  ;;  %v7464_v15 = vld [vmem:[#allocation24_spill] sm:$0xff] }
 0x2c9   : > { %2149 = vrot.lane.b32.xlu1 %v6280_v38, %s4938_s9  ;;  %v2323_v22 = vsel %vm2311_vm6, %v2290_v36, %v6158_v7  ;;  %3140 = vst.msk [vmem:[#allocation3 + $0xb8] sm:$0x1] %vm3117_vm14, %v7456_v48  ;;  %v2238_v29 = vsel %vm820_vm1, %v5893_v62, %v7464_v15  ;;  %v7465_v28 = vld [vmem:[#allocation51_spill] sm:$0xff] }
 0x2ca   : > { %v6294_v37 = vpop.permute.xlu2 %1911  ;;  %1893 = vrot.lane.b32.xlu0 %v6289_v32, %s4934_s22  ;;  %v2356_v49 = vsel %vm2344_vm7, %v2323_v22, %v6203_v16  ;;  %v2614_v16 = vpop.f32.mrf.mxu0  ;;  %3141 = vst.msk [vmem:[#allocation3 + $0xd0] sm:$0x1] %vm3117_vm14, %v7456_v48  ;;  %v2271_v36 = vsel %vm2245_vm4, %v2238_v29, %v7465_v28 }
 0x2cb   : > { %v6300_v9 = vpop.permute.xlu1 %1507  ;;  %3142 = vst.msk [vmem:[#allocation3 + $0xe8] sm:$0x1] %vm3117_vm14, %v7456_v48  ;;  %v2615_v14 = vadd.f32 %v6136_v58, %v2614_v16  ;;  %v6391_v16 = vld [vmem:[#allocation2 + $0x1ef] sm:$0xff]  ;;  %vm7468_vm14 = vcmask 1041409  }
 0x2cc   : > { %v1884_v12 = vpop.permute.xlu0 %1883 }
 0x2cd   : > { %v2389_v7 = vsel %vm2377_vm8, %v2356_v49, %v1884_v12  ;;  %v2702_v56 = vmax.f32 %v2615_v14, 0.0  ;;  %v7466_v14 = vld [vmem:[#allocation22_spill] sm:$0xff] }
 0x2d0   : > { %1901 = vrot.lane.b32.xlu2 %v6312_v10, %s4934_s22 }
 0x2d1   : > { %1659 = vrot.lane.b32.xlu1 %v6082_v52, %s4935_s23  ;;  %v2422_v52 = vsel %vm2410_vm9, %v2389_v7, %v6199_v59  ;;  %v1170_v59 = vld [vmem:[#allocation2 + $0x111] sm:$0xff] }
 0x2d2   : > { %v6327_v35 = vpop.permute.xlu2 %1763  ;;  %2015 = vrot.lane.b32.xlu0 %v6022_v24, %s4936_s29  ;;  %v1023_v24 = vld [vmem:[#allocation2 + $0x1cf] sm:$0xff] }
 0x2d3   : > { %v6333_v4 = vpop.permute.xlu1 %1635  ;;  %v2617_v13 = vpop.f32.mrf.mxu0 }
 0x2d4   : > { %v2140_v54 = vpop.permute.xlu0 %2139 }
 0x2d5   : > { %v2455_v23 = vsel %vm2443_vm10, %v2422_v52, %v2140_v54  ;;  %v2618_v52 = vadd.f32 %v6136_v58, %v2617_v13 }
 0x2d6   : > { %4503 = vmatmul.msk.f32.gmra.mxu0 %vm2484_vm11, %v2455_v23 }
 0x2d8   : > { %1531 = vrot.lane.b32.xlu2 %v1023_v24, %s4933_s21 }
 0x2d9   : > { %1511 = vrot.lane.b32.xlu1 %v1013_v42, %s4933_s21 }
 0x2da   : > { %v6349_v11 = vpop.permute.xlu2 %1885  ;;  %2143 = vrot.lane.b32.xlu0 %v1170_v59, %s4938_s9 }
 0x2db   : > { %v6352_v47 = vpop.permute.xlu1 %1757 }
 0x2dc   : > { %v6354_v53 = vpop.permute.xlu0 %1501 }
 0x2e0   : > { %2157 = vrot.lane.b32.xlu2 %v6356_v43, %s4938_s9 }
 0x2e1   : > { %1639 = vrot.lane.b32.xlu1 %v6077_v27, %s4935_s23 }
 0x2e2   : > { %v6365_v39 = vpop.permute.xlu2 %1771  ;;  %2029 = vrot.lane.b32.xlu0 %v6362_v5, %s4936_s29 }
 0x2e3   : > { %v6369_v18 = vpop.permute.xlu1 %1643  ;;  %v2620_v60 = vpop.f32.mrf.mxu0 }
 0x2e4   : > { %v2621_v31 = vadd.f32 %v6136_v58, %v2620_v60  ;;  %v6372_v17 = vpop.permute.xlu0 %1629  ;;  %v2228_v60 = vsel %vm820_vm1, %v6010_v21, %v7466_v14 }
 0x2e6   : > { %v2704_v46 = vmax.f32 %v2621_v31, 0.0 }
 0x2e8   : > { %v2732_v26 = vmax.f32 %v2702_v56, %v2704_v46  ;;  %1787 = vrot.lane.b32.xlu2 %v6061_v6, %s4937_s8  ;;  %v7467_v46 = vld [vmem:[#allocation34_spill] sm:$0xff] }
 0x2e9   : > { %1761 = vrot.lane.b32.xlu1 %v6125_v1, %s4937_s8  ;;  %v2304_v1 = vsel %vm2278_vm5, %v2271_v36, %v6255_v19 }
 0x2ea   : > { %v2768_v27 = vrot.slane %v2732_v26, 2  ;;  %v6378_v40 = vpop.permute.xlu2 %1899  ;;  %1505 = vrot.lane.b32.xlu0 %v6073_v3, %s4933_s21  ;;  %v2769_v61 = vrot.slane %v2732_v26, 4  ;;  %v4532_v49 = vrot.slane %v2732_v26, 9  ;;  %v2337_v3 = vsel %vm2311_vm6, %v2304_v1, %v6221_v25 }
 0x2eb   : > { %v2168_v50 = vpop.permute.xlu1 %2167  ;;  %v2770_v62 = vrot.slane %v2732_v26, 6  ;;  %v2370_v19 = vsel %vm2344_vm7, %v2337_v3, %v6246_v30 }
 0x2ec   : > { %v4533_v12 = vrot.slane %v2768_v27, 9  ;;  %v6387_v22 = vpop.permute.xlu0 %1515  ;;  %v4534_v7 = vrot.slane %v2769_v61, 9  ;;  %v3058_v23 = vmax.f32 %v2732_v26, %v4532_v49  ;;  %v6423_v49 = vld [vmem:[#allocation2 + $0x1f1] sm:$0xff] }
 0x2ed   : > { %v4535_v26 = vrot.slane %v2770_v62, 9 }
 0x2ee   : > { %v3059_v54 = vmax.f32 %v2768_v27, %v4533_v12  ;;  %v3060_v25 = vmax.f32 %v2769_v61, %v4534_v7  ;;  %v2703_v27 = vmax.f32 %v2618_v52, 0.0  ;;  %v3215_v15 = vperm.slane %v3058_v23, 0 }
 0x2ef   : > { %v3061_v7 = vmax.f32 %v2770_v62, %v4535_v26 }
 0x2f0   : > { %1915 = vrot.lane.b32.xlu2 %v6391_v16, %s4934_s22  ;;  %v3216_v13 = vperm.slane %v3059_v54, 0  ;;  %v3217_v28 = vperm.slane %v3060_v25, 0 }
 0x2f1   : > { %1647 = vrot.lane.b32.xlu1 %v6153_v63, %s4935_s23  ;;  %v2403_v63 = vsel %vm2377_vm8, %v2370_v19, %v6294_v37  ;;  %v1077_v37 = vld [vmem:[#allocation2 + $0x131] sm:$0xff] }
 0x2f2   : > { %v6400_v24 = vpop.permute.xlu2 %1529  ;;  %1633 = vrot.lane.b32.xlu0 %v6111_v33, %s4935_s23  ;;  %v2261_v33 = vsel %vm2245_vm4, %v2228_v60, %v7467_v46  ;;  %v3285_v12 = vsel %vm7468_vm14, %v3216_v13, %v3215_v15  ;;  %v3218_v13 = vperm.slane %v3061_v7, 0 }
 0x2f3   : > { %v2020_v42 = vpop.permute.xlu1 %2019  ;;  %v2623_v59 = vpop.f32.mrf.mxu0  ;;  %v2294_v21 = vsel %vm2278_vm5, %v2261_v33, %v6300_v9 }
 0x2f4   : > { %v2624_v31 = vadd.f32 %v6136_v58, %v2623_v59  ;;  %v2040_v56 = vpop.permute.xlu0 %2039  ;;  %v2327_v36 = vsel %vm2311_vm6, %v2294_v21, %v6333_v4  ;;  %v3286_v4 = vsel %vm7469_vm12, %v3217_v28, %v3285_v12  ;;  %v6441_v28 = vld [vmem:[#allocation2 + $0x1f0] sm:$0xff]  ;;  %vm7472_vm12 = vcmask 130048  }
 0x2f5   : > { %v2436_v30 = vsel %vm2410_vm9, %v2403_v63, %v2040_v56  ;;  %v2360_v25 = vsel %vm2344_vm7, %v2327_v36, %v6327_v35  ;;  %v7470_v36 = vld [vmem:[#allocation19_spill] sm:$0xff] }
 0x2f6   : > { %v2705_v29 = vmax.f32 %v2624_v31, 0.0  ;;  %v2469_v61 = vsel %vm2443_vm10, %v2436_v30, %v2168_v50  ;;  %v1017_v50 = vld [vmem:[#allocation2 + $0x16f] sm:$0xff]  ;;  %v3287_v30 = vsel %vm3275_vm15, %v3218_v13, %v3286_v4 }
 0x2f7   : > { %4517 = vmatmul.msk.f32.gmra.mxu3 %vm2484_vm11, %v2469_v61 }
 0x2f8   : > { %v2733_v1 = vmax.f32 %v2703_v27, %v2705_v29  ;;  %1767 = vrot.lane.b32.xlu2 %v1077_v37, %s4937_s8  ;;  %v1107_v27 = vld [vmem:[#allocation2 + $0x127] sm:$0xff] }
 0x2f9   : > { %2171 = vrot.lane.b32.xlu1 %v6423_v49, %s4938_s9  ;;  %v4835_v37 = vld [vmem:[#allocation2 + $0xc7] sm:$0xff] }
 0x2fa   : > { %v2771_v9 = vrot.slane %v2733_v1, 2  ;;  %v2772_v3 = vrot.slane %v2733_v1, 4  ;;  %v2773_v54 = vrot.slane %v2733_v1, 6  ;;  %v4536_v52 = vrot.slane %v2733_v1, 9  ;;  %v6427_v23 = vpop.permute.xlu2 %2155  ;;  %1519 = vrot.lane.b32.xlu0 %v1017_v50, %s4933_s21  ;;  %v7471_v50 = vld [vmem:[#allocation33_spill] sm:$0xff] }
 0x2fb   : > { %v2148_v19 = vpop.permute.xlu1 %2147  ;;  %v2225_v12 = vsel %vm820_vm1, %v4835_v37, %v7470_v36 }
 0x2fc   : > { %v4537_v59 = vrot.slane %v2771_v9, 9  ;;  %v4538_v62 = vrot.slane %v2772_v3, 9  ;;  %v4539_v14 = vrot.slane %v2773_v54, 9  ;;  %v3062_v60 = vmax.f32 %v2733_v1, %v4536_v52  ;;  %v1892_v63 = vpop.permute.xlu0 %1891 }
 0x2fd   : > { %v2393_v31 = vsel %vm2377_vm8, %v2360_v25, %v1892_v63 }
 0x2fe   : > { %v3063_v56 = vmax.f32 %v2771_v9, %v4537_v59  ;;  %v3064_v46 = vmax.f32 %v2772_v3, %v4538_v62  ;;  %v3065_v33 = vmax.f32 %v2773_v54, %v4539_v14  ;;  %v3219_v26 = vperm.slane %v3062_v60, 0  ;;  %v1174_v59 = vld [vmem:[#allocation2 + $0x151] sm:$0xff]  ;;  %v7473_v62 = vld [vmem:[#allocation18_spill] sm:$0xff]  ;;  %v7474_v60 = vld [vmem:[#allocation49_spill] sm:$0xff] }
 0x2ff   : > { %v2426_v15 = vsel %vm2410_vm9, %v2393_v31, %v2020_v42  ;;  %v2232_v14 = vsel %vm820_vm1, %v6096_v51, %v7473_v62  ;;  %v7478_v62 = vld [vmem:[#allocation46_spill] sm:$0xff] }
 0x300   : > { %v3220_v29 = vperm.slane %v3063_v56, 0  ;;  %v3221_v61 = vperm.slane %v3064_v46, 0  ;;  %v3288_v35 = vsel %vm3277_vm2, %v3219_v26, %v3287_v30  ;;  %1889 = vrot.lane.b32.xlu2 %v1107_v27, %s4934_s22  ;;  %v2459_v21 = vsel %vm2443_vm10, %v2426_v15, %v2148_v19 }
 0x301   : > { %2023 = vrot.lane.b32.xlu1 %v6047_v34, %s4936_s29  ;;  %v3222_v1 = vperm.slane %v3065_v33, 0  ;;  %4507 = vmatmul.msk.f32.vlgmr.msra.gmra.mxu1 %vm2484_vm11, %v2459_v21  ;;  %v2258_v34 = vsel %vm2245_vm4, %v2225_v12, %v7471_v50  ;;  %v2265_v63 = vsel %vm2245_vm4, %v2232_v14, %v7474_v60  ;;  %v1114_v33 = vld [vmem:[#allocation2 + $0x18f] sm:$0xff]  ;;  %v4836_v12 = vld [vmem:[#allocation2 + $0x1a7] sm:$0xff] }
 0x302   : > { %v3289_v42 = vsel %vm3279_vm3, %v3220_v29, %v3288_v35  ;;  %v6447_v7 = vpop.permute.xlu2 %1785  ;;  %2043 = vrot.lane.b32.xlu0 %v6441_v28, %s4936_s29  ;;  %v2291_v54 = vsel %vm2278_vm5, %v2258_v34, %v6354_v53  ;;  %v1110_v53 = vld [vmem:[#allocation2 + $0x14f] sm:$0xff] }
 0x303   : > { %v3290_v9 = vsel %vm3281_vm0, %v3221_v61, %v3289_v42  ;;  %v1658_v3 = vpop.permute.xlu1 %1657  ;;  %v2324_v19 = vsel %vm2311_vm6, %v2291_v54, %v6372_v17  ;;  %v1178_v29 = vld [vmem:[#allocation2 + $0x191] sm:$0xff] }
 0x304   : > { %v3291_v52 = vsel %vm3283_vm13, %v3222_v1, %v3290_v9  ;;  %v2014_v4 = vpop.permute.xlu0 %2013  ;;  %v2357_v25 = vsel %vm2344_vm7, %v2324_v19, %v6352_v47  ;;  %v2298_v47 = vsel %vm2278_vm5, %v2265_v63, %v6387_v22  ;;  %v7475_v1 = vld [vmem:[#allocation20_spill] sm:$0xff] }
 0x305   : > { %3344 = vst.msk [vmem:[#allocation3 + $0x38] sm:$0xff] %vm7472_vm12, %v3291_v52  ;;  %v2331_v46 = vsel %vm2311_vm6, %v2298_v47, %v6369_v18  ;;  %v2239_v42 = vsel %vm820_vm1, %v4836_v12, %v7475_v1  ;;  %v7476_v50 = vld [vmem:[#allocation48_spill] sm:$0xff]  ;;  %vm7483_vm12 = vcmask 1042434  }
 0x306   : > { %v2272_v34 = vsel %vm2245_vm4, %v2239_v42, %v7476_v50  ;;  %v920_v42 = vld [vmem:[#allocation2 + $0x147] sm:$0xff] }
 0x308   : > { %1775 = vrot.lane.b32.xlu2 %v6140_v57, %s4937_s8  ;;  %v2390_v57 = vsel %vm2377_vm8, %v2357_v25, %v6349_v11  ;;  %v2364_v11 = vsel %vm2344_vm7, %v2331_v46, %v6365_v39  ;;  %v7477_v25 = vld [vmem:[#allocation9_spill] sm:$0xff] }
 0x309   : > { %2151 = vrot.lane.b32.xlu1 %v1174_v59, %s4938_s9  ;;  %v2423_v31 = vsel %vm2410_vm9, %v2390_v57, %v2014_v4  ;;  %v2397_v18 = vsel %vm2377_vm8, %v2364_v11, %v6378_v40  ;;  %v1147_v11 = vld [vmem:[#allocation2 + $0x1a8] sm:$0xff] }
 0x30a   : > { %v1914_v17 = vpop.permute.xlu2 %1913  ;;  %1895 = vrot.lane.b32.xlu0 %v1110_v53, %s4934_s22 }
 0x30b   : > { %v1510_v13 = vpop.permute.xlu1 %1509 }
 0x30c   : > { %v2142_v56 = vpop.permute.xlu0 %2141 }
 0x30d   : > { %v2456_v51 = vsel %vm2443_vm10, %v2423_v31, %v2142_v56 }
 0x30e   : > { %4504 = vmatmul.msk.f32.gmra.mxu0 %vm2484_vm11, %v2456_v51 }
 0x310   : > { %1903 = vrot.lane.b32.xlu2 %v1114_v33, %s4934_s22 }
 0x311   : > { %1661 = vrot.lane.b32.xlu1 %v6241_v41, %s4935_s23  ;;  %v1024_v41 = vld [vmem:[#allocation2 + $0x1e7] sm:$0xff] }
 0x312   : > { %v6485_v22 = vpop.permute.xlu2 %1765  ;;  %2017 = vrot.lane.b32.xlu0 %v6147_v20, %s4936_s29 }
 0x313   : > { %v1638_v26 = vpop.permute.xlu1 %1637 }
 0x314   : > { %v2028_v30 = vpop.permute.xlu0 %2027 }
 0x315   : > { %v2430_v27 = vsel %vm2410_vm9, %v2397_v18, %v2028_v30  ;;  %v6577_v30 = vld [vmem:[#allocation2 + $0x209] sm:$0xff]  ;;  %v7479_v18 = vld [vmem:[#allocation16_spill] sm:$0xff] }
 0x316   : > { %v2463_v15 = vsel %vm2443_vm10, %v2430_v27, %v6427_v23  ;;  %v1146_v23 = vld [vmem:[#allocation2 + $0x190] sm:$0xff] }
 0x317   : > { %4511 = vmatmul.msk.f32.vlgmr.msra.gmra.mxu2 %vm2484_vm11, %v2463_v15 }
 0x318   : > { %1533 = vrot.lane.b32.xlu2 %v1024_v41, %s4933_s21 }
 0x319   : > { %1789 = vrot.lane.b32.xlu1 %v6215_v2, %s4937_s8 }
 0x31a   : > { %v6498_v39 = vpop.permute.xlu2 %1887  ;;  %2145 = vrot.lane.b32.xlu0 %v6210_v45, %s4938_s9  ;;  %v2626_v45 = vpop.f32.mrf.mxu0 }
 0x31b   : > { %v6502_v20 = vpop.permute.xlu1 %1759  ;;  %v2627_v51 = vadd.f32 %v6136_v58, %v2626_v45 }
 0x31c   : > { %v6504_v40 = vpop.permute.xlu0 %1503 }
 0x31d   : > { %v2706_v15 = vmax.f32 %v2627_v51, 0.0 }
 0x320   : > { %2159 = vrot.lane.b32.xlu2 %v1178_v29, %s4938_s9 }
 0x321   : > { %1521 = vrot.lane.b32.xlu1 %v6312_v10, %s4933_s21 }
 0x322   : > { %v6509_v61 = vpop.permute.xlu2 %1773  ;;  %2031 = vrot.lane.b32.xlu0 %v1146_v23, %s4936_s29  ;;  %v6535_v9 = vpop.f32.mrf.mxu0 }
 0x323   : > { %v6512_v35 = vpop.permute.xlu1 %1645 }
 0x324   : > { %v6514_v21 = vpop.permute.xlu0 %1631 }
 0x328   : > { %1641 = vrot.lane.b32.xlu2 %v6235_v55, %s4935_s23  ;;  %v2305_v55 = vsel %vm2278_vm5, %v2272_v34, %v6400_v24 }
 0x329   : > { %1649 = vrot.lane.b32.xlu1 %v6362_v5, %s4935_s23  ;;  %v2338_v5 = vsel %vm2311_vm6, %v2305_v55, %v1658_v3  ;;  %v7481_v55 = vld [vmem:[#allocation15_spill] sm:$0xff] }
 0x32a   : > { %v6520_v37 = vpop.permute.xlu2 %1901  ;;  %1513 = vrot.lane.b32.xlu0 %v6289_v32, %s4933_s21  ;;  %v6539_v32 = vld [vmem:[#allocation2 + $0x207] sm:$0xff]  ;;  %v2371_v24 = vsel %vm2344_vm7, %v2338_v5, %v6447_v7  ;;  %v2233_v5 = vsel %vm820_vm1, %v920_v42, %v7481_v55 }
 0x32b   : > { %v2170_v10 = vpop.permute.xlu1 %2169  ;;  %v2404_v3 = vsel %vm2377_vm8, %v2371_v24, %v1914_v17  ;;  %v1115_v7 = vld [vmem:[#allocation2 + $0x1a7] sm:$0xff] }
 0x32c   : > { %v6524_v36 = vpop.permute.xlu0 %1517  ;;  %v6560_v17 = vld [vmem:[#allocation2 + $0x208] sm:$0xff] }
 0x330   : > { %1769 = vrot.lane.b32.xlu2 %v6280_v38, %s4937_s8  ;;  %v916_v38 = vld [vmem:[#allocation2 + $0x107] sm:$0xff] }
 0x331   : > { %1777 = vrot.lane.b32.xlu1 %v6356_v43, %s4937_s8  ;;  %v2229_v43 = vsel %vm820_vm1, %v916_v38, %v7477_v25 }
 0x332   : > { %v6541_v54 = vpop.permute.xlu2 %1531  ;;  %1917 = vrot.lane.b32.xlu0 %v6539_v32, %s4934_s22  ;;  %v2262_v14 = vsel %vm2245_vm4, %v2229_v43, %v7478_v62 }
 0x333   : > { %v2022_v52 = vpop.permute.xlu1 %2021  ;;  %v2295_v53 = vsel %vm2278_vm5, %v2262_v14, %v1510_v13  ;;  %v2632_v63 = vpop.f32.mrf.mxu0 }
 0x334   : > { %v2042_v4 = vpop.permute.xlu0 %2041  ;;  %v2328_v60 = vsel %vm2311_vm6, %v2295_v53, %v1638_v26  ;;  %v2633_v31 = vadd.f32 %v6136_v58, %v2632_v63 }
 0x335   : > { %v2437_v19 = vsel %vm2410_vm9, %v2404_v3, %v2042_v4 }
 0x336   : > { %v2470_v59 = vsel %vm2443_vm10, %v2437_v19, %v2170_v10  ;;  %v2708_v33 = vmax.f32 %v2633_v31, 0.0 }
 0x337   : > { %4518 = vmatmul.msk.f32.gmra.mxu3 %vm2484_vm11, %v2470_v59 }
 0x338   : > { %1897 = vrot.lane.b32.xlu2 %v6219_v0, %s4934_s22  ;;  %v2361_v0 = vsel %vm2344_vm7, %v2328_v60, %v6485_v22  ;;  %v4837_v22 = vld [vmem:[#allocation2 + $0xcf] sm:$0xff]  ;;  %v2734_v10 = vmax.f32 %v2706_v15, %v2708_v33 }
 0x339   : > { %1905 = vrot.lane.b32.xlu1 %v1115_v7, %s4934_s22  ;;  %v2226_v27 = vsel %vm820_vm1, %v4837_v22, %v7479_v18 }
 0x33a   : > { %v6562_v47 = vpop.permute.xlu2 %2157  ;;  %2045 = vrot.lane.b32.xlu0 %v6560_v17, %s4936_s29  ;;  %v2774_v34 = vrot.slane %v2734_v10, 2  ;;  %v4540_v59 = vrot.slane %v2734_v10, 9  ;;  %v2776_v62 = vrot.slane %v2734_v10, 6 }
 0x33b   : > { %v2150_v57 = vpop.permute.xlu1 %2149 }
 0x33c   : > { %v1894_v13 = vpop.permute.xlu0 %1893  ;;  %v4541_v4 = vrot.slane %v2774_v34, 9  ;;  %v3066_v53 = vmax.f32 %v2734_v10, %v4540_v59 }
 0x33d   : > { %v2394_v56 = vsel %vm2377_vm8, %v2361_v0, %v1894_v13  ;;  %v4543_v0 = vrot.slane %v2776_v62, 9 }
 0x33e   : > { %v2427_v46 = vsel %vm2410_vm9, %v2394_v56, %v2022_v52  ;;  %v3223_v51 = vperm.slane %v3066_v53, 0  ;;  %v4838_v53 = vld [vmem:[#allocation2 + $0x1af] sm:$0xff] }
 0x33f   : > { %v2460_v26 = vsel %vm2443_vm10, %v2427_v46, %v2150_v57  ;;  %v3069_v22 = vmax.f32 %v2776_v62, %v4543_v0  ;;  %v1123_v0 = vld [vmem:[#allocation2 + $0x227] sm:$0xff] }
 0x340   : > { %2025 = vrot.lane.b32.xlu2 %v6193_v8, %s4936_s29  ;;  %4508 = vmatmul.msk.f32.gmra.mxu1 %vm2484_vm11, %v2460_v26  ;;  %v7480_v8 = vld [vmem:[#allocation43_spill] sm:$0xff] }
 0x341   : > { %2033 = vrot.lane.b32.xlu1 %v1147_v11, %s4936_s29  ;;  %v2259_v29 = vsel %vm2245_vm4, %v2226_v27, %v7480_v8  ;;  %v1122_v11 = vld [vmem:[#allocation2 + $0x20f] sm:$0xff] }
 0x342   : > { %v6581_v41 = vpop.permute.xlu2 %1787  ;;  %2173 = vrot.lane.b32.xlu0 %v6577_v30, %s4938_s9  ;;  %v2292_v45 = vsel %vm2278_vm5, %v2259_v29, %v6504_v40  ;;  %v7482_v40 = vld [vmem:[#allocation42_spill] sm:$0xff] }
 0x343   : > { %v6587_v23 = vpop.permute.xlu1 %1659  ;;  %v2325_v1 = vsel %vm2311_vm6, %v2292_v45, %v6514_v21  ;;  %v2266_v24 = vsel %vm2245_vm4, %v2233_v5, %v7482_v40  ;;  %v2775_v21 = vrot.slane %v2734_v10, 4 }
 0x344   : > { %v2016_v12 = vpop.permute.xlu0 %2015  ;;  %v2358_v50 = vsel %vm2344_vm7, %v2325_v1, %v6502_v20  ;;  %v2299_v20 = vsel %vm2278_vm5, %v2266_v24, %v6524_v36  ;;  %v3067_v36 = vmax.f32 %v2774_v34, %v4541_v4  ;;  %v1155_v24 = vld [vmem:[#allocation2 + $0x228] sm:$0xff] }
 0x345   : > { %v2332_v43 = vsel %vm2311_vm6, %v2299_v20, %v6512_v35  ;;  %v2630_v35 = vadd.f32 %v6136_v58, %v6535_v9 }
 0x346   : > { %v2365_v14 = vsel %vm2344_vm7, %v2332_v43, %v6509_v61  ;;  %v3224_v57 = vperm.slane %v3067_v36, 0 }
 0x347   : > { %v2398_v61 = vsel %vm2377_vm8, %v2365_v14, %v6520_v37  ;;  %v2707_v56 = vmax.f32 %v2630_v35, 0.0  ;;  %v1179_v37 = vld [vmem:[#allocation2 + $0x1a9] sm:$0xff] }
 0x348   : > { %2153 = vrot.lane.b32.xlu2 %v6270_v44, %s4938_s9  ;;  %v2391_v44 = vsel %vm2377_vm8, %v2358_v50, %v6498_v39  ;;  %v6620_v39 = vld [vmem:[#allocation2 + $0x211] sm:$0xff]  ;;  %v3292_v26 = vsel %vm7468_vm14, %v3224_v57, %v3223_v51  ;;  %vm7484_vm14 = vcmask 130048   ;;  %v1187_v57 = vld [vmem:[#allocation2 + $0x229] sm:$0xff] }
 0x349   : > { %1791 = vrot.lane.b32.xlu1 %v6423_v49, %s4937_s8  ;;  %v2424_v38 = vsel %vm2410_vm9, %v2391_v44, %v2016_v12 }
 0x34a   : > { %v6603_v52 = vpop.permute.xlu2 %1915  ;;  %1407 = vrot.lane.b32.xlu0 %v6061_v6, %s4932_s20  ;;  %v4542_v6 = vrot.slane %v2775_v21, 9 }
 0x34b   : > { %v6611_v3 = vpop.permute.xlu1 %1511 }
 0x34c   : > { %v2144_v19 = vpop.permute.xlu0 %2143  ;;  %v3068_v60 = vmax.f32 %v2775_v21, %v4542_v6 }
 0x34d   : > { %v2457_v25 = vsel %vm2443_vm10, %v2424_v38, %v2144_v19  ;;  %v1154_v38 = vld [vmem:[#allocation2 + $0x210] sm:$0xff] }
 0x34e   : > { %4505 = vmatmul.msk.f32.gmra.mxu0 %vm2484_vm11, %v2457_v25  ;;  %v3225_v33 = vperm.slane %v3068_v60, 0  ;;  %v7485_v60 = vld [vmem:[#allocation30_spill] sm:$0xff] }
 0x350   : > { %1663 = vrot.lane.b32.xlu2 %v6441_v28, %s4935_s23 }
 0x351   : > { %2175 = vrot.lane.b32.xlu1 %v6620_v39, %s4938_s9 }
 0x352   : > { %v6628_v7 = vpop.permute.xlu2 %1767  ;;  %1535 = vrot.lane.b32.xlu0 %v6391_v16, %s4933_s21 }
 0x353   : > { %v6632_v28 = vpop.permute.xlu1 %1639  ;;  %v2635_v63 = vpop.f32.mrf.mxu0 }
 0x354   : > { %v2636_v31 = vadd.f32 %v6136_v58, %v2635_v63  ;;  %v2030_v13 = vpop.permute.xlu0 %2029  ;;  %v2240_v63 = vsel %vm820_vm1, %v4838_v53, %v7485_v60  ;;  %v7491_v53 = vld [vmem:[#allocation27_spill] sm:$0xff]  ;;  %v7492_v60 = vld [vmem:[#allocation38_spill] sm:$0xff] }
 0x355   : > { %v2431_v9 = vsel %vm2410_vm9, %v2398_v61, %v2030_v13  ;;  %v1124_v61 = vld [vmem:[#allocation2 + $0x22f] sm:$0xff] }
 0x356   : > { %v2709_v46 = vmax.f32 %v2636_v31, 0.0  ;;  %v2464_v16 = vsel %vm2443_vm10, %v2431_v9, %v6562_v47  ;;  %v3293_v47 = vsel %vm7483_vm12, %v3225_v33, %v3292_v26  ;;  %v7486_v31 = vld [vmem:[#allocation44_spill] sm:$0xff]  ;;  %v3360_v33 = vld [vmem:[#allocation3 + $0x20] sm:$0xff]  ;;  %vm7500_vm12 = vmmov %vm7484_vm14 }
 0x357   : > { %4512 = vmatmul.msk.f32.gmra.mxu2 %vm2484_vm11, %v2464_v16  ;;  %v2273_v13 = vsel %vm2245_vm4, %v2240_v63, %v7486_v31  ;;  %v3359_v16 = vld [vmem:[#allocation3 + $0x8] sm:$0xff]  ;;  %v7487_v26 = vld [vmem:[#allocation12_spill] sm:$0xff] }
 0x358   : > { %v2735_v58 = vmax.f32 %v2707_v56, %v2709_v46  ;;  %1919 = vrot.lane.b32.xlu2 %v1122_v11, %s4934_s22 }
 0x359   : > { %1665 = vrot.lane.b32.xlu1 %v6560_v17, %s4935_s23  ;;  %v3226_v17 = vperm.slane %v3069_v22, 0 }
 0x35a   : > { %v2777_v18 = vrot.slane %v2735_v58, 2  ;;  %v2778_v27 = vrot.slane %v2735_v58, 4  ;;  %v2779_v15 = vrot.slane %v2735_v58, 6  ;;  %v4544_v8 = vrot.slane %v2735_v58, 9  ;;  %v6645_v29 = vpop.permute.xlu2 %1889  ;;  %2161 = vrot.lane.b32.xlu0 %v1179_v37, %s4938_s9  ;;  %v7488_v37 = vld [vmem:[#allocation39_spill] sm:$0xff] }
 0x35b   : > { %v6649_v45 = vpop.permute.xlu1 %1761  ;;  %v3294_v20 = vsel %vm3275_vm15, %v3226_v17, %v3293_v47 }
 0x35c   : > { %v4545_v10 = vrot.slane %v2777_v18, 9  ;;  %v4546_v12 = vrot.slane %v2778_v27, 9  ;;  %v4547_v1 = vrot.slane %v2779_v15, 9  ;;  %v3070_v42 = vmax.f32 %v2735_v58, %v4544_v8  ;;  %v6651_v50 = vpop.permute.xlu0 %1505 }
 0x35e   : > { %v3071_v34 = vmax.f32 %v2777_v18, %v4545_v10  ;;  %v3072_v55 = vmax.f32 %v2778_v27, %v4546_v12  ;;  %v3073_v5 = vmax.f32 %v2779_v15, %v4547_v1  ;;  %v3227_v40 = vperm.slane %v3070_v42, 0  ;;  %v3384_v12 = vld [vmem:[#allocation3 + $0x38] sm:$0xff]  ;;  %v1156_v1 = vld [vmem:[#allocation2 + $0x230] sm:$0xff] }
 0x360   : > { %v3228_v21 = vperm.slane %v3071_v34, 0  ;;  %v3229_v44 = vperm.slane %v3072_v55, 0  ;;  %v3295_v4 = vsel %vm3277_vm2, %v3227_v40, %v3294_v20  ;;  %1409 = vrot.lane.b32.xlu2 %v6215_v2, %s4932_s20  ;;  %v3230_v19 = vperm.slane %v3073_v5, 0  ;;  %v7489_v34 = vld [vmem:[#allocation11_spill] sm:$0xff]  ;;  %v7490_v5 = vld [vmem:[#allocation37_spill] sm:$0xff] }
 0x361   : > { %2049 = vrot.lane.b32.xlu1 %v1155_v24, %s4936_s29  ;;  %v3367_v20 = vld [vmem:[#allocation3 + $0x9] sm:$0xff] }
 0x362   : > { %v3296_v25 = vsel %vm3279_vm3, %v3228_v21, %v3295_v4  ;;  %v6659_v43 = vpop.permute.xlu2 %1775  ;;  %2047 = vrot.lane.b32.xlu0 %v1154_v38, %s4936_s29  ;;  %v3368_v21 = vld [vmem:[#allocation3 + $0x21] sm:$0xff] }
 0x363   : > { %v3297_v59 = vsel %vm3281_vm0, %v3229_v44, %v3296_v25  ;;  %v6663_v6 = vpop.permute.xlu1 %1647  ;;  %v4712_v25 = vpack.i.bf16 %v3368_v21, %v3367_v20  ;;  %v7496_v20 = vld [vmem:[#allocation52_spill] sm:$0xff] }
 0x364   : > { %v3298_v36 = vsel %vm3283_vm13, %v3230_v19, %v3297_v59  ;;  %v6666_v62 = vpop.permute.xlu0 %1633 }
 0x365   : > { %3345 = vst.msk [vmem:[#allocation3 + $0x50] sm:$0xff] %vm7484_vm14, %v3298_v36  ;;  %vm7502_vm14 = vmmov %vm7500_vm12 }
 0x368   : > { %1793 = vrot.lane.b32.xlu2 %v6577_v30, %s4937_s8  ;;  %v2306_v30 = vsel %vm2278_vm5, %v2273_v13, %v6541_v54  ;;  %v6748_v13 = vld [vmem:[#allocation3 + $0x39] sm:$0xff] }
 0x369   : > { %1539 = vrot.lane.b32.xlu1 %v1122_v11, %s4933_s21  ;;  %v2339_v9 = vsel %vm2311_vm6, %v2306_v30, %v6587_v23  ;;  %v4839_v11 = vld [vmem:[#allocation2 + $0x10f] sm:$0xff] }
 0x36a   : > { %v6672_v2 = vpop.permute.xlu2 %1903  ;;  %1537 = vrot.lane.b32.xlu0 %v6539_v32, %s4933_s21  ;;  %v2372_v56 = vsel %vm2344_vm7, %v2339_v9, %v6581_v41  ;;  %v2230_v58 = vsel %vm820_vm1, %v4839_v11, %v7487_v26  ;;  %v4707_v41 = vpack.i.bf16 %v3360_v33, %v3359_v16  ;;  %s4939_s21 = smov 16   ;;  %v3376_v9 = vld [vmem:[#allocation3 + $0x37] sm:$0xff] }
 0x36b   : > { %v2172_v14 = vpop.permute.xlu1 %2171  ;;  %v2405_v46 = vsel %vm2377_vm8, %v2372_v56, %v6603_v52  ;;  %v2263_v18 = vsel %vm2245_vm4, %v2230_v58, %v7488_v37  ;;  %v7493_v37 = vld [vmem:[#allocation25_spill] sm:$0xff] }
 0x36c   : > { %v6676_v35 = vpop.permute.xlu0 %1519  ;;  %v2296_v52 = vsel %vm2278_vm5, %v2263_v18, %v6611_v3  ;;  %v6766_v11 = vld [vmem:[#allocation3 + $0x4f] sm:$0xff] }
 0x36d   : > { %v2329_v27 = vsel %vm2311_vm6, %v2296_v52, %v6632_v28  ;;  %v4722_v28 = vpack.i.bf16 %v3384_v12, %v3360_v33 }
 0x36e   : > { %v2362_v10 = vsel %vm2344_vm7, %v2329_v27, %v6628_v7 }
 0x370   : > { %2177 = vrot.lane.b32.xlu2 %v1187_v57, %s4938_s9 }
 0x371   : > { %1923 = vrot.lane.b32.xlu1 %v1124_v61, %s4934_s22 }
 0x372   : > { %v6688_v32 = vpop.permute.xlu2 %1533  ;;  %1921 = vrot.lane.b32.xlu0 %v1123_v0, %s4934_s22  ;;  %s4940_s22 = smov 64  }
 0x373   : > { %v2024_v51 = vpop.permute.xlu1 %2023 }
 0x374   : > { %v2044_v54 = vpop.permute.xlu0 %2043 }
 0x375   : > { %v2438_v23 = vsel %vm2410_vm9, %v2405_v46, %v2044_v54 }
 0x376   : > { %v2471_v22 = vsel %vm2443_vm10, %v2438_v23, %v2172_v14  ;;  %v4841_v14 = vld [vmem:[#allocation2 + $0x14f] sm:$0xff] }
 0x377   : > { %4519 = vmatmul.msk.f32.gmra.mxu3 %vm2484_vm11, %v2471_v22  ;;  %v4842_v22 = vld [vmem:[#allocation2 + $0x127] sm:$0xff] }
 0x378   : > { %1667 = vrot.lane.b32.xlu2 %v1154_v38, %s4935_s23  ;;  %v6730_v38 = vld [vmem:[#allocation3 + $0x50] sm:$0xff]  ;;  %s4942_s23 = smov 112  }
 0x379   : > { %4708 = vrot.lane.b32.xlu1 %v4707_v41, %s4939_s21  ;;  %v4737_v59 = vpack.i.bf16 %v6730_v38, %v3384_v12  ;;  %v7494_v41 = vld [vmem:[#allocation36_spill] sm:$0xff] }
 0x37a   : > { %v6708_v15 = vpop.permute.xlu2 %2159  ;;  %1411 = vrot.lane.b32.xlu0 %v6423_v49, %s4932_s20  ;;  %v4840_v49 = vld [vmem:[#allocation2 + $0xe7] sm:$0xff]  ;;  %s4941_s20 = smov 32  }
 0x37b   : > { %v2152_v8 = vpop.permute.xlu1 %2151  ;;  %v2227_v7 = vsel %vm820_vm1, %v4840_v49, %v7489_v34 }
 0x37c   : > { %v1896_v47 = vpop.permute.xlu0 %1895  ;;  %v2260_v40 = vsel %vm2245_vm4, %v2227_v7, %v7490_v5  ;;  %v7495_v5 = vld [vmem:[#allocation26_spill] sm:$0xff] }
 0x37d   : > { %v2395_v3 = vsel %vm2377_vm8, %v2362_v10, %v1896_v47  ;;  %v2293_v44 = vsel %vm2278_vm5, %v2260_v40, %v6651_v50  ;;  %v2234_v50 = vsel %vm820_vm1, %v4841_v14, %v7491_v53 }
 0x37e   : > { %v2428_v42 = vsel %vm2410_vm9, %v2395_v3, %v2024_v51  ;;  %v2326_v19 = vsel %vm2311_vm6, %v2293_v44, %v6666_v62  ;;  %v2267_v62 = vsel %vm2245_vm4, %v2234_v50, %v7492_v60  ;;  %v4727_v51 = vpack.i.bf16 %v6748_v13, %v3368_v21 }
 0x37f   : > { %v2461_v17 = vsel %vm2443_vm10, %v2428_v42, %v2152_v8  ;;  %v2359_v36 = vsel %vm2344_vm7, %v2326_v19, %v6649_v45  ;;  %v2300_v57 = vsel %vm2278_vm5, %v2267_v62, %v6676_v35  ;;  %v6756_v35 = vld [vmem:[#allocation3 + $0x1f] sm:$0xff]  ;;  %v6779_v8 = vld [vmem:[#allocation3 + $0x51] sm:$0xff] }
 0x380   : > { %2051 = vrot.lane.b32.xlu2 %v1156_v1, %s4936_s29  ;;  %4509 = vmatmul.msk.f32.gmra.mxu1 %vm2484_vm11, %v2461_v17  ;;  %v2392_v45 = vsel %vm2377_vm8, %v2359_v36, %v6645_v29  ;;  %v2333_v56 = vsel %vm2311_vm6, %v2300_v57, %v6663_v6  ;;  %s4943_s29 = smov 80   ;;  %v4717_v29 = vpack.i.bf16 %v3376_v9, %v6756_v35  ;;  %v922_v57 = vld [vmem:[#allocation2 + $0x167] sm:$0xff] }
 0x381   : > { %4723 = vrot.lane.b32.xlu1 %v4722_v28, %s4940_s22  ;;  %v2366_v46 = vsel %vm2344_vm7, %v2333_v56, %v6659_v43  ;;  %v4732_v43 = vpack.i.bf16 %v6766_v11, %v3376_v9  ;;  %v4747_v12 = vpack.i.bf16 %v6779_v8, %v6748_v13  ;;  %v6813_v9 = vpop.f32.mrf.mxu3 }
 0x382   : > { %v1642_v55 = vpop.permute.xlu2 %1641  ;;  %1795 = vrot.lane.b32.xlu0 %v6620_v39, %s4937_s8  ;;  %v1188_v39 = vld [vmem:[#allocation2 + $0x231] sm:$0xff]  ;;  %s4944_s8 = smov 48   ;;  %v2399_v33 = vsel %vm2377_vm8, %v2366_v46, %v6672_v2  ;;  %v2231_v2 = vsel %vm820_vm1, %v4842_v22, %v7493_v37 }
 0x383   : > { %v6726_v24 = vpop.permute.xlu1 %1661  ;;  %v2264_v52 = vsel %vm2245_vm4, %v2231_v2, %v7494_v41  ;;  %v3725_v2 = vld [vmem:[%s7391_s3 + $0x78] sm:$0xff] }
 0x384   : > { %v2018_v4 = vpop.permute.xlu0 %2017  ;;  %3756 = vmatpush.msrb.mxu1 %v3725_v2 }
 0x385   : > { %v2425_v61 = vsel %vm2410_vm9, %v2392_v45, %v2018_v4 }
 0x388   : > { %4713 = vrot.lane.b32.xlu2 %v4712_v25, %s4941_s20 }
 0x389   : > { %4738 = vrot.lane.b32.xlu1 %v4737_v59, %s4942_s23  ;;  %v2674_v41 = vpop.f32.mrf.mxu3 }
 0x38a   : > { %v1770_v63 = vpop.permute.xlu2 %1769  ;;  %2179 = vrot.lane.b32.xlu0 %v1188_v39, %s4938_s9  ;;  %s4945_s9 = smov 96  }
 0x38b   : > { %v1790_v31 = vpop.permute.xlu1 %1789 }
 0x38c   : > { %v2146_v30 = vpop.permute.xlu0 %2145 }
 0x38d   : > { %v2458_v0 = vsel %vm2443_vm10, %v2425_v61, %v2146_v30  ;;  %v7498_v30 = vld [vmem:[#allocation50_spill] sm:$0xff] }
 0x38e   : > { %4506 = vmatmul.msk.f32.gmra.mxu0 %vm2484_vm11, %v2458_v0 }
 0x390   : > { %4728 = vrot.lane.b32.xlu2 %v4727_v51, %s4943_s29  ;;  %v4844_v51 = vld [vmem:[#allocation2 + $0x1cf] sm:$0xff] }
 0x392   : > { %v1898_v54 = vpop.permute.xlu2 %1897  ;;  %4718 = vrot.lane.b32.xlu0 %v4717_v29, %s4944_s8  ;;  %v7499_v29 = vld [vmem:[#allocation23_spill] sm:$0xff] }
 0x393   : > { %v1522_v16 = vpop.permute.xlu1 %1521  ;;  %v2242_v46 = vsel %vm820_vm1, %v4844_v51, %v7499_v29  ;;  %v3718_v29 = vld [vmem:[%s7391_s3 + $0x40] sm:$0xff] }
 0x394   : > { %v2032_v6 = vpop.permute.xlu0 %2031 }
 0x395   : > { %v2432_v23 = vsel %vm2410_vm9, %v2399_v33, %v2032_v6 }
 0x396   : > { %v2465_v26 = vsel %vm2443_vm10, %v2432_v23, %v6708_v15 }
 0x397   : > { %4513 = vmatmul.msk.f32.gmra.mxu2 %vm2484_vm11, %v2465_v26 }
 0x398   : > { %4743 = vrot.lane.b32.xlu2 %v4737_v59, %s4939_s21 }
 0x39a   : > { %v2026_v58 = vpop.permute.xlu2 %2025  ;;  %4733 = vrot.lane.b32.xlu0 %v4732_v43, %s4945_s9 }
 0x39b   : > { %v1650_v18 = vpop.permute.xlu1 %1649 }
 0x39c   : > { %v1514_v27 = vpop.permute.xlu0 %1513 }
 0x39d   : > { %v2297_v15 = vsel %vm2278_vm5, %v2264_v52, %v1514_v27 }
 0x39e   : > { %v2330_v47 = vsel %vm2311_vm6, %v2297_v15, %v1642_v55  ;;  %v4843_v55 = vld [vmem:[#allocation2 + $0x1c7] sm:$0xff] }
 0x39f   : > { %v2363_v10 = vsel %vm2344_vm7, %v2330_v47, %v1770_v63  ;;  %v2241_v40 = vsel %vm820_vm1, %v4843_v55, %v7495_v5 }
 0x3a0   : > { %v2396_v3 = vsel %vm2377_vm8, %v2363_v10, %v1898_v54  ;;  %v2274_v21 = vsel %vm2245_vm4, %v2241_v40, %v7496_v20  ;;  %v3724_v10 = vld [vmem:[%s7391_s3 + $0x70] sm:$0xff] }
 0x3a1   : > { %v2429_v1 = vsel %vm2410_vm9, %v2396_v3, %v2026_v58  ;;  %v2307_v44 = vsel %vm2278_vm5, %v2274_v21, %v6688_v32  ;;  %v3727_v32 = vld [vmem:[%s7391_s3 + $0x88] sm:$0xff]  ;;  %3757 = vmatpush.msrb.mxu1 %v3724_v10 }
 0x3a2   : > { %v2154_v42 = vpop.permute.xlu2 %2153  ;;  %4748 = vrot.lane.b32.xlu0 %v4747_v12, %s4941_s20  ;;  %v2340_v4 = vsel %vm2311_vm6, %v2307_v44, %v6726_v24  ;;  %v3726_v24 = vld [vmem:[%s7391_s3 + $0x80] sm:$0xff]  ;;  %3811 = vmatpush.msrb.mxu2 %v3727_v32  ;;  %v3723_v3 = vld [vmem:[%s7391_s3 + $0x68] sm:$0xff] }
 0x3a3   : > { %v1778_v28 = vpop.permute.xlu1 %1777  ;;  %v2462_v17 = vsel %vm2443_vm10, %v2429_v1, %v2154_v42  ;;  %v2373_v19 = vsel %vm2344_vm7, %v2340_v4, %v1790_v31  ;;  %v7497_v31 = vld [vmem:[#allocation21_spill] sm:$0xff]  ;;  %3758 = vmatpush.msrb.mxu1 %v3723_v3  ;;  %v6858_v44 = vld [vmem:[%s7390_s2] ss:$0 sm:$0xff] }
 0x3a4   : > { %v1918_v49 = vpop.permute.xlu0 %1917  ;;  %4510 = vmatmul.msk.f32.gmra.mxu1 %vm2484_vm11, %v2462_v17  ;;  %3812 = vmatpush.msrb.mxu2 %v3726_v24  ;;  %v2235_v61 = vsel %vm820_vm1, %v922_v57, %v7497_v31  ;;  %v3722_v42 = vld [vmem:[%s7391_s3 + $0x60] sm:$0xff]  ;;  %v3720_v57 = vld [vmem:[%s7391_s3 + $0x50] sm:$0xff] }
 0x3a5   : > { %v2406_v25 = vsel %vm2377_vm8, %v2373_v19, %v1918_v49  ;;  %v2268_v0 = vsel %vm2245_vm4, %v2235_v61, %v7498_v30  ;;  %3759 = vmatpush.msrb.mxu1 %v3722_v42  ;;  %v4845_v49 = vld [vmem:[#allocation2 + $0x1e7] sm:$0xff]  ;;  %v7503_v61 = vld [vmem:[#allocation28_spill] sm:$0xff] }
 0x3a6   : > { %v2301_v56 = vsel %vm2278_vm5, %v2268_v0, %v1522_v16  ;;  %v3719_v0 = vld [vmem:[%s7391_s3 + $0x48] sm:$0xff]  ;;  %v3713_v42 = vld [vmem:[%s7391_s3 + $0x18] sm:$0xff] }
 0x3a7   : > { %v2334_v54 = vsel %vm2311_vm6, %v2301_v56, %v1650_v18 }
 0x3a8   : > { %v2367_v6 = vsel %vm2344_vm7, %v2334_v54, %v1778_v28  ;;  %v6845_v28 = vpop.f32.mrf.mxu3 }
 0x3aa   : > { %v1664_v53 = vpop.permute.xlu2 %1663 }
 0x3ab   : > { %v1906_v34 = vpop.permute.xlu1 %1905 }
 0x3ac   : > { %v2046_v7 = vpop.permute.xlu0 %2045  ;;  %v2400_v23 = vsel %vm2377_vm8, %v2367_v6, %v1906_v34  ;;  %v3717_v6 = vld [vmem:[%s7391_s3 + $0x38] sm:$0xff] }
 0x3ad   : > { %v2439_v39 = vsel %vm2410_vm9, %v2406_v25, %v2046_v7 }
 0x3b2   : > { %v1920_v62 = vpop.permute.xlu2 %1919 }
 0x3b3   : > { %v2034_v59 = vpop.permute.xlu1 %2033 }
 0x3b4   : > { %v2174_v36 = vpop.permute.xlu0 %2173  ;;  %v2433_v43 = vsel %vm2410_vm9, %v2400_v23, %v2034_v59 }
 0x3b5   : > { %v2472_v14 = vsel %vm2443_vm10, %v2439_v39, %v2174_v36  ;;  %v2675_v39 = vadd.f32 %v6858_v44, %v2674_v41 }
 0x3b6   : > { %4520 = vmatmul.msk.f32.gmra.mxu3 %vm2484_vm11, %v2472_v14 }
 0x3b7   : > { %v2722_v24 = vmax.f32 %v2675_v39, 0.0 }
 0x3ba   : > { %v1410_v58 = vpop.permute.xlu2 %1409  ;;  %v2680_v40 = vpop.f32.mrf.mxu3 }
 0x3bb   : > { %v1792_v50 = vpop.permute.xlu1 %1791  ;;  %v2681_v4 = vadd.f32 %v6858_v44, %v2680_v40 }
 0x3bc   : > { %v1408_v60 = vpop.permute.xlu0 %1407 }
 0x3bd   : > { %v2275_v33 = vsel %vm2245_vm4, %v2242_v46, %v1408_v60 }
 0x3c2   : > { %v1794_v12 = vpop.permute.xlu2 %1793 }
 0x3c3   : > { %v2176_v45 = vpop.permute.xlu1 %2175 }
 0x3c4   : > { %v1536_v63 = vpop.permute.xlu0 %1535 }
 0x3c5   : > { %v2308_v26 = vsel %vm2278_vm5, %v2275_v33, %v1536_v63  ;;  %v3721_v63 = vld [vmem:[%s7391_s3 + $0x58] sm:$0xff]  ;;  %v6894_v33 = vpop.f32.mrf.mxu0 }
 0x3c6   : > { %v2341_v37 = vsel %vm2311_vm6, %v2308_v26, %v1664_v53  ;;  %v2724_v53 = vmax.f32 %v2681_v4, 0.0  ;;  %3760 = vmatpush.msrb.mxu1 %v3721_v63  ;;  %v3711_v63 = vld [vmem:[%s7391_s3 + $0x8] sm:$0xff] }
 0x3c7   : > { %v2374_v52 = vsel %vm2344_vm7, %v2341_v37, %v1792_v50 }
 0x3c8   : > { %v2407_v15 = vsel %vm2377_vm8, %v2374_v52, %v1920_v62  ;;  %v6869_v60 = vmax.f32 %v2722_v24, %v2724_v53  ;;  %3761 = vmatpush.msrb.mxu1 %v3720_v57 }
 0x3ca   : > { %v2178_v20 = vpop.permute.xlu2 %2177  ;;  %v2798_v56 = vrot.slane %v6869_v60, 2  ;;  %3762 = vmatpush.msrb.mxu1 %v3719_v0  ;;  %v2799_v46 = vrot.slane %v6869_v60, 4 }
 0x3cb   : > { %v1666_v18 = vpop.permute.xlu1 %1665 }
 0x3cc   : > { %v2162_v22 = vpop.permute.xlu0 %2161  ;;  %v4573_v23 = vrot.slane %v2798_v56, 9  ;;  %3763 = vmatpush.msrb.mxu1 %v3718_v29  ;;  %v4574_v37 = vrot.slane %v2799_v46, 9 }
 0x3cd   : > { %v2466_v16 = vsel %vm2443_vm10, %v2433_v43, %v2162_v22  ;;  %v4572_v22 = vrot.slane %v6869_v60, 9 }
 0x3ce   : > { %4514 = vmatmul.msk.f32.gmra.mxu2 %vm2484_vm11, %v2466_v16  ;;  %3764 = vmatpush.msrb.mxu1 %v3717_v6  ;;  %v3099_v41 = vmax.f32 %v2798_v56, %v4573_v23  ;;  %v3100_v3 = vmax.f32 %v2799_v46, %v4574_v37 }
 0x3cf   : > { %v3098_v10 = vmax.f32 %v6869_v60, %v4572_v22 }
 0x3d0   : > { %v3257_v4 = vperm.slane %v3100_v3, 0 }
 0x3d1   : > { %v3255_v40 = vperm.slane %v3098_v10, 0 }
 0x3d2   : > { %v1668_v50 = vpop.permute.xlu2 %1667 }
 0x3d3   : > { %v2050_v17 = vpop.permute.xlu1 %2049 }
 0x3d4   : > { %v2048_v27 = vpop.permute.xlu0 %2047 }
 0x3d5   : > { %v2440_v47 = vsel %vm2410_vm9, %v2407_v15, %v2048_v27  ;;  %v2800_v27 = vrot.slane %v6869_v60, 6  ;;  %v3714_v15 = vld [vmem:[%s7391_s3 + $0x20] sm:$0xff] }
 0x3d6   : > { %4588 = vmatmul.msk.f32.vlgmr.msrb.gmra.mxu2 %vm7500_vm12, %v6748_v13  ;;  %v2473_v1 = vsel %vm2443_vm10, %v2440_v47, %v2176_v45  ;;  %v7501_v13 = vld [vmem:[#allocation32_spill] sm:$0xff]  ;;  %vm3656_vm12 = vcmask 261120   ;;  %v2678_v47 = vadd.f32 %v6858_v44, %v6845_v28 }
 0x3d7   : > { %4521 = vmatmul.msk.f32.gmra.mxu3 %vm2484_vm11, %v2473_v1  ;;  %v2243_v34 = vsel %vm820_vm1, %v4845_v49, %v7501_v13  ;;  %3942 = vst.msk [vmem:[#allocation4] sm:$0xff] %vm3656_vm12, %v7456_v48  ;;  %v931_v45 = vld [vmem:[#allocation2 + $0x1ef] sm:$0xff]  ;;  %v2641_v49 = vpop.f32.mrf.mxu0 }
 0x3d8   : > { %v2276_v55 = vsel %vm2245_vm4, %v2243_v34, %v1410_v58  ;;  %3946 = vst.msk [vmem:[#allocation4 + $0x50] sm:$0xff] %vm3656_vm12, %v7456_v48  ;;  %v2244_v30 = vsel %vm820_vm1, %v931_v45, %v7503_v61  ;;  %v3716_v58 = vld [vmem:[%s7391_s3 + $0x30] sm:$0xff]  ;;  %v4575_v34 = vrot.slane %v2800_v27, 9  ;;  %vm7504_vm1 = vcmask 1041409  }
 0x3d9   : > { %3765 = vmatpush.msrb.mxu1 %v3716_v58 }
 0x3da   : > { %v2052_v26 = vpop.permute.xlu2 %2051 }
 0x3db   : > { %v1540_v19 = vpop.permute.xlu1 %1539 }
 0x3dc   : > { %v1538_v7 = vpop.permute.xlu0 %1537 }
 0x3dd   : > { %v2309_v5 = vsel %vm2278_vm5, %v2276_v55, %v1538_v7  ;;  %v2723_v55 = vmax.f32 %v2678_v47, 0.0 }
 0x3de   : > { %4589 = vmatmul.msk.f32.gmra.mxu2 %vm7502_vm14, %v6779_v8  ;;  %v2342_v21 = vsel %vm2311_vm6, %v2309_v5, %v1666_v18  ;;  %v3715_v18 = vld [vmem:[%s7391_s3 + $0x28] sm:$0xff]  ;;  %v2647_v5 = vpop.f32.mrf.mxu1 }
 0x3df   : > { %v2375_v59 = vsel %vm2344_vm7, %v2342_v21, %v1794_v12  ;;  %3766 = vmatpush.msrb.mxu1 %v3715_v18 }
 0x3e1   : > { %3767 = vmatpush.msrb.mxu1 %v3714_v15 }
 0x3e3   : > { %v1924_v31 = vpop.permute.xlu1 %1923  ;;  %3768 = vmatpush.msrb.mxu1 %v3713_v42 }
 0x3e4   : > { %v1922_v25 = vpop.permute.xlu0 %1921 }
 0x3e5   : > { %v2408_v36 = vsel %vm2377_vm8, %v2375_v59, %v1922_v25  ;;  %v4714_v25 = vpop.permute.xlu2 %4713 }
 0x3e6   : > { %v2441_v14 = vsel %vm2410_vm9, %v2408_v36, %v2050_v17  ;;  %v3256_v17 = vperm.slane %v3099_v41, 0  ;;  %v2648_v36 = vadd.f32 %v6858_v44, %v2647_v5  ;;  %v4715_v15 = vunpack.i.l.bf16 %v4714_v25 }
 0x3e7   : > { %v2474_v32 = vsel %vm2443_vm10, %v2441_v14, %v2178_v20  ;;  %v3101_v14 = vmax.f32 %v2800_v27, %v4575_v34  ;;  %v4716_v42 = vunpack.i.h.bf16 %v4714_v25 }
 0x3e8   : > { %4522 = vmatmul.msk.f32.gmra.mxu3 %vm2484_vm11, %v2474_v32  ;;  %v3320_v59 = vsel %vm7504_vm1, %v3256_v17, %v3255_v40  ;;  %v2713_v29 = vmax.f32 %v2648_v36, 0.0 }
 0x3e9   : > { %v3258_v46 = vperm.slane %v3101_v14, 0 }
 0x3eb   : > { %v6905_v52 = vpop.permute.xlu1 %4708 }
 0x3ec   : > { %v1412_v62 = vpop.permute.xlu0 %1411  ;;  %v4711_v6 = vunpack.i.h.bf16 %v6905_v52 }
 0x3ed   : > { %v2277_v51 = vsel %vm2245_vm4, %v2244_v30, %v1412_v62  ;;  %v3712_v62 = vld [vmem:[%s7391_s3 + $0x10] sm:$0xff]  ;;  %vm7505_vm4 = vcmask 1042434   ;;  %v4729_v47 = vpop.permute.xlu2 %4728 }
 0x3ee   : > { %v2310_v54 = vsel %vm2278_vm5, %v2277_v51, %v1540_v19  ;;  %v2642_v19 = vadd.f32 %v6858_v44, %v2641_v49  ;;  %v3321_v57 = vsel %vm7505_vm4, %v3257_v4, %v3320_v59  ;;  %3769 = vmatpush.msrb.mxu1 %v3712_v62  ;;  %v3710_v51 = vld [vmem:[%s7391_s3] sm:$0xff]  ;;  %vm7506_vm5 = vmmov %vm7502_vm14  ;;  %v4730_v34 = vunpack.i.l.bf16 %v4729_v47  ;;  %v2650_v59 = vpop.f32.mrf.mxu1 }
 0x3ef   : > { %v2343_v16 = vsel %vm2311_vm6, %v2310_v54, %v1668_v50  ;;  %v3351_v54 = vld [vmem:[#allocation3 + $0x7] sm:$0xff]  ;;  %v3322_v37 = vsel %vm3275_vm15, %v3258_v46, %v3321_v57  ;;  %vm7507_vm6 = vmmov %vm7506_vm5  ;;  %vm3701_vm14 = vcmask 916480  }
 0x3f0   : > { %v2711_v45 = vmax.f32 %v2642_v19, 0.0  ;;  %3770 = vmatpush.msrb.mxu1 %v3711_v63  ;;  %v3649_v10 = vsel %vm7507_vm6, %v6756_v35, %v4711_v6  ;;  %vm7509_vm6 = vmmov %vm7506_vm5 }
 0x3f1   : > { %v3658_v5 = vsel %vm3656_vm12, %v3649_v10, %v4716_v42 }
 0x3f2   : > { %3771 = vmatpush.msrb.mxu1 %v3710_v51 }
 0x3f3   : > { %v6925_v53 = vpop.permute.xlu1 %4723 }
 0x3f4   : > { %v1796_v43 = vpop.permute.xlu0 %1795  ;;  %v4725_v17 = vunpack.i.l.bf16 %v6925_v53 }
 0x3f5   : > { %v2376_v2 = vsel %vm2344_vm7, %v2343_v16, %v1796_v43  ;;  %v2639_v16 = vadd.f32 %v6858_v44, %v6894_v33  ;;  %vm3665_vm7 = vcmask 392192  }
 0x3f6   : > { %v2409_v12 = vsel %vm2377_vm8, %v2376_v2, %v1924_v31  ;;  %v4710_v31 = vunpack.i.l.bf16 %v6905_v52  ;;  %v6942_v2 = vmax.f32 %v2711_v45, %v2713_v29  ;;  %vm3674_vm8 = vcmask 523264  }
 0x3f7   : > { %v2442_v28 = vsel %vm2410_vm9, %v2409_v12, %v2052_v26  ;;  %vm3683_vm9 = vcmask 654336   ;;  %v2710_v4 = vmax.f32 %v2639_v16, 0.0 }
 0x3f8   : > { %v3648_v18 = vsel %vm7506_vm5, %v3351_v54, %v4710_v31  ;;  %v2784_v57 = vrot.slane %v6942_v2, 4  ;;  %v2785_v45 = vrot.slane %v6942_v2, 6  ;;  %v4731_v31 = vunpack.i.h.bf16 %v4729_v47  ;;  %v2659_v47 = vpop.f32.mrf.mxu2 }
 0x3f9   : > { %v4552_v51 = vrot.slane %v6942_v2, 9 }
 0x3fa   : > { %v2683_v1 = vpop.f32.mrf.mxu3 }
 0x3fb   : > { %v2684_v13 = vadd.f32 %v6858_v44, %v2683_v1 }
 0x3fc   : > { %v2180_v7 = vpop.permute.xlu0 %2179 }
 0x3fd   : > { %v2725_v20 = vmax.f32 %v2684_v13, 0.0  ;;  %v2475_v21 = vsel %vm2443_vm10, %v2442_v28, %v2180_v7  ;;  %v3657_v13 = vsel %vm3656_vm12, %v3648_v18, %v4715_v15  ;;  %v4739_v28 = vpop.permute.xlu1 %4738  ;;  %vm7508_vm10 = vmmov %vm7506_vm5 }
 0x3fe   : > { %4523 = vmatmul.msk.f32.gmra.mxu3 %vm2484_vm11, %v2475_v21  ;;  %vm3692_vm11 = vcmask 785408   ;;  %v4740_v36 = vunpack.i.l.bf16 %v4739_v28  ;;  %v4741_v16 = vunpack.i.h.bf16 %v4739_v28 }
 0x3ff   : > { %v2743_v39 = vmax.f32 %v2723_v55, %v2725_v20 }
 0x401   : > { %v2801_v32 = vrot.slane %v2743_v39, 2  ;;  %v2802_v24 = vrot.slane %v2743_v39, 4  ;;  %v2803_v50 = vrot.slane %v2743_v39, 6  ;;  %v4576_v60 = vrot.slane %v2743_v39, 9 }
 0x403   : > { %v4577_v61 = vrot.slane %v2801_v32, 9  ;;  %v4578_v30 = vrot.slane %v2802_v24, 9  ;;  %v4579_v0 = vrot.slane %v2803_v50, 9  ;;  %v3102_v56 = vmax.f32 %v2743_v39, %v4576_v60 }
 0x404   : > { %v4719_v23 = vpop.permute.xlu0 %4718  ;;  %v4726_v39 = vunpack.i.h.bf16 %v6925_v53 }
 0x405   : > { %v3103_v26 = vmax.f32 %v2801_v32, %v4577_v61  ;;  %v3104_v43 = vmax.f32 %v2802_v24, %v4578_v30  ;;  %v3105_v58 = vmax.f32 %v2803_v50, %v4579_v0  ;;  %v3259_v22 = vperm.slane %v3102_v56, 0 }
 0x406   : > { %v4721_v3 = vunpack.i.h.bf16 %v4719_v23  ;;  %v4720_v1 = vunpack.i.l.bf16 %v4719_v23  ;;  %v2783_v24 = vrot.slane %v6942_v2, 2 }
 0x407   : > { %v3260_v41 = vperm.slane %v3103_v26, 0  ;;  %v3261_v27 = vperm.slane %v3104_v43, 0  ;;  %v3323_v52 = vsel %vm3277_vm2, %v3259_v22, %v3322_v37  ;;  %v3262_v12 = vperm.slane %v3105_v58, 0  ;;  %v2653_v37 = vpop.f32.mrf.mxu1 }
 0x408   : > { %v3666_v35 = vsel %vm3665_vm7, %v3657_v13, %v4720_v1  ;;  %v3667_v19 = vsel %vm3665_vm7, %v3658_v5, %v4721_v3  ;;  %v4553_v29 = vrot.slane %v2783_v24, 9  ;;  %v4554_v43 = vrot.slane %v2784_v57, 9 }
 0x409   : > { %v3324_v33 = vsel %vm3279_vm3, %v3260_v41, %v3323_v52  ;;  %v3675_v21 = vsel %vm3674_vm8, %v3666_v35, %v4725_v17  ;;  %v3676_v63 = vsel %vm3674_vm8, %v3667_v19, %v4726_v39  ;;  %v4555_v58 = vrot.slane %v2785_v45, 9 }
 0x40a   : > { %v3325_v49 = vsel %vm3281_vm0, %v3261_v27, %v3324_v33  ;;  %v3684_v32 = vsel %vm3683_vm9, %v3675_v21, %v4730_v34  ;;  %v3685_v46 = vsel %vm3683_vm9, %v3676_v63, %v4731_v31  ;;  %v3078_v52 = vmax.f32 %v6942_v2, %v4552_v51 }
 0x40b   : > { %v3326_v7 = vsel %vm3283_vm13, %v3262_v12, %v3325_v49  ;;  %v2644_v55 = vpop.f32.mrf.mxu0  ;;  %v3079_v15 = vmax.f32 %v2783_v24, %v4553_v29  ;;  %v3080_v1 = vmax.f32 %v2784_v57, %v4554_v43  ;;  %v2654_v42 = vadd.f32 %v6858_v44, %v2653_v37 }
 0x40c   : > { %3349 = vst.msk [vmem:[#allocation3 + $0xb0] sm:$0xff] %vm7508_vm10, %v3326_v7  ;;  %v2645_v40 = vadd.f32 %v6858_v44, %v2644_v55  ;;  %v4734_v20 = vpop.permute.xlu0 %4733  ;;  %v3081_v17 = vmax.f32 %v2785_v45, %v4555_v58  ;;  %v2660_v34 = vadd.f32 %v6858_v44, %v2659_v47  ;;  %v3235_v7 = vperm.slane %v3078_v52, 0  ;;  %vm7510_vm10 = vmmov %vm7504_vm1 }
 0x40d   : > { %v4735_v25 = vunpack.i.l.bf16 %v4734_v20  ;;  %v4736_v61 = vunpack.i.h.bf16 %v4734_v20  ;;  %v3236_v28 = vperm.slane %v3079_v15, 0  ;;  %v3237_v55 = vperm.slane %v3080_v1, 0 }
 0x40e   : > { %v2712_v14 = vmax.f32 %v2645_v40, 0.0  ;;  %v2715_v5 = vmax.f32 %v2654_v42, 0.0  ;;  %v3238_v20 = vperm.slane %v3081_v17, 0 }
 0x40f   : > { %v3693_v50 = vsel %vm3692_vm11, %v3684_v32, %v4735_v25  ;;  %v3694_v22 = vsel %vm3692_vm11, %v3685_v46, %v4736_v61  ;;  %v2651_v25 = vadd.f32 %v6858_v44, %v2650_v59 }
 0x410   : > { %v2736_v60 = vmax.f32 %v2710_v4, %v2712_v14  ;;  %v3702_v62 = vsel %vm3701_vm14, %v3693_v50, %v4740_v36  ;;  %v3703_v3 = vsel %vm3701_vm14, %v3694_v22, %v4741_v16  ;;  %v2717_v4 = vmax.f32 %v2660_v34, 0.0 }
 0x411   : > { %3772 = vmatmul.f32.vlgmr.msrb.gmra.mxu1 %v3702_v62  ;;  %v2714_v24 = vmax.f32 %v2651_v25, 0.0 }
 0x412   : > { %v2780_v53 = vrot.slane %v2736_v60, 2  ;;  %v2781_v30 = vrot.slane %v2736_v60, 4  ;;  %v2782_v0 = vrot.slane %v2736_v60, 6  ;;  %v4548_v56 = vrot.slane %v2736_v60, 9 }
 0x413   : > { %v2739_v36 = vmax.f32 %v2715_v5, %v2717_v4 }
 0x414   : > { %v4549_v54 = vrot.slane %v2780_v53, 9  ;;  %v4550_v6 = vrot.slane %v2781_v30, 9  ;;  %v4551_v23 = vrot.slane %v2782_v0, 9  ;;  %v3074_v26 = vmax.f32 %v2736_v60, %v4548_v56 }
 0x415   : > { %v2789_v60 = vrot.slane %v2739_v36, 2  ;;  %v2790_v63 = vrot.slane %v2739_v36, 4  ;;  %v2791_v57 = vrot.slane %v2739_v36, 6 }
 0x416   : > { %v3075_v18 = vmax.f32 %v2780_v53, %v4549_v54  ;;  %v3076_v41 = vmax.f32 %v2781_v30, %v4550_v6  ;;  %v3077_v27 = vmax.f32 %v2782_v0, %v4551_v23  ;;  %v3231_v10 = vperm.slane %v3074_v26, 0 }
 0x417   : > { %v4560_v0 = vrot.slane %v2739_v36, 9  ;;  %v4561_v56 = vrot.slane %v2789_v60, 9  ;;  %v4562_v43 = vrot.slane %v2790_v63, 9  ;;  %v4563_v22 = vrot.slane %v2791_v57, 9 }
 0x418   : > { %v3232_v12 = vperm.slane %v3075_v18, 0  ;;  %v3233_v33 = vperm.slane %v3076_v41, 0  ;;  %v3234_v49 = vperm.slane %v3077_v27, 0 }
 0x419   : > { %3775 = vmatmul.f32.gmra.mxu1 %v3703_v3  ;;  %v3086_v41 = vmax.f32 %v2739_v36, %v4560_v0  ;;  %v3088_v15 = vmax.f32 %v2790_v63, %v4562_v43  ;;  %v3089_v47 = vmax.f32 %v2791_v57, %v4563_v22 }
 0x41a   : > { %v3299_v13 = vsel %vm7504_vm1, %v3232_v12, %v3231_v10  ;;  %vm7511_vm1 = vmmov %vm7505_vm4 }
 0x41b   : > { %v3300_v2 = vsel %vm7505_vm4, %v3233_v33, %v3299_v13  ;;  %v3243_v33 = vperm.slane %v3086_v41, 0  ;;  %v3245_v42 = vperm.slane %v3088_v15, 0  ;;  %vm7512_vm4 = vmmov %vm7506_vm5 }
 0x41c   : > { %v3301_v35 = vsel %vm3275_vm15, %v3234_v49, %v3300_v2  ;;  %v3246_v49 = vperm.slane %v3089_v47, 0  ;;  %v2662_v2 = vpop.f32.mrf.mxu2 }
 0x41d   : > { %v3302_v40 = vsel %vm3277_vm2, %v3235_v7, %v3301_v35  ;;  %v2663_v36 = vadd.f32 %v6858_v44, %v2662_v2 }
 0x41e   : > { %v3303_v21 = vsel %vm3279_vm3, %v3236_v28, %v3302_v40 }
 0x41f   : > { %v3304_v19 = vsel %vm3281_vm0, %v3237_v55, %v3303_v21 }
 0x420   : > { %v3305_v39 = vsel %vm3283_vm13, %v3238_v20, %v3304_v19  ;;  %v2672_v19 = vadd.f32 %v6858_v44, %v6813_v9 }
 0x421   : > { %3346 = vst.msk [vmem:[#allocation3 + $0x68] sm:$0xff] %vm7506_vm5, %v3305_v39  ;;  %v2656_v14 = vpop.f32.mrf.mxu1  ;;  %vm7513_vm5 = vmmov %vm7512_vm4 }
 0x422   : > { %v2657_v32 = vadd.f32 %v6858_v44, %v2656_v14  ;;  %v2721_v39 = vmax.f32 %v2672_v19, 0.0 }
 0x424   : > { %v2716_v50 = vmax.f32 %v2657_v32, 0.0  ;;  %v2665_v20 = vpop.f32.mrf.mxu2 }
 0x425   : > { %v2666_v4 = vadd.f32 %v6858_v44, %v2665_v20 }
 0x426   : > { %v2738_v62 = vmax.f32 %v2714_v24, %v2716_v50  ;;  %v2718_v50 = vmax.f32 %v2663_v36, 0.0 }
 0x427   : > { %v2719_v25 = vmax.f32 %v2666_v4, 0.0 }
 0x428   : > { %v2786_v45 = vrot.slane %v2738_v62, 2  ;;  %v2787_v31 = vrot.slane %v2738_v62, 4  ;;  %v2788_v61 = vrot.slane %v2738_v62, 6  ;;  %v4556_v53 = vrot.slane %v2738_v62, 9  ;;  %v3418_v30 = vld [vmem:[#allocation3 + $0x69] sm:$0xff] }
 0x429   : > { %v6984_v59 = vld [vmem:[#allocation3 + $0x67] sm:$0xff]  ;;  %4590 = vmatmul.msk.f32.gmra.mxu2 %vm7509_vm6, %v3418_v30  ;;  %v4762_v29 = vpack.i.bf16 %v3418_v30, %v6779_v8  ;;  %v2741_v14 = vmax.f32 %v2719_v25, %v2721_v39  ;;  %vm7514_vm6 = vmmov %vm7510_vm10 }
 0x42a   : > { %v4752_v51 = vpack.i.bf16 %v6984_v59, %v6766_v11  ;;  %v3386_v46 = vld [vmem:[#allocation3 + $0x68] sm:$0xff]  ;;  %v4557_v54 = vrot.slane %v2786_v45, 9  ;;  %v4558_v6 = vrot.slane %v2787_v31, 9  ;;  %v4559_v23 = vrot.slane %v2788_v61, 9 }
 0x42b   : > { %v3082_v26 = vmax.f32 %v2738_v62, %v4556_v53  ;;  %4763 = vrot.lane.b32.xlu0 %v4762_v29, %s4943_s29  ;;  %v4757_v58 = vpack.i.bf16 %v3386_v46, %v6730_v38  ;;  %v3087_v11 = vmax.f32 %v2789_v60, %v4561_v56  ;;  %v2795_v62 = vrot.slane %v2741_v14, 2 }
 0x42c   : > { %4753 = vrot.lane.b32.xlu1 %v4752_v51, %s4944_s8  ;;  %v3083_v16 = vmax.f32 %v2786_v45, %v4557_v54  ;;  %v3084_v37 = vmax.f32 %v2787_v31, %v4558_v6  ;;  %v3085_v18 = vmax.f32 %v2788_v61, %v4559_v23  ;;  %v2796_v57 = vrot.slane %v2741_v14, 4 }
 0x42d   : > { %4758 = vrot.lane.b32.xlu2 %v4757_v58, %s4940_s22  ;;  %v3239_v8 = vperm.slane %v3082_v26, 0  ;;  %v3244_v38 = vperm.slane %v3087_v11, 0  ;;  %v2797_v45 = vrot.slane %v2741_v14, 6  ;;  %v4568_v0 = vrot.slane %v2741_v14, 9 }
 0x42e   : > { %v3240_v27 = vperm.slane %v3083_v16, 0  ;;  %v3241_v52 = vperm.slane %v3084_v37, 0  ;;  %v3242_v10 = vperm.slane %v3085_v18, 0  ;;  %v4569_v9 = vrot.slane %v2795_v62, 9 }
 0x42f   : > { %v4570_v54 = vrot.slane %v2796_v57, 9  ;;  %v4571_v23 = vrot.slane %v2797_v45, 9  ;;  %v3094_v22 = vmax.f32 %v2741_v14, %v4568_v0  ;;  %v3421_v14 = vld [vmem:[#allocation3 + $0xb1] sm:$0xff] }
 0x430   : > { %v3306_v12 = vsel %vm7510_vm10, %v3240_v27, %v3239_v8  ;;  %v3095_v16 = vmax.f32 %v2795_v62, %v4569_v9  ;;  %vm7515_vm10 = vmmov %vm7511_vm1 }
 0x431   : > { %v3307_v3 = vsel %vm7511_vm1, %v3241_v52, %v3306_v12  ;;  %v3096_v11 = vmax.f32 %v2796_v57, %v4570_v54  ;;  %v3097_v8 = vmax.f32 %v2797_v45, %v4571_v23  ;;  %v3251_v15 = vperm.slane %v3094_v22, 0  ;;  %vm7516_vm1 = vmmov %vm7512_vm4 }
 0x432   : > { %v3308_v1 = vsel %vm3275_vm15, %v3242_v10, %v3307_v3  ;;  %v3252_v10 = vperm.slane %v3095_v16, 0 }
 0x433   : > { %v3309_v17 = vsel %vm3277_vm2, %v3243_v33, %v3308_v1  ;;  %v3253_v33 = vperm.slane %v3096_v11, 0  ;;  %v3254_v1 = vperm.slane %v3097_v8, 0 }
 0x434   : > { %v3310_v13 = vsel %vm3279_vm3, %v3244_v38, %v3309_v17 }
 0x435   : > { %v3311_v34 = vsel %vm3281_vm0, %v3245_v42, %v3310_v13 }
 0x436   : > { %v3312_v7 = vsel %vm3283_vm13, %v3246_v49, %v3311_v34 }
 0x437   : > { %3347 = vst.msk [vmem:[#allocation3 + $0x80] sm:$0xff] %vm7512_vm4, %v3312_v7  ;;  %vm7517_vm4 = vmmov %vm7516_vm1 }
 0x439   : > { %v2686_v6 = vpop.f32.mrf.mxu3 }
 0x43a   : > { %v2687_v34 = vadd.f32 %v6858_v44, %v2686_v6 }
 0x43c   : > { %v2726_v25 = vmax.f32 %v2687_v34, 0.0 }
 0x43e   : > { %v7002_v28 = vld [vmem:[#allocation3 + $0x81] sm:$0xff] }
 0x43f   : > { %v7004_v35 = vld [vmem:[#allocation3 + $0x7f] sm:$0xff]  ;;  %4591 = vmatmul.msk.f32.gmra.mxu2 %vm7513_vm5, %v7002_v28  ;;  %v4782_v21 = vpack.i.bf16 %v7002_v28, %v3418_v30  ;;  %vm7518_vm5 = vmmov %vm7516_vm1 }
 0x440   : > { %v7006_v55 = vld [vmem:[#allocation3 + $0x80] sm:$0xff]  ;;  %v4767_v5 = vpack.i.bf16 %v7004_v35, %v6984_v59 }
 0x441   : > { %v4777_v40 = vpack.i.bf16 %v7006_v55, %v3386_v46 }
 0x442   : > { %4768 = vrot.lane.b32.xlu1 %v4767_v5, %s4945_s9 }
 0x443   : > { %4778 = vrot.lane.b32.xlu0 %v4777_v40, %s4939_s21  ;;  %4773 = vrot.lane.b32.xlu2 %v4777_v40, %s4942_s23 }
 0x44a   : > { %4783 = vrot.lane.b32.xlu1 %v4782_v21, %s4941_s20 }
 0x451   : > { %v2668_v32 = vpop.f32.mrf.mxu2 }
 0x452   : > { %v2669_v24 = vadd.f32 %v6858_v44, %v2668_v32  ;;  %v7043_v32 = vld [vmem:[#allocation3 + $0xb0] sm:$0xff] }
 0x454   : > { %v2720_v60 = vmax.f32 %v2669_v24, 0.0 }
 0x456   : > { %v2740_v63 = vmax.f32 %v2718_v50, %v2720_v60 }
 0x458   : > { %v2792_v31 = vrot.slane %v2740_v63, 2  ;;  %v2793_v61 = vrot.slane %v2740_v63, 4  ;;  %v2794_v53 = vrot.slane %v2740_v63, 6  ;;  %v4564_v30 = vrot.slane %v2740_v63, 9 }
 0x45a   : > { %v4565_v56 = vrot.slane %v2792_v31, 9  ;;  %v4566_v51 = vrot.slane %v2793_v61, 9  ;;  %v4567_v29 = vrot.slane %v2794_v53, 9  ;;  %v3090_v46 = vmax.f32 %v2740_v63, %v4564_v30  ;;  %v2689_v38 = vpop.f32.mrf.mxu3 }
 0x45c   : > { %v3091_v26 = vmax.f32 %v2792_v31, %v4565_v56  ;;  %v3092_v43 = vmax.f32 %v2793_v61, %v4566_v51  ;;  %v3093_v58 = vmax.f32 %v2794_v53, %v4567_v29  ;;  %v3247_v37 = vperm.slane %v3090_v46, 0 }
 0x45d   : > { %v2690_v31 = vadd.f32 %v6858_v44, %v2689_v38 }
 0x45e   : > { %v3248_v18 = vperm.slane %v3091_v26, 0  ;;  %v3249_v41 = vperm.slane %v3092_v43, 0  ;;  %v3250_v27 = vperm.slane %v3093_v58, 0 }
 0x45f   : > { %v2727_v29 = vmax.f32 %v2690_v31, 0.0 }
 0x460   : > { %v3313_v52 = vsel %vm7514_vm6, %v3248_v18, %v3247_v37 }
 0x461   : > { %v3314_v47 = vsel %vm7515_vm10, %v3249_v41, %v3313_v52 }
 0x462   : > { %v3315_v12 = vsel %vm3275_vm15, %v3250_v27, %v3314_v47 }
 0x463   : > { %v3316_v3 = vsel %vm3277_vm2, %v3251_v15, %v3315_v12 }
 0x464   : > { %v3317_v42 = vsel %vm3279_vm3, %v3252_v10, %v3316_v3 }
 0x465   : > { %v3318_v17 = vsel %vm3281_vm0, %v3253_v33, %v3317_v42  ;;  %v3814_v33 = vpop.f32.mrf.mxu2 }
 0x466   : > { %v3319_v49 = vsel %vm3283_vm13, %v3254_v1, %v3318_v17  ;;  %v7067_v17 = vld [vmem:[%s7392_s4] ss:$0 sm:$0xff] }
 0x467   : > { %3348 = vst.msk [vmem:[#allocation3 + $0x98] sm:$0xff] %vm7516_vm1, %v3319_v49  ;;  %vm3948_vm1 = vcmask 253952  }
 0x468   : > { %3956 = vst.msk [vmem:[#allocation4 + $0x1c] sm:$0x1] %vm3948_vm1, %v7456_v48 }
 0x469   : > { %3949 = vst.msk [vmem:[#allocation4 + $0x7] sm:$0x1] %vm3948_vm1, %v7456_v48 }
 0x46a   : > { %3950 = vst.msk [vmem:[#allocation4 + $0x17] sm:$0x1] %vm3948_vm1, %v7456_v48 }
 0x46b   : > { %v2692_v13 = vpop.f32.mrf.mxu3  ;;  %3951 = vst.msk [vmem:[#allocation4 + $0x27] sm:$0x1] %vm3948_vm1, %v7456_v48 }
 0x46c   : > { %v2693_v7 = vadd.f32 %v6858_v44, %v2692_v13  ;;  %3952 = vst.msk [vmem:[#allocation4 + $0x37] sm:$0x1] %vm3948_vm1, %v7456_v48 }
 0x46d   : > { %3953 = vst.msk [vmem:[#allocation4 + $0x47] sm:$0x1] %vm3948_vm1, %v7456_v48 }
 0x46e   : > { %v2728_v2 = vmax.f32 %v2693_v7, 0.0  ;;  %v3420_v5 = vld [vmem:[#allocation3 + $0x99] sm:$0xff]  ;;  %3954 = vst.msk [vmem:[#allocation4 + $0x57] sm:$0x1] %vm3948_vm1, %v7456_v48 }
 0x46f   : > { %v3388_v40 = vld [vmem:[#allocation3 + $0x98] sm:$0xff]  ;;  %4592 = vmatmul.msk.f32.gmra.mxu2 %vm7517_vm4, %v3420_v5  ;;  %v4797_v21 = vpack.i.bf16 %v3420_v5, %v7002_v28  ;;  %v4817_v53 = vpack.i.bf16 %v3421_v14, %v3420_v5  ;;  %3957 = vst.msk [vmem:[#allocation4 + $0x2c] sm:$0x1] %vm3948_vm1, %v7456_v48 }
 0x470   : > { %v7033_v20 = vld [vmem:[#allocation3 + $0x97] sm:$0xff]  ;;  %v4792_v4 = vpack.i.bf16 %v3388_v40, %v7006_v55  ;;  %v2744_v39 = vmax.f32 %v2726_v25, %v2728_v2  ;;  %v4812_v28 = vpack.i.bf16 %v7043_v32, %v3388_v40  ;;  %v7047_v55 = vld [vmem:[#allocation3 + $0xaf] sm:$0xff]  ;;  %3958 = vst.msk [vmem:[#allocation4 + $0x3c] sm:$0x1] %vm3948_vm1, %v7456_v48 }
 0x471   : > { %v4787_v19 = vpack.i.bf16 %v7033_v20, %v7004_v35  ;;  %4798 = vrot.lane.b32.xlu1 %v4797_v21, %s4943_s29  ;;  %v4802_v24 = vpack.i.bf16 %v7047_v55, %v7033_v20  ;;  %3959 = vst.msk [vmem:[#allocation4 + $0x4c] sm:$0x1] %vm3948_vm1, %v7456_v48 }
 0x472   : > { %4793 = vrot.lane.b32.xlu0 %v4792_v4, %s4940_s22  ;;  %v2804_v36 = vrot.slane %v2744_v39, 2  ;;  %v2805_v50 = vrot.slane %v2744_v39, 4  ;;  %v4580_v62 = vrot.slane %v2744_v39, 9  ;;  %v2806_v45 = vrot.slane %v2744_v39, 6  ;;  %v3817_v4 = vpop.f32.mrf.mxu2 }
 0x473   : > { %4788 = vrot.lane.b32.xlu2 %v4787_v19, %s4944_s8 }
 0x474   : > { %v4581_v60 = vrot.slane %v2804_v36, 9  ;;  %v4582_v63 = vrot.slane %v2805_v50, 9  ;;  %v3106_v61 = vmax.f32 %v2744_v39, %v4580_v62  ;;  %v4583_v51 = vrot.slane %v2806_v45, 9 }
 0x476   : > { %v3107_v57 = vmax.f32 %v2804_v36, %v4581_v60  ;;  %v3108_v30 = vmax.f32 %v2805_v50, %v4582_v63  ;;  %v3263_v46 = vperm.slane %v3106_v61, 0  ;;  %v3109_v43 = vmax.f32 %v2806_v45, %v4583_v51 }
 0x477   : > { %4593 = vmatmul.msk.f32.gmra.mxu2 %vm7518_vm5, %v3421_v14  ;;  %vm4010_vm5 = vcmask 257024  }
 0x478   : > { %v3264_v9 = vperm.slane %v3107_v57, 0  ;;  %v3265_v6 = vperm.slane %v3108_v30, 0  ;;  %v3266_v27 = vperm.slane %v3109_v43, 0 }
 0x479   : > { %4813 = vrot.lane.b32.xlu1 %v4812_v28, %s4939_s21  ;;  %s269_s21 = sand.u32 1, %s4903_s25  }
 0x47a   : > { %4808 = vrot.lane.b32.xlu0 %v4812_v28, %s4942_s23  ;;  %v3327_v23 = vsel %vm7514_vm6, %v3264_v9, %v3263_v46  ;;  %s4488_s19 = sshll.u32 %s269_s21, 1  ;;  %s4410_s15 = scalar_lea.sflag [#allocation6], %s269_s21 }
 0x47b   : > { %4803 = vrot.lane.b32.xlu2 %v4802_v24, %s4945_s9  ;;  %v3328_v18 = vsel %vm7515_vm10, %v3265_v6, %v3327_v23  ;;  %s271_s13 = scalar_lea.vmem [#allocation5], %s4488_s19 }
 0x47c   : > { %v3329_v12 = vsel %vm3275_vm15, %v3266_v27, %v3328_v18  ;;  %v3407_v18 = vld [vmem:[#allocation3 + $0xdf] sm:$0xff] }
 0x481   : > { %v2695_v0 = vpop.f32.mrf.mxu3 }
 0x482   : > { %v2696_v56 = vadd.f32 %v6858_v44, %v2695_v0  ;;  %v4744_v0 = vpop.permute.xlu2 %4743 }
 0x483   : > { %4818 = vrot.lane.b32.xlu2 %v4817_v53, %s4941_s20 }
 0x484   : > { %v2729_v54 = vmax.f32 %v2696_v56, 0.0 }
 0x486   : > { %v2745_v26 = vmax.f32 %v2727_v29, %v2729_v54  ;;  %v4749_v54 = vpop.permute.xlu0 %4748 }
 0x488   : > { %v2807_v58 = vrot.slane %v2745_v26, 2  ;;  %v2808_v22 = vrot.slane %v2745_v26, 4  ;;  %v2809_v16 = vrot.slane %v2745_v26, 6  ;;  %v4584_v37 = vrot.slane %v2745_v26, 9 }
 0x48a   : > { %v4585_v41 = vrot.slane %v2807_v58, 9  ;;  %v4586_v11 = vrot.slane %v2808_v22, 9  ;;  %v4587_v44 = vrot.slane %v2809_v16, 9  ;;  %v3110_v8 = vmax.f32 %v2745_v26, %v4584_v37  ;;  %v4759_v37 = vpop.permute.xlu2 %4758 }
 0x48b   : > { %3572 = vrot.lane.b32.xlu2 %v3421_v14, %s4943_s29 }
 0x48c   : > { %v3111_v52 = vmax.f32 %v2807_v58, %v4585_v41  ;;  %v3112_v15 = vmax.f32 %v2808_v22, %v4586_v11  ;;  %v3113_v47 = vmax.f32 %v2809_v16, %v4587_v44  ;;  %v3267_v10 = vperm.slane %v3110_v8, 0  ;;  %v3415_v41 = vld [vmem:[#allocation3 + $0xe0] sm:$0xff]  ;;  %v4847_v44 = vld [vmem:[#allocation3 + $0x37] sm:$0xff] }
 0x48d   : > { %v4745_v58 = vunpack.i.l.bf16 %v4744_v0  ;;  %v4750_v16 = vunpack.i.l.bf16 %v4749_v54 }
 0x48e   : > { %v3268_v3 = vperm.slane %v3111_v52, 0  ;;  %v3269_v38 = vperm.slane %v3112_v15, 0  ;;  %v3330_v1 = vsel %vm3277_vm2, %v3267_v10, %v3329_v12  ;;  %v3773_v42 = vpop.f32.mrf.mxu1  ;;  %v3270_v49 = vperm.slane %v3113_v47, 0  ;;  %vm7519_vm2 = vmmov %vm7517_vm4 }
 0x48f   : > { %v3774_v2 = vadd.f32 %v7067_v17, %v3773_v42  ;;  %vm7521_vm4 = vmmov %vm7514_vm6  ;;  %v4746_v52 = vunpack.i.h.bf16 %v4744_v0  ;;  %v4751_v47 = vunpack.i.h.bf16 %v4749_v54  ;;  %v4760_v10 = vunpack.i.l.bf16 %v4759_v37  ;;  %v4848_v42 = vld [vmem:[#allocation3 + $0x4f] sm:$0xff] }
 0x490   : > { %v3331_v13 = vsel %vm3279_vm3, %v3268_v3, %v3330_v1  ;;  %vm7522_vm6 = vmmov %vm7515_vm10 }
 0x491   : > { %v3332_v34 = vsel %vm3281_vm0, %v3269_v38, %v3331_v13  ;;  %v3815_v40 = vadd.f32 %v3814_v33, %v3774_v2  ;;  %vm7520_vm0 = vmmov %vm7519_vm2 }
 0x492   : > { %v3333_v7 = vsel %vm3283_vm13, %v3270_v49, %v3332_v34  ;;  %vm7523_vm10 = vmmov %vm7520_vm0 }
 0x493   : > { %3350 = vst.msk [vmem:[#allocation3 + $0xc8] sm:$0xff] %vm7519_vm2, %v3333_v7  ;;  %v3838_v14 = vmax.f32 %v3815_v40, 0.0  ;;  %v3650_v8 = vsel %vm7523_vm10, %v4847_v44, %v4745_v58  ;;  %vm7524_vm2 = vmmov %vm7520_vm0 }
 0x494   : > { %v3659_v27 = vsel %vm3656_vm12, %v3650_v8, %v4750_v16  ;;  %v3651_v49 = vsel %vm7524_vm2, %v4848_v42, %v4746_v52  ;;  %vm7527_vm10 = vmmov %vm7520_vm0 }
 0x495   : > { %v3660_v7 = vsel %vm3656_vm12, %v3651_v49, %v4751_v47  ;;  %vm7528_vm2 = vmmov %vm7520_vm0 }
 0x496   : > { %v3776_v5 = vpop.f32.mrf.mxu1 }
 0x497   : > { %v3777_v21 = vadd.f32 %v7067_v17, %v3776_v5 }
 0x499   : > { %v3818_v19 = vadd.f32 %v3817_v4, %v3777_v21  ;;  %v4761_v4 = vunpack.i.h.bf16 %v4759_v37 }
 0x49a   : > { %v3422_v25 = vld [vmem:[#allocation3 + $0xc9] sm:$0xff] }
 0x49b   : > { %v3390_v39 = vld [vmem:[#allocation3 + $0xc8] sm:$0xff]  ;;  %v3839_v28 = vmax.f32 %v3818_v19, 0.0  ;;  %4594 = vmatmul.msk.f32.gmra.mxu2 %vm7520_vm0, %v3422_v25  ;;  %3574 = vrot.lane.b32.xlu2 %v3422_v25, %s4943_s29 }
 0x49c   : > { %v3382_v36 = vld [vmem:[#allocation3 + $0xc7] sm:$0xff]  ;;  %v4827_v24 = vpack.i.bf16 %v3390_v39, %v7043_v32 }
 0x49d   : > { %v4822_v50 = vpack.i.bf16 %v3382_v36, %v7047_v55  ;;  %v3846_v60 = vmax.f32 %v3838_v14, %v3839_v28  ;;  %v4764_v12 = vpop.permute.xlu0 %4763  ;;  %v4774_v38 = vpop.permute.xlu2 %4773 }
 0x49e   : > { %4828 = vrot.lane.b32.xlu1 %v4827_v24, %s4940_s22  ;;  %v4754_v43 = vpop.permute.xlu1 %4753  ;;  %v4765_v13 = vunpack.i.l.bf16 %v4764_v12  ;;  %v4775_v5 = vunpack.i.l.bf16 %v4774_v38  ;;  %v4766_v14 = vunpack.i.h.bf16 %v4764_v12 }
 0x49f   : > { %4823 = vrot.lane.b32.xlu0 %v4822_v50, %s4944_s8  ;;  %v3854_v62 = vrot.slane %v3846_v60, 2  ;;  %v3855_v63 = vrot.slane %v3846_v60, 4  ;;  %v3856_v57 = vrot.slane %v3846_v60, 6  ;;  %v4596_v45 = vrot.slane %v3846_v60, 9 }
 0x4a0   : > { %v4755_v11 = vunpack.i.l.bf16 %v4754_v43  ;;  %v4756_v33 = vunpack.i.h.bf16 %v4754_v43  ;;  %v4776_v50 = vunpack.i.h.bf16 %v4774_v38 }
 0x4a1   : > { %v4597_v31 = vrot.slane %v3854_v62, 9  ;;  %v4598_v61 = vrot.slane %v3855_v63, 9  ;;  %v4599_v53 = vrot.slane %v3856_v57, 9  ;;  %v3926_v30 = vmax.f32 %v3846_v60, %v4596_v45 }
 0x4a2   : > { %v3668_v15 = vsel %vm3665_vm7, %v3659_v27, %v4755_v11  ;;  %v3669_v40 = vsel %vm3665_vm7, %v3660_v7, %v4756_v33 }
 0x4a3   : > { %v3927_v9 = vmax.f32 %v3854_v62, %v4597_v31  ;;  %v3928_v56 = vmax.f32 %v3855_v63, %v4598_v61  ;;  %v3929_v51 = vmax.f32 %v3856_v57, %v4599_v53  ;;  %v3977_v32 = vperm.slane %v3926_v30, 0 }
 0x4a4   : > { %v3677_v1 = vsel %vm3674_vm8, %v3668_v15, %v4760_v10  ;;  %v3423_v10 = vld [vmem:[#allocation3 + $0xe1] sm:$0xff] }
 0x4a5   : > { %v3978_v29 = vperm.slane %v3927_v9, 0  ;;  %v3979_v46 = vperm.slane %v3928_v56, 0  ;;  %v3980_v6 = vperm.slane %v3929_v51, 0  ;;  %v3686_v21 = vsel %vm3683_vm9, %v3677_v1, %v4765_v13 }
 0x4a6   : > { %3636 = vrot.lane.b32.xlu1 %v3390_v39, %s4942_s23 }
 0x4a7   : > { %3604 = vrot.lane.b32.xlu0 %v3382_v36, %s4945_s9  ;;  %v3993_v23 = vsel %vm7521_vm4, %v3978_v29, %v3977_v32  ;;  %v3678_v36 = vsel %vm3674_vm8, %v3669_v40, %v4761_v4  ;;  %vm7525_vm4 = vmmov %vm7520_vm0 }
 0x4a8   : > { %v3994_v26 = vsel %vm7522_vm6, %v3979_v46, %v3993_v23  ;;  %v3687_v28 = vsel %vm3683_vm9, %v3678_v36, %v4766_v14  ;;  %vm7526_vm6 = vmmov %vm7520_vm0 }
 0x4a9   : > { %v3995_v22 = vsel %vm3275_vm15, %v3980_v6, %v3994_v26  ;;  %4595 = vmatmul.msk.f32.gmra.mxu2 %vm7526_vm6, %v3423_v10 }
 0x4aa   : > { %4011 = vst.msk [vmem:[#allocation4 + $0x18] sm:$0xf] %vm4010_vm5, %v3995_v22 }
 0x4ae   : > { %3638 = vrot.lane.b32.xlu1 %v3415_v41, %s4942_s23  ;;  %s4619_s23 = sshll.u32 %s5007_s28, 1 }
 0x4af   : > { %3606 = vrot.lane.b32.xlu0 %v3407_v18, %s4945_s9  ;;  %s4420_s8 = scalar_lea.hbm %s7395_s7, %s4619_s23 }
 0x4b0   : > { %s4424_s14 = sshll.u32 %s4420_s8, 4  ;;  %s4425_s14 = int_to_ptr.hbm [resolvable:$true] %s4424_s14 }
 0x4b1   : > { %v4035_v3 = vld [vmem:[#allocation4 + $0x19] sm:$0xf]  ;;  %s4863_s16 = sshra.s32 %s4425_s14, 4  ;;  %s4864_s16 = int_to_ptr.hbm [resolvable:$true] %s4863_s16 }
 0x4b2   : > { %4104 = vrot.lane.b32.xlu2 %v4035_v3, %s4941_s20  ;;  %p4870_p0 = scmp.lt.s32.totalorder %s4864_s16, %s7395_s7 }
 0x4b4   : > { %v4769_v34 = vpop.permute.xlu1 %4768 }
 0x4b5   : > { %v4770_v2 = vunpack.i.l.bf16 %v4769_v34  ;;  %v4771_v39 = vunpack.i.h.bf16 %v4769_v34  ;;  %v4779_v62 = vpop.permute.xlu0 %4778 }
 0x4b6   : > { %v4780_v45 = vunpack.i.l.bf16 %v4779_v62  ;;  %v4781_v46 = vunpack.i.h.bf16 %v4779_v62 }
 0x4b7   : > { %v3695_v19 = vsel %vm3692_vm11, %v3686_v21, %v4770_v2  ;;  %v3696_v24 = vsel %vm3692_vm11, %v3687_v28, %v4771_v39 }
 0x4b8   : > { %v3704_v25 = vsel %vm3701_vm14, %v3695_v19, %v4775_v5  ;;  %v3705_v60 = vsel %vm3701_vm14, %v3696_v24, %v4776_v50  ;;  %v3652_v0 = vsel %vm7520_vm0, %v6984_v59, %v4780_v45  ;;  %v3653_v59 = vsel %vm7525_vm4, %v7004_v35, %v4781_v46 }
 0x4b9   : > { %3778 = vmatmul.f32.gmra.mxu1 %v3704_v25 }
 0x4bc   : > { %v4784_v63 = vpop.permute.xlu1 %4783 }
 0x4bd   : > { %v4785_v31 = vunpack.i.l.bf16 %v4784_v63  ;;  %v4786_v6 = vunpack.i.h.bf16 %v4784_v63 }
 0x4bf   : > { %v3661_v56 = vsel %vm3656_vm12, %v3652_v0, %v4785_v31  ;;  %v3662_v37 = vsel %vm3656_vm12, %v3653_v59, %v4786_v6 }
 0x4c1   : > { %3781 = vmatmul.f32.gmra.mxu1 %v3705_v60 }
 0x4cd   : > { %v4789_v57 = vpop.permute.xlu2 %4788 }
 0x4ce   : > { %v4790_v61 = vunpack.i.l.bf16 %v4789_v57  ;;  %v4791_v23 = vunpack.i.h.bf16 %v4789_v57 }
 0x4d0   : > { %v3670_v51 = vsel %vm3665_vm7, %v3661_v56, %v4790_v61  ;;  %v3671_v41 = vsel %vm3665_vm7, %v3662_v37, %v4791_v23 }
 0x4d5   : > { %v4804_v54 = vpop.permute.xlu2 %4803 }
 0x4d6   : > { %v4805_v43 = vunpack.i.l.bf16 %v4804_v54  ;;  %v4806_v15 = vunpack.i.h.bf16 %v4804_v54 }
 0x4dd   : > { %v4819_v3 = vpop.permute.xlu2 %4818 }
 0x4de   : > { %v4820_v1 = vunpack.i.l.bf16 %v4819_v3  ;;  %v4821_v19 = vunpack.i.h.bf16 %v4819_v3 }
 0x4e3   : > { %v4799_v53 = vpop.permute.xlu1 %4798 }
 0x4e4   : > { %v4794_v30 = vpop.permute.xlu0 %4793  ;;  %v4800_v32 = vunpack.i.l.bf16 %v4799_v53  ;;  %v4801_v11 = vunpack.i.h.bf16 %v4799_v53 }
 0x4e5   : > { %v4795_v9 = vunpack.i.l.bf16 %v4794_v30  ;;  %v4796_v58 = vunpack.i.h.bf16 %v4794_v30  ;;  %v3573_v25 = vpop.permute.xlu2 %3572  ;;  %v3820_v30 = vpop.f32.mrf.mxu2 }
 0x4e7   : > { %v3679_v29 = vsel %vm3674_vm8, %v3670_v51, %v4795_v9  ;;  %v3680_v8 = vsel %vm3674_vm8, %v3671_v41, %v4796_v58 }
 0x4e8   : > { %v3688_v26 = vsel %vm3683_vm9, %v3679_v29, %v4800_v32  ;;  %v3689_v52 = vsel %vm3683_vm9, %v3680_v8, %v4801_v11 }
 0x4e9   : > { %v3697_v18 = vsel %vm3692_vm11, %v3688_v26, %v4805_v43  ;;  %v3698_v47 = vsel %vm3692_vm11, %v3689_v52, %v4806_v15 }
 0x4eb   : > { %v4814_v12 = vpop.permute.xlu1 %4813 }
 0x4ec   : > { %v4809_v22 = vpop.permute.xlu0 %4808  ;;  %v4815_v33 = vunpack.i.l.bf16 %v4814_v12  ;;  %v4816_v7 = vunpack.i.h.bf16 %v4814_v12 }
 0x4ed   : > { %v4810_v16 = vunpack.i.l.bf16 %v4809_v22  ;;  %v4811_v27 = vunpack.i.h.bf16 %v4809_v22  ;;  %v3823_v32 = vpop.f32.mrf.mxu2 }
 0x4ee   : > { %v3654_v38 = vsel %vm7527_vm10, %v7033_v20, %v4815_v33  ;;  %v3655_v21 = vsel %vm7528_vm2, %v7047_v55, %v4816_v7  ;;  %v4020_v33 = vld [vmem:[#allocation4 + $0x18] sm:$0xf] }
 0x4ef   : > { %v3706_v44 = vsel %vm3701_vm14, %v3697_v18, %v4810_v16  ;;  %v3707_v35 = vsel %vm3701_vm14, %v3698_v47, %v4811_v27  ;;  %v3663_v2 = vsel %vm3656_vm12, %v3654_v38, %v4820_v1  ;;  %v3664_v28 = vsel %vm3656_vm12, %v3655_v21, %v4821_v19 }
 0x4f0   : > { %3784 = vmatmul.f32.gmra.mxu1 %v3706_v44 }
 0x4f5   : > { %v3575_v55 = vpop.permute.xlu2 %3574  ;;  %v3826_v1 = vpop.f32.mrf.mxu2 }
 0x4f8   : > { %3787 = vmatmul.f32.gmra.mxu1 %v3707_v35 }
 0x510   : > { %v4829_v42 = vpop.permute.xlu1 %4828 }
 0x511   : > { %v4824_v49 = vpop.permute.xlu0 %4823  ;;  %v4830_v13 = vunpack.i.l.bf16 %v4829_v42  ;;  %v4831_v14 = vunpack.i.h.bf16 %v4829_v42 }
 0x512   : > { %v4825_v34 = vunpack.i.l.bf16 %v4824_v49  ;;  %v4826_v4 = vunpack.i.h.bf16 %v4824_v49 }
 0x514   : > { %v3672_v5 = vsel %vm3665_vm7, %v3663_v2, %v4825_v34  ;;  %v3673_v50 = vsel %vm3665_vm7, %v3664_v28, %v4826_v4  ;;  %vm3943_vm7 = vcmask 258048   ;;  %v4227_v34 = vld [vmem:[%s7393_s5 + $0x110] sm:$0xff]  ;;  %v4226_v2 = vld [vmem:[%s7393_s5 + $0x108] sm:$0xff]  ;;  %v3829_v4 = vpop.f32.mrf.mxu2 }
 0x515   : > { %v3681_v40 = vsel %vm3674_vm8, %v3672_v5, %v4830_v13  ;;  %v3682_v62 = vsel %vm3674_vm8, %v3673_v50, %v4831_v14  ;;  %3944 = vst.msk [vmem:[#allocation4 + $0x8] sm:$0x1f] %vm3943_vm7, %v7456_v48  ;;  %v4228_v13 = vld [vmem:[%s7393_s5 + $0x118] sm:$0xff] }
 0x516   : > { %v3690_v36 = vsel %vm3683_vm9, %v3681_v40, %v3573_v25  ;;  %v3691_v57 = vsel %vm3683_vm9, %v3682_v62, %v3575_v55  ;;  %3955 = vst.msk [vmem:[#allocation4 + $0xc] sm:$0x1] %vm3948_vm1, %v7456_v48  ;;  %vm7529_vm9 = vcmask 1041409   ;;  %4320 = vmatpush.msra.mxu2 %v4228_v13 }
 0x517   : > { %3947 = vst.msk [vmem:[#allocation4 + $0x58] sm:$0x1f] %vm3943_vm7, %v7456_v48  ;;  %vm7537_vm7 = vcmask 1047556  }
 0x518   : > { %v3637_v39 = vpop.permute.xlu1 %3636  ;;  %3960 = vst.msk [vmem:[#allocation4 + $0x5c] sm:$0x1] %vm3948_vm1, %v7456_v48  ;;  %4321 = vmatpush.msra.mxu2 %v4227_v34  ;;  %vm7531_vm1 = vmmov %vm7529_vm9 }
 0x519   : > { %v3605_v20 = vpop.permute.xlu0 %3604  ;;  %vm7533_vm4 = vmmov %vm7531_vm1 }
 0x51a   : > { %v3699_v24 = vsel %vm3692_vm11, %v3690_v36, %v3605_v20  ;;  %4322 = vmatpush.msra.mxu2 %v4226_v2  ;;  %v4225_v36 = vld [vmem:[%s7393_s5 + $0x100] sm:$0xff]  ;;  %vm7535_vm10 = vmmov %vm7531_vm1 }
 0x51b   : > { %v3708_v60 = vsel %vm3701_vm14, %v3699_v24, %v3637_v39  ;;  %vm7536_vm2 = vmmov %vm7531_vm1 }
 0x51c   : > { %3790 = vmatmul.f32.gmra.mxu1 %v3708_v60  ;;  %v4019_v38 = vld [vmem:[#allocation4 + $0x8] sm:$0xf]  ;;  %4323 = vmatpush.msra.mxu2 %v4225_v36 }
 0x51d   : > { %v4023_v3 = vld [vmem:[#allocation4 + $0x9] sm:$0xf] }
 0x520   : > { %v3639_v45 = vpop.permute.xlu1 %3638 }
 0x521   : > { %v3607_v63 = vpop.permute.xlu0 %3606 }
 0x522   : > { %v3700_v31 = vsel %vm3692_vm11, %v3691_v57, %v3607_v63 }
 0x523   : > { %v3709_v61 = vsel %vm3701_vm14, %v3700_v31, %v3639_v45  ;;  %vm7530_vm14 = vcmask 1042434  }
 0x524   : > { %3793 = vmatmul.f32.gmra.mxu1 %v3709_v61  ;;  %vm7532_vm0 = vmmov %vm7530_vm14 }
 0x525   : > { %vm7534_vm6 = vmmov %vm7532_vm0 }
 0x536   : > { %v3779_v53 = vpop.f32.mrf.mxu1 }
 0x537   : > { %v3780_v0 = vadd.f32 %v7067_v17, %v3779_v53 }
 0x539   : > { %v3821_v56 = vadd.f32 %v3820_v30, %v3780_v0 }
 0x53b   : > { %v3840_v46 = vmax.f32 %v3821_v56, 0.0 }
 0x53e   : > { %v3782_v9 = vpop.f32.mrf.mxu1 }
 0x53f   : > { %v3783_v51 = vadd.f32 %v7067_v17, %v3782_v9 }
 0x541   : > { %v3824_v29 = vadd.f32 %v3823_v32, %v3783_v51 }
 0x543   : > { %v3841_v54 = vmax.f32 %v3824_v29, 0.0 }
 0x545   : > { %v3847_v6 = vmax.f32 %v3840_v46, %v3841_v54  ;;  %v3832_v54 = vpop.f32.mrf.mxu2 }
 0x547   : > { %v3857_v23 = vrot.slane %v3847_v6, 2  ;;  %v3858_v26 = vrot.slane %v3847_v6, 4  ;;  %v3859_v43 = vrot.slane %v3847_v6, 6  ;;  %v4600_v58 = vrot.slane %v3847_v6, 9 }
 0x549   : > { %v4601_v22 = vrot.slane %v3857_v23, 9  ;;  %v4602_v59 = vrot.slane %v3858_v26, 9  ;;  %v4603_v16 = vrot.slane %v3859_v43, 9  ;;  %v3930_v37 = vmax.f32 %v3847_v6, %v4600_v58 }
 0x54b   : > { %v3931_v18 = vmax.f32 %v3857_v23, %v4601_v22  ;;  %v3932_v41 = vmax.f32 %v3858_v26, %v4602_v59  ;;  %v3933_v11 = vmax.f32 %v3859_v43, %v4603_v16  ;;  %v3981_v44 = vperm.slane %v3930_v37, 0  ;;  %v4027_v43 = vld [vmem:[#allocation4 + $0x17] sm:$0xf] }
 0x54c   : > { %v4051_v22 = vld [vmem:[#allocation4 + $0x59] sm:$0xf] }
 0x54d   : > { %v3982_v8 = vperm.slane %v3931_v18, 0  ;;  %v3983_v27 = vperm.slane %v3932_v41, 0  ;;  %v3984_v52 = vperm.slane %v3933_v11, 0  ;;  %4247 = vst [vmem:[#allocation1 + $0x31] ss:$2 sm:$0xff] %v4051_v22  ;;  %v3835_v37 = vpop.f32.mrf.mxu2 }
 0x54e   : > { %v4024_v16 = vld [vmem:[#allocation4 + $0x19] sm:$0xf] }
 0x54f   : > { %v3996_v15 = vsel %vm7529_vm9, %v3982_v8, %v3981_v44  ;;  %vm7539_vm9 = vmmov %vm7537_vm7 }
 0x550   : > { %v3997_v47 = vsel %vm7530_vm14, %v3983_v27, %v3996_v15 }
 0x551   : > { %v3998_v48 = vsel %vm3275_vm15, %v3984_v52, %v3997_v47 }
 0x552   : > { %4012 = vst.msk [vmem:[#allocation4 + $0x28] sm:$0xf] %vm4010_vm5, %v3998_v48 }
 0x559   : > { %v4040_v35 = vld [vmem:[#allocation4 + $0x27] sm:$0xf] }
 0x55a   : > { %v4036_v10 = vld [vmem:[#allocation4 + $0x29] sm:$0xf]  ;;  %4120 = vrot.lane.b32.xlu1 %v4040_v35, %s4940_s22 }
 0x55b   : > { %4106 = vrot.lane.b32.xlu0 %v4036_v10, %s4941_s20  ;;  %v4048_v12 = vld [vmem:[#allocation4 + $0x29] sm:$0xf] }
 0x55c   : > { %4237 = vst [vmem:[#allocation1 + $0x10] ss:$2 sm:$0xff] %v4048_v12  ;;  %v4028_v49 = vld [vmem:[#allocation4 + $0x27] sm:$0xf] }
 0x55d   : > { %v4044_v26 = vld [vmem:[#allocation4 + $0x28] sm:$0xf] }
 0x562   : > { %4058 = vrot.lane.b32.xlu1 %v4020_v33, %s4941_s20 }
 0x563   : > { %4056 = vrot.lane.b32.xlu0 %v4019_v38, %s4941_s20 }
 0x56a   : > { %4072 = vrot.lane.b32.xlu1 %v4023_v3, %s4940_s22 }
 0x56d   : > { %v3785_v42 = vpop.f32.mrf.mxu1 }
 0x56e   : > { %v3786_v7 = vadd.f32 %v7067_v17, %v3785_v42  ;;  %v4043_v42 = vld [vmem:[#allocation4 + $0x57] sm:$0xf] }
 0x570   : > { %v3827_v40 = vadd.f32 %v3826_v1, %v3786_v7 }
 0x572   : > { %4090 = vrot.lane.b32.xlu1 %v4028_v49, %s4945_s9  ;;  %v3842_v25 = vmax.f32 %v3827_v40, 0.0 }
 0x575   : > { %v3788_v5 = vpop.f32.mrf.mxu1 }
 0x576   : > { %v3789_v21 = vadd.f32 %v7067_v17, %v3788_v5 }
 0x578   : > { %v3830_v19 = vadd.f32 %v3829_v4, %v3789_v21 }
 0x57a   : > { %v3843_v39 = vmax.f32 %v3830_v19, 0.0 }
 0x57c   : > { %v3848_v20 = vmax.f32 %v3842_v25, %v3843_v39 }
 0x57e   : > { %v3860_v14 = vrot.slane %v3848_v20, 2  ;;  %v3861_v28 = vrot.slane %v3848_v20, 4  ;;  %v3862_v24 = vrot.slane %v3848_v20, 6  ;;  %v4604_v50 = vrot.slane %v3848_v20, 9 }
 0x580   : > { %v4605_v60 = vrot.slane %v3860_v14, 9  ;;  %v4606_v62 = vrot.slane %v3861_v28, 9  ;;  %v4607_v55 = vrot.slane %v3862_v24, 9  ;;  %v3934_v63 = vmax.f32 %v3848_v20, %v4604_v50  ;;  %v4021_v20 = vld [vmem:[#allocation4 + $0x28] sm:$0xf] }
 0x582   : > { %v3935_v57 = vmax.f32 %v3860_v14, %v4605_v60  ;;  %v3936_v45 = vmax.f32 %v3861_v28, %v4606_v62  ;;  %v3937_v31 = vmax.f32 %v3862_v24, %v4607_v55  ;;  %v3985_v61 = vperm.slane %v3934_v63, 0  ;;  %v4047_v28 = vld [vmem:[#allocation4 + $0x58] sm:$0xf]  ;;  %v4025_v24 = vld [vmem:[#allocation4 + $0x29] sm:$0xf]  ;;  %v4208_v62 = vld [vmem:[%s7393_s5 + $0x78] sm:$0xff] }
 0x583   : > { %v4207_v55 = vld [vmem:[%s7393_s5 + $0x70] sm:$0xff]  ;;  %4262 = vmatpush.msrb.mxu3 %v4208_v62  ;;  %v4206_v63 = vld [vmem:[%s7393_s5 + $0x68] sm:$0xff] }
 0x584   : > { %v3986_v53 = vperm.slane %v3935_v57, 0  ;;  %v3987_v30 = vperm.slane %v3936_v45, 0  ;;  %v3988_v0 = vperm.slane %v3937_v31, 0  ;;  %v4205_v57 = vld [vmem:[%s7393_s5 + $0x60] sm:$0xff]  ;;  %v4204_v45 = vld [vmem:[%s7393_s5 + $0x58] sm:$0xff]  ;;  %v4203_v31 = vld [vmem:[%s7393_s5 + $0x50] sm:$0xff] }
 0x585   : > { %4263 = vmatpush.msrb.mxu3 %v4207_v55  ;;  %v4212_v55 = vld [vmem:[%s7393_s5 + $0x98] sm:$0xff] }
 0x586   : > { %v3999_v9 = vsel %vm7531_vm1, %v3986_v53, %v3985_v61  ;;  %v4202_v61 = vld [vmem:[%s7393_s5 + $0x48] sm:$0xff]  ;;  %v4105_v53 = vpop.permute.xlu2 %4104 }
 0x587   : > { %v4000_v56 = vsel %vm7532_vm0, %v3987_v30, %v3999_v9  ;;  %4264 = vmatpush.msrb.mxu3 %v4206_v63  ;;  %v4200_v9 = vld [vmem:[%s7393_s5 + $0x38] sm:$0xff]  ;;  %v4211_v63 = vld [vmem:[%s7393_s5 + $0x90] sm:$0xff] }
 0x588   : > { %v4001_v51 = vsel %vm3275_vm15, %v3988_v0, %v4000_v56  ;;  %v4201_v0 = vld [vmem:[%s7393_s5 + $0x40] sm:$0xff]  ;;  %v4199_v56 = vld [vmem:[%s7393_s5 + $0x30] sm:$0xff] }
 0x589   : > { %4013 = vst.msk [vmem:[#allocation4 + $0x38] sm:$0xf] %vm4010_vm5, %v4001_v51  ;;  %4265 = vmatpush.msrb.mxu3 %v4205_v57 }
 0x58b   : > { %4266 = vmatpush.msrb.mxu3 %v4204_v45  ;;  %v4210_v45 = vld [vmem:[%s7393_s5 + $0x88] sm:$0xff] }
 0x58d   : > { %4267 = vmatpush.msrb.mxu3 %v4203_v31 }
 0x58f   : > { %4268 = vmatpush.msrb.mxu3 %v4202_v61  ;;  %v4209_v61 = vld [vmem:[%s7393_s5 + $0x80] sm:$0xff] }
 0x590   : > { %v4041_v32 = vld [vmem:[#allocation4 + $0x37] sm:$0xf] }
 0x591   : > { %v4045_v29 = vld [vmem:[#allocation4 + $0x38] sm:$0xf]  ;;  %4122 = vrot.lane.b32.xlu2 %v4041_v32, %s4940_s22  ;;  %4269 = vmatpush.msrb.mxu3 %v4201_v0  ;;  %v4198_v32 = vld [vmem:[%s7393_s5 + $0x28] sm:$0xff] }
 0x592   : > { %v4049_v46 = vld [vmem:[#allocation4 + $0x39] sm:$0xf]  ;;  %4138 = vrot.lane.b32.xlu0 %v4045_v29, %s4945_s9  ;;  %v4197_v29 = vld [vmem:[%s7393_s5 + $0x20] sm:$0xff] }
 0x593   : > { %4239 = vst [vmem:[#allocation1 + $0x11] ss:$2 sm:$0xff] %v4049_v46  ;;  %v4037_v52 = vld [vmem:[#allocation4 + $0x39] sm:$0xf]  ;;  %4270 = vmatpush.msrb.mxu3 %v4200_v9  ;;  %v4196_v46 = vld [vmem:[%s7393_s5 + $0x18] sm:$0xff] }
 0x594   : > { %v4026_v39 = vld [vmem:[#allocation4 + $0x39] sm:$0xf] }
 0x595   : > { %v4022_v14 = vld [vmem:[#allocation4 + $0x38] sm:$0xf]  ;;  %4271 = vmatpush.msrb.mxu3 %v4199_v56 }
 0x596   : > { %v4029_v50 = vld [vmem:[#allocation4 + $0x37] sm:$0xf] }
 0x597   : > { %4272 = vmatpush.msrb.mxu3 %v4198_v32 }
 0x599   : > { %v3791_v6 = vpop.f32.mrf.mxu1  ;;  %4136 = vrot.lane.b32.xlu2 %v4044_v26, %s4945_s9  ;;  %4273 = vmatpush.msrb.mxu3 %v4197_v29  ;;  %v4194_v26 = vld [vmem:[%s7393_s5 + $0x8] sm:$0xff] }
 0x59a   : > { %v4250_v23 = vld.sshfl [vmem:[#allocation1 + $0x10] sm:$0xff pattern:$0x75316420]  ;;  %4088 = vrot.lane.b32.xlu0 %v4027_v43, %s4945_s9  ;;  %v3792_v58 = vadd.f32 %v7067_v17, %v3791_v6 }
 0x59b   : > { %4612 = vmatmul.msk.f32.vlgmr.msra.gmra.mxu2 %vm3656_vm12, %v4250_v23  ;;  %v4195_v23 = vld [vmem:[%s7393_s5 + $0x10] sm:$0xff]  ;;  %4274 = vmatpush.msrb.mxu3 %v4196_v46 }
 0x59c   : > { %v3833_v18 = vadd.f32 %v3832_v54, %v3792_v58  ;;  %v4193_v58 = vld [vmem:[%s7393_s5] sm:$0xff] }
 0x59d   : > { %4275 = vmatpush.msrb.mxu3 %v4195_v23 }
 0x59e   : > { %v3844_v44 = vmax.f32 %v3833_v18, 0.0  ;;  %v4016_v18 = vld [vmem:[#allocation4 + $0x17] sm:$0xf] }
 0x59f   : > { %4276 = vmatpush.msrb.mxu3 %v4194_v26  ;;  %v4017_v26 = vld [vmem:[#allocation4 + $0x27] sm:$0xf] }
 0x5a1   : > { %v3794_v59 = vpop.f32.mrf.mxu1  ;;  %4074 = vrot.lane.b32.xlu2 %v4024_v16, %s4940_s22  ;;  %4277 = vmatpush.msrb.mxu3 %v4193_v58 }
 0x5a2   : > { %v3795_v41 = vadd.f32 %v7067_v17, %v3794_v59 }
 0x5a4   : > { %v3836_v11 = vadd.f32 %v3835_v37, %v3795_v41  ;;  %v4032_v37 = vld [vmem:[#allocation4 + $0x28] sm:$0xf] }
 0x5a6   : > { %v3845_v8 = vmax.f32 %v3836_v11, 0.0 }
 0x5a8   : > { %v3849_v27 = vmax.f32 %v3844_v44, %v3845_v8 }
 0x5a9   : > { %4108 = vrot.lane.b32.xlu2 %v4037_v52, %s4941_s20  ;;  %v4015_v52 = vld [vmem:[#allocation4 + $0x7] sm:$0xf] }
 0x5aa   : > { %v3863_v15 = vrot.slane %v3849_v27, 2  ;;  %v3864_v47 = vrot.slane %v3849_v27, 4  ;;  %v3865_v48 = vrot.slane %v3849_v27, 6  ;;  %v4608_v35 = vrot.slane %v3849_v27, 9 }
 0x5ac   : > { %v4609_v10 = vrot.slane %v3863_v15, 9  ;;  %v4610_v12 = vrot.slane %v3864_v47, 9  ;;  %v4611_v33 = vrot.slane %v3865_v48, 9  ;;  %v3938_v3 = vmax.f32 %v3849_v27, %v4608_v35  ;;  %v4031_v35 = vld [vmem:[#allocation4 + $0x18] sm:$0xf] }
 0x5ae   : > { %v3939_v38 = vmax.f32 %v3863_v15, %v4609_v10  ;;  %v3940_v1 = vmax.f32 %v3864_v47, %v4610_v12  ;;  %v3941_v17 = vmax.f32 %v3865_v48, %v4611_v33  ;;  %v3989_v49 = vperm.slane %v3938_v3, 0 }
 0x5af   : > { %v4160_v12 = vsel %vm3656_vm12, %v4031_v35, %v4105_v53 }
 0x5b0   : > { %v3990_v13 = vperm.slane %v3939_v38, 0  ;;  %v3991_v34 = vperm.slane %v3940_v1, 0  ;;  %v3992_v7 = vperm.slane %v3941_v17, 0 }
 0x5b1   : > { %4126 = vrot.lane.b32.xlu2 %v4043_v42, %s4940_s22 }
 0x5b2   : > { %v4002_v2 = vsel %vm7533_vm4, %v3990_v13, %v3989_v49 }
 0x5b3   : > { %v4003_v5 = vsel %vm7534_vm6, %v3991_v34, %v4002_v2  ;;  %v4224_v2 = vld [vmem:[%s7393_s5 + $0xf8] sm:$0xff] }
 0x5b4   : > { %v4004_v40 = vsel %vm3275_vm15, %v3992_v7, %v4003_v5  ;;  %v4223_v5 = vld [vmem:[%s7393_s5 + $0xf0] sm:$0xff]  ;;  %4285 = vmatpush.msra.mxu3 %v4224_v2 }
 0x5b5   : > { %4014 = vst.msk [vmem:[#allocation4 + $0x48] sm:$0xf] %vm4010_vm5, %v4004_v40  ;;  %vm4188_vm5 = vcmask 1043456   ;;  %v4222_v40 = vld [vmem:[%s7393_s5 + $0xe8] sm:$0xff] }
 0x5b6   : > { %4286 = vmatpush.msra.mxu3 %v4223_v5 }
 0x5b8   : > { %4287 = vmatpush.msra.mxu3 %v4222_v40 }
 0x5bc   : > { %v4046_v21 = vld [vmem:[#allocation4 + $0x48] sm:$0xf] }
 0x5bd   : > { %v4038_v4 = vld [vmem:[#allocation4 + $0x49] sm:$0xf]  ;;  %4140 = vrot.lane.b32.xlu2 %v4046_v21, %s4945_s9 }
 0x5be   : > { %v4042_v19 = vld [vmem:[#allocation4 + $0x47] sm:$0xf]  ;;  %4110 = vrot.lane.b32.xlu0 %v4038_v4, %s4941_s20 }
 0x5bf   : > { %v4050_v25 = vld [vmem:[#allocation4 + $0x49] sm:$0xf]  ;;  %4124 = vrot.lane.b32.xlu1 %v4042_v19, %s4940_s22  ;;  %v4220_v4 = vld [vmem:[%s7393_s5 + $0xd8] sm:$0xff]  ;;  %v4219_v19 = vld [vmem:[%s7393_s5 + $0xd0] sm:$0xff] }
 0x5c0   : > { %4245 = vst [vmem:[#allocation1 + $0x30] ss:$2 sm:$0xff] %v4050_v25  ;;  %v4030_v60 = vld [vmem:[#allocation4 + $0x47] sm:$0xf]  ;;  %v4218_v25 = vld [vmem:[%s7393_s5 + $0xc8] sm:$0xff] }
 0x5c1   : > { %v4221_v21 = vld [vmem:[%s7393_s5 + $0xe0] sm:$0xff] }
 0x5c2   : > { %4288 = vmatpush.msra.mxu3 %v4221_v21  ;;  %v4034_v56 = vld [vmem:[#allocation4 + $0x48] sm:$0xf] }
 0x5c4   : > { %4289 = vmatpush.msra.mxu3 %v4220_v4 }
 0x5c5   : > { %4078 = vrot.lane.b32.xlu2 %v4026_v39, %s4940_s22 }
 0x5c6   : > { %4060 = vrot.lane.b32.xlu0 %v4021_v20, %s4941_s20  ;;  %4290 = vmatpush.msra.mxu3 %v4219_v19  ;;  %v4217_v20 = vld [vmem:[%s7393_s5 + $0xc0] sm:$0xff] }
 0x5c7   : > { %v4253_v36 = vld.sshfl [vmem:[#allocation1 + $0x30] sm:$0xff pattern:$0x75316420]  ;;  %4062 = vrot.lane.b32.xlu1 %v4022_v14, %s4941_s20 }
 0x5c8   : > { %4613 = vmatmul.msk.f32.gmra.mxu2 %vm3656_vm12, %v4253_v36  ;;  %4291 = vmatpush.msra.mxu3 %v4218_v25  ;;  %v4216_v36 = vld [vmem:[%s7393_s5 + $0xb8] sm:$0xff]  ;;  %v4215_v14 = vld [vmem:[%s7393_s5 + $0xb0] sm:$0xff] }
 0x5ca   : > { %4292 = vmatpush.msra.mxu3 %v4217_v20 }
 0x5cc   : > { %v4121_v30 = vpop.permute.xlu1 %4120  ;;  %4293 = vmatpush.msra.mxu3 %v4216_v36 }
 0x5cd   : > { %v4107_v54 = vpop.permute.xlu0 %4106  ;;  %v4164_v38 = vsel %vm3674_vm8, %v4160_v12, %v4121_v30  ;;  %v4033_v30 = vld [vmem:[#allocation4 + $0x38] sm:$0xf]  ;;  %v4834_v12 = vld [vmem:[%s7394_s6] ss:$0 sm:$0xff] }
 0x5ce   : > { %4142 = vrot.lane.b32.xlu0 %v4047_v28, %s4945_s9  ;;  %v4161_v41 = vsel %vm3656_vm12, %v4032_v37, %v4107_v54  ;;  %4294 = vmatpush.msra.mxu3 %v4215_v14  ;;  %v4018_v54 = vld [vmem:[#allocation4 + $0x37] sm:$0xf] }
 0x5cf   : > { %4076 = vrot.lane.b32.xlu1 %v4025_v24, %s4940_s22  ;;  %v4214_v24 = vld [vmem:[%s7393_s5 + $0xa8] sm:$0xff] }
 0x5d0   : > { %4295 = vmatpush.msra.mxu3 %v4214_v24 }
 0x5d4   : > { %v4059_v6 = vpop.permute.xlu1 %4058 }
 0x5d5   : > { %v4057_v22 = vpop.permute.xlu0 %4056  ;;  %v4149_v11 = vsel %vm3656_vm12, %v4016_v18, %v4059_v6 }
 0x5d6   : > { %4092 = vrot.lane.b32.xlu0 %v4029_v50, %s4945_s9  ;;  %v4148_v33 = vsel %vm3656_vm12, %v4015_v52, %v4057_v22 }
 0x5d7   : > { %4094 = vrot.lane.b32.xlu1 %v4030_v60, %s4945_s9  ;;  %v4213_v60 = vld [vmem:[%s7393_s5 + $0xa0] sm:$0xff]  ;;  %s4422_s9 = sshll.u32 %s271_s13, 4  ;;  %s4423_s9 = int_to_ptr.vmem [resolvable:$true] %s4422_s9 }
 0x5d8   : > { %4296 = vmatpush.msra.mxu3 %v4213_v60 }
 0x5da   : > { %4297 = vmatpush.msra.mxu3 %v4212_v55 }
 0x5dc   : > { %v4073_v59 = vpop.permute.xlu1 %4072  ;;  %4298 = vmatpush.msra.mxu3 %v4211_v63 }
 0x5dd   : > { %v4152_v17 = vsel %vm3674_vm8, %v4148_v33, %v4073_v59 }
 0x5de   : > { %4299 = vmatpush.msra.mxu3 %v4210_v45 }
 0x5e0   : > { %4300 = vmatpush.msra.mxu3 %v4209_v61 }
 0x5e4   : > { %v4091_v47 = vpop.permute.xlu1 %4090 }
 0x5eb   : > { %v4123_v51 = vpop.permute.xlu2 %4122 }
 0x5ec   : > { %v4165_v44 = vsel %vm3674_vm8, %v4161_v41, %v4123_v51 }
 0x5f3   : > { %v4137_v43 = vpop.permute.xlu2 %4136 }
 0x5f4   : > { %v4168_v1 = vsel %vm3692_vm11, %v4164_v38, %v4137_v43 }
 0x5f5   : > { %v4184_v42 = vrot.slane %v4168_v1, 4 }
 0x5fb   : > { %v4075_v16 = vpop.permute.xlu2 %4074 }
 0x5fc   : > { %v4153_v8 = vsel %vm3674_vm8, %v4149_v11, %v4075_v16 }
 0x5fd   : > { %v4157_v10 = vsel %vm3692_vm11, %v4153_v8, %v4091_v47 }
 0x603   : > { %v4109_v39 = vpop.permute.xlu2 %4108 }
 0x604   : > { %v4139_v27 = vpop.permute.xlu0 %4138  ;;  %v4162_v9 = vsel %vm3656_vm12, %v4033_v30, %v4109_v39 }
 0x605   : > { %v4169_v15 = vsel %vm3692_vm11, %v4165_v44, %v4139_v27 }
 0x606   : > { %v4185_v48 = vrot.slane %v4169_v15, 4 }
 0x608   : > { %v4190_v3 = vsel %vm4188_vm5, %v4157_v10, %v4185_v48 }
 0x609   : > { %4235 = vst [vmem:[#allocation1 + $0x1] ss:$2 sm:$0xff] %v4190_v3 }
 0x60b   : > { %v4127_v62 = vpop.permute.xlu2 %4126 }
 0x60c   : > { %v4089_v49 = vpop.permute.xlu0 %4088 }
 0x60d   : > { %v4156_v13 = vsel %vm3692_vm11, %v4152_v17, %v4089_v49 }
 0x60e   : > { %v4189_v34 = vsel %vm4188_vm5, %v4156_v13, %v4184_v42 }
 0x60f   : > { %4233 = vst [vmem:[#allocation1] ss:$2 sm:$0xff] %v4189_v34 }
 0x616   : > { %v4248_v7 = vld.sshfl [vmem:[#allocation1] sm:$0xff pattern:$0x75316420]  ;;  %v4249_v47 = vld.sshfl [vmem:[#allocation1 + $0x8] sm:$0xff pattern:$0x75316420] }
 0x617   : > { %4278 = vmatmul.f32.vlgmr.msrb.gmra.mxu3 %v4248_v7  ;;  %v4141_v53 = vpop.permute.xlu2 %4140 }
 0x61e   : > { %v4325_v1 = vpop.f32.mrf.mxu2 }
 0x61f   : > { %v4079_v22 = vpop.permute.xlu2 %4078 }
 0x630   : > { %v4111_v28 = vpop.permute.xlu0 %4110 }
 0x631   : > { %v4125_v50 = vpop.permute.xlu1 %4124  ;;  %v4163_v32 = vsel %vm3656_vm12, %v4034_v56, %v4111_v28 }
 0x632   : > { %v4166_v29 = vsel %vm3674_vm8, %v4162_v9, %v4125_v50  ;;  %v4167_v6 = vsel %vm3674_vm8, %v4163_v32, %v4127_v62 }
 0x633   : > { %v4170_v46 = vsel %vm3692_vm11, %v4166_v29, %v4141_v53 }
 0x634   : > { %v4186_v59 = vrot.slane %v4170_v46, 4 }
 0x638   : > { %v4061_v57 = vpop.permute.xlu0 %4060 }
 0x639   : > { %v4063_v31 = vpop.permute.xlu1 %4062  ;;  %v4150_v58 = vsel %vm3656_vm12, %v4017_v26, %v4061_v57  ;;  %v7538_v26 = vld [vmem:[#allocation8_spill] sm:$0xff] }
 0x63a   : > { %v4151_v23 = vsel %vm3656_vm12, %v4018_v54, %v4063_v31  ;;  %vm4347_vm12 = vcmask 1043458  }
 0x63b   : > { %v4155_v41 = vsel %vm3674_vm8, %v4151_v23, %v4079_v22 }
 0x640   : > { %v4143_v0 = vpop.permute.xlu0 %4142 }
 0x641   : > { %v4077_v51 = vpop.permute.xlu1 %4076  ;;  %v4171_v43 = vsel %vm3692_vm11, %v4167_v6, %v4143_v0 }
 0x642   : > { %v4154_v16 = vsel %vm3674_vm8, %v4150_v58, %v4077_v51  ;;  %v4187_v18 = vrot.slane %v4171_v43, 4 }
 0x648   : > { %v4093_v37 = vpop.permute.xlu0 %4092 }
 0x649   : > { %v4095_v11 = vpop.permute.xlu1 %4094  ;;  %v4158_v44 = vsel %vm3692_vm11, %v4154_v16, %v4093_v37 }
 0x64a   : > { %v4159_v8 = vsel %vm3692_vm11, %v4155_v41, %v4095_v11  ;;  %v4191_v27 = vsel %vm4188_vm5, %v4158_v44, %v4186_v59  ;;  %vm4345_vm11 = vcmask 1041408  }
 0x64b   : > { %v4192_v52 = vsel %vm4188_vm5, %v4159_v8, %v4187_v18  ;;  %4241 = vst [vmem:[#allocation1 + $0x20] ss:$2 sm:$0xff] %v4191_v27  ;;  %v4328_v5 = vpop.f32.mrf.mxu2 }
 0x64c   : > { %4243 = vst [vmem:[#allocation1 + $0x21] ss:$2 sm:$0xff] %v4192_v52 }
 0x653   : > { %v4251_v15 = vld.sshfl [vmem:[#allocation1 + $0x20] sm:$0xff pattern:$0x75316420]  ;;  %v4252_v48 = vld.sshfl [vmem:[#allocation1 + $0x28] sm:$0xff pattern:$0x75316420] }
 0x654   : > { %4281 = vmatmul.f32.gmra.mxu3 %v4251_v15 }
 0x65c   : > { %4301 = vmatmul.f32.vlgmr.msra.gmra.mxu3 %v4249_v47 }
 0x664   : > { %4304 = vmatmul.f32.gmra.mxu3 %v4252_v48 }
 0x69a   : > { %v4279_v35 = vpop.f32.mrf.mxu3 }
 0x69b   : > { %v4280_v33 = vadd.f32 %v4834_v12, %v4279_v35 }
 0x6d7   : > { %v4282_v10 = vpop.f32.mrf.mxu3 }
 0x6d8   : > { %v4283_v49 = vadd.f32 %v4834_v12, %v4282_v10 }
 0x6df   : > { %v4302_v3 = vpop.f32.mrf.mxu3 }
 0x6e0   : > { %v4303_v38 = vadd.f32 %v4302_v3, %v4280_v33 }
 0x6e2   : > { %v4326_v17 = vadd.f32 %v4325_v1, %v4303_v38 }
 0x6e4   : > { %v4331_v42 = vmax.f32 %v4326_v17, 0.0 }
 0x6e6   : > { %v4335_v13 = vrot.slane %v4331_v42, 4 }
 0x6e7   : > { %v4305_v34 = vpop.f32.mrf.mxu3 }
 0x6e8   : > { %v4339_v7 = vmax.f32 %v4331_v42, %v4335_v13  ;;  %v4306_v2 = vadd.f32 %v4305_v34, %v4283_v49 }
 0x6ea   : > { %v4343_v40 = vrot.slane %v4339_v7, 2  ;;  %v4329_v21 = vadd.f32 %v4328_v5, %v4306_v2 }
 0x6ec   : > { %v4348_v4 = vsel %vm4347_vm12, %v4339_v7, %v4343_v40  ;;  %v4332_v19 = vmax.f32 %v4329_v21, 0.0  ;;  %v4346_v36 = vsel %vm4345_vm11, %v4339_v7, %v4343_v40 }
 0x6ed   : > { %v4349_v25 = vrot.slane %v4348_v4, 2  ;;  %v4614_v50 = vrot.slane %v4346_v36, 9 }
 0x6ee   : > { %v4336_v39 = vrot.slane %v4332_v19, 4 }
 0x6ef   : > { %v4615_v20 = vrot.slane %v4349_v25, 9  ;;  %v4369_v57 = vmax.f32 %v4346_v36, %v4614_v50 }
 0x6f0   : > { %v4340_v14 = vmax.f32 %v4332_v19, %v4336_v39 }
 0x6f1   : > { %v4370_v28 = vmax.f32 %v4349_v25, %v4615_v20 }
 0x6f2   : > { %v4344_v24 = vrot.slane %v4340_v14, 2 }
 0x6f3   : > { %v4379_v55 = vrot.slane %v4370_v28, 7 }
 0x6f4   : > { %v4350_v60 = vsel %vm4345_vm11, %v4340_v14, %v4344_v24  ;;  %v4351_v62 = vsel %vm4347_vm12, %v4340_v14, %v4344_v24 }
 0x6f5   : > { %v4352_v63 = vrot.slane %v4351_v62, 2  ;;  %v4616_v45 = vrot.slane %v4350_v60, 9  ;;  %v4380_v61 = vsel %vm7535_vm10, %v4379_v55, %v4369_v57 }
 0x6f6   : > { %v4381_v9 = vsel %vm3275_vm15, %v4379_v55, %v4380_v61 }
 0x6f7   : > { %v4617_v31 = vrot.slane %v4352_v63, 9  ;;  %v4371_v30 = vmax.f32 %v4350_v60, %v4616_v45  ;;  %v4382_v32 = vsel %vm3279_vm3, %v4379_v55, %v4381_v9 }
 0x6f8   : > { %v4383_v6 = vsel %vm3283_vm13, %v4379_v55, %v4382_v32 }
 0x6f9   : > { %v4372_v53 = vmax.f32 %v4352_v63, %v4617_v31 }
 0x6fb   : > { %v4386_v0 = vrot.slane %v4372_v53, 7 }
 0x6fd   : > { %v4387_v56 = vsel %vm7536_vm2, %v4386_v0, %v4371_v30 }
 0x6fe   : > { %v4388_v51 = vsel %vm3275_vm15, %v4386_v0, %v4387_v56 }
 0x6ff   : > { %v4389_v29 = vsel %vm3279_vm3, %v4386_v0, %v4388_v51 }
 0x700   : > { %v4390_v46 = vsel %vm3283_vm13, %v4386_v0, %v4389_v29 }
 0x701   : > { %v4393_v54 = vrot.slane %v4390_v46, 4 }
 0x703   : > { %v4394_v23 = vsel %vm7537_vm7, %v4393_v54, %v4383_v6 }
 0x704   : > { %v4398_v43 = vperm.slane %v4394_v23, %v7538_v26 }
 0x706   : > { %v4399_v58 = vrot.slane %v4398_v43, 4 }
 0x708   : > { %v4400_v22 = vsel %vm7539_vm9, 0.0, %v4399_v58 }
 0x709   : > { %4402 = vst [vmem:[#allocation1] ss:$4 sm:$0xff] %v4400_v22 }
 0x710   : > { %v4403_v59 = vld.sshfl [vmem:[#allocation1] sm:$0xff pattern:$0x73625140] }
 0x711   : > { %4404 = vrot.lane.b32.xlu2 %v4403_v59, %s4940_s22  ;;  %s4865_s22 = scalar_lea.hbm %s4864_s16, 2 }
 0x712   : > { %p4866_p11 = scmp.ne.s32.totalorder %s4864_s16, %s4865_s22  ;;  %p4871_p1 = scmp.lt.s32.totalorder %s4869_s18, %s4865_s22 }
 0x714   : > { %p4867_p12 = pnand %p4866_p11, %p5024_p5  ;;  %p4872_p2 = por %p4871_p1, %p4870_p0 }
 0x716   : > { %p4868_p13 = pneg %p4867_p12 }
 0x718   : > { %p4873_p3 = pnand %p4872_p2, %p4868_p13 }
 0x76b   : > { %v4405_v16 = vpop.permute.xlu2 %4404 }
 0x76c   : > { %v4407_v37 = vsel %vm3674_vm8, %v4398_v43, %v4405_v16 }
 0x76d   : > { %4408 = vst [vmem:[%s271_s13] sm:$0x3] %v4407_v37 }
 0x76e   : > { %4876 = shalt.err (!%p4873_p3)
}
 0x76f   : > { %4635 = dma.vmem_to_hbm [thread:$0]  (%p5024_p5), %s4423_s9, 32, %s4425_s14, %s4410_s15  }
 0x770 PF: > { %p4641_p4 = scmp.ge.s32.totalorder %s4911_s27, 2  ;;  %s4436_s21 = sand.u32 1, %s4899_s24  }
 0x771   : > { %s4437_s20 = scalar_lea.sflag [#allocation6], %s4436_s21 }
 0x772   : > { %p4638_p7 = pnand %p4641_p4, %p5028_p6 }
 0x774   : > { %p4639_p8 = pneg %p4638_p7 }
 0x776   : > { %4894 = dma.done.wait (%p4639_p8), %s4437_s20, 32  }
 0x777   : > { %4896 = vsyncadd (%p4639_p8), %s4437_s20, 4294967264  ;;  %p17_p9 = scmp.ge.s32.totalorder %s5011_s30, 4   ;;  %s7540_s24 = smov %s4903_s25 }
 0x778   : > { %s7541_s25 = smov %s4907_s26  ;;  %s7542_s26 = smov %s5022_s10 }
 0x779   : > { %s7543_s27 = smov %s5011_s30  ;;  %19 = sbr.rel (!%p17_p9) target bundleno = 3 (0x3), region = 99 }
 0x77e   :  { %4443 = vsyncpa [#allocation6], 1 }
 0x77f   :  { %4445 = vsyncpa [#allocation6 + $0x1], 1 }

</bundles_post_ra>
